<compile_context>
chip_gen: v7x
topology: tpu7x:2x2x1
jax: 0.10.0
libtpu: 0.0.40
codegen_flags: <defaults>
</compile_context>

<pallas_src>
import functools

import jax
import jax.numpy as jnp
from jax import lax
from jax.experimental import pallas as pl
from jax.experimental.pallas import tpu as pltpu


_VMEM_LIMIT = 32 * 1024 * 1024   # explicit scoped-VMEM limit, safe on v5e/v6e/v7x


def _round_up(x, n):
    return ((x + n - 1) // n) * n


# ----------------------------------------------------------------------------
# Kernel 1: similarity accumulation + greedy unique-argmax matching
#   v: (BT_pad, m_pad), a/f: (BT_pad, o_pad)  ->  idx: (2, m_pad) int32
# ----------------------------------------------------------------------------
def _match_kernel(v_ref, a_ref, f_ref, idx_ref, sim_a_ref, sim_f_ref, vsq_ref,
                  *, n_real_cols, o_m):
    @pl.when(pl.program_id(0) == 0)
    def _():
        sim_a_ref[...] = jnp.zeros_like(sim_a_ref)
        sim_f_ref[...] = jnp.zeros_like(sim_f_ref)
        vsq_ref[...] = jnp.zeros_like(vsq_ref)

    v = v_ref[...]                         # (TR, m_pad)
    a = a_ref[...]                         # (TR, o_pad)
    f = f_ref[...]                         # (TR, o_pad)

    # Contract over the row axis directly on the MXU (no wrapper transpose).
    dn = (((0,), (0,)), ((), ()))
    sim_a_ref[...] += lax.dot_general(a, v, dn, preferred_element_type=jnp.float32)
    sim_f_ref[...] += lax.dot_general(f, v, dn, preferred_element_type=jnp.float32)
    vsq_ref[...] += jnp.sum(v * v, axis=0, keepdims=True)

    @pl.when(pl.program_id(0) == pl.num_programs(0) - 1)
    def _():
        m_pad = idx_ref.shape[1]
        # F.normalize(V, dim=0) folded in as a per-column post-scale of the
        # similarity.  A/F column norms are skipped: a positive per-row scale
        # does not change the per-row argmax (sim values are never output).
        inv_vn = 1.0 / jnp.maximum(jnp.sqrt(vsq_ref[...]), 1e-12)    # (1, m_pad)

        lane_i = lax.broadcasted_iota(jnp.int32, (1, m_pad), 1)
        lane_f = lane_i.astype(jnp.float32)
        # Padded V columns (lane >= m) are never valid match candidates.
        used0 = jnp.where(lane_i >= n_real_cols, 1.0, 0.0)

        # Merged greedy loops for A and F (two independent XLU dependency
        # chains interleave); fully unrolled (o_m is static and small).
        def body(i, carry):
            used_a, used_f, idx_a, idx_f = carry
            row_a = sim_a_ref[pl.ds(i, 1), :] * inv_vn     # dynamic row load
            row_f = sim_f_ref[pl.ds(i, 1), :] * inv_vn
            row_a = jnp.where(used_a > 0.5, -jnp.inf, row_a)
            row_f = jnp.where(used_f > 0.5, -jnp.inf, row_f)
            mx_a = jnp.max(row_a, axis=1, keepdims=True)
            mx_f = jnp.max(row_f, axis=1, keepdims=True)
            cand_a = jnp.min(jnp.where(row_a >= mx_a, lane_f, float(m_pad)),
                             axis=1, keepdims=True)        # first (lowest) argmax
            cand_f = jnp.min(jnp.where(row_f >= mx_f, lane_f, float(m_pad)),
                             axis=1, keepdims=True)
            used_a = jnp.where(lane_f == cand_a, 1.0, used_a)
            used_f = jnp.where(lane_f == cand_f, 1.0, used_f)
            idx_a = jnp.where(lane_i == i, cand_a, idx_a)
            idx_f = jnp.where(lane_i == i, cand_f, idx_f)
            return used_a, used_f, idx_a, idx_f

        init = (used0, used0,
                jnp.zeros((1, m_pad), jnp.float32),
                jnp.zeros((1, m_pad), jnp.float32))
        _, _, idx_a, idx_f = lax.fori_loop(0, o_m, body, init, unroll=True)

        row2 = lax.broadcasted_iota(jnp.int32, (2, m_pad), 0)
        idx_ref[...] = jnp.where(row2 == 0, idx_a, idx_f).astype(jnp.int32)


# ----------------------------------------------------------------------------
# Kernel 2: fused loss (tiled over B*T rows, packed (1, 128) output)
#   lanes: [0]=cos_total [1]=ce_total [2]=a_loss [3]=f_loss [4]=raf_loss [5]=trip
# ----------------------------------------------------------------------------
def _loss_kernel(ext_ref, v_ref, a_ref, f_ref, pr_ref, mil_ref, apn_ref,
                 out_ref, acc_ref, *, n_rows, tile_rows, o_pad, m_pad, bsz):
    step = pl.program_id(0)
    base = step * tile_rows
    lane128 = lax.broadcasted_iota(jnp.int32, (1, 128), 1)

    @pl.when(step == 0)
    def _():
        acc_ref[...] = jnp.zeros_like(acc_ref)

    # ---- matched-column permutation as one-hot MXU matmuls (compact A/F
    #      read from HBM; the padded tensors never round-trip) --------------
    ext = ext_ref[...]                                     # (2, m_pad) int32
    row_o = lax.broadcasted_iota(jnp.int32, (o_pad, m_pad), 0)
    p_a = (row_o == ext[0:1, :]).astype(jnp.float32)       # one-hot (o_pad, m_pad)
    p_f = (row_o == ext[1:2, :]).astype(jnp.float32)

    v = v_ref[...]                                         # (TR, m_pad)
    a = a_ref[...]                                         # (TR, o_pad)
    f = f_ref[...]
    pa = jnp.dot(a, p_a, preferred_element_type=jnp.float32)   # permuted A
    pf = jnp.dot(f, p_f, preferred_element_type=jnp.float32)   # permuted F

    # ---- cosine alignment terms (row norms of the permuted tensors equal
    #      the compact row norms, so compute them on the narrow operands) ---
    sub_ids = lax.broadcasted_iota(jnp.int32, (tile_rows, 1), 0) + base
    valid_sub = (sub_ids < n_rows).astype(jnp.float32)     # mask padded rows
    n_v = jnp.sqrt(jnp.sum(v * v, axis=1, keepdims=True))
    n_a = jnp.sqrt(jnp.sum(a * a, axis=1, keepdims=True))
    n_f = jnp.sqrt(jnp.sum(f * f, axis=1, keepdims=True))

    def cos(x, y, nx, ny):
        return (jnp.sum(x * y, axis=1, keepdims=True)
                / jnp.maximum(nx * ny, 1e-8))              # torch CosSim eps

    cos_rows = (3.0 - cos(v, pa, n_v, n_a) - cos(v, pf, n_v, n_f)
                - cos(pa, pf, n_a, n_f))
    cos_step = jnp.sum(valid_sub * cos_rows, axis=0, keepdims=True)     # (1, 1)

    # ---- clamped cross-entropies on the lane-dense (4, TR) prob slab ------
    # ce_VA + ce_VF folded into one pass (both use q = V); masked (padded
    # sequence) frames are zeroed then clamped to eps, matching torch.
    eps = 1e-6
    lane_ids = lax.broadcasted_iota(jnp.int32, (1, tile_rows), 1) + base
    valid_lane = (lane_ids < n_rows).astype(jnp.float32)
    pr = pr_ref[...]                                       # rows: vo, ao, fo, mask
    msk = pr[3:4, :]
    qv = jnp.clip(pr[0:1, :] * msk, eps, 1.0 - eps)
    qa = jnp.clip(pr[1:2, :] * msk, eps, 1.0 - eps)
    qf = jnp.clip(pr[2:3, :] * msk, eps, 1.0 - eps)
    log_v, log_1v = jnp.log(qv), jnp.log(1.0 - qv)
    log_a, log_1a = jnp.log(qa), jnp.log(1.0 - qa)
    paf = qa + qf
    ce_all = -(paf * log_v + (2.0 - paf) * log_1v
               + qf * log_a + (1.0 - qf) * log_1a)
    ce_step = jnp.sum(valid_lane * ce_all, axis=1, keepdims=True)       # (1, 1)

    acc_ref[...] += jnp.where(lane128 == 0, cos_step,
                              jnp.where(lane128 == 1, ce_step, 0.0))

    # ---- finalize: scale running sums, add MIL BCEs and triplet -----------
    @pl.when(step == pl.num_programs(0) - 1)
    def _():
        res = acc_ref[...] * (1.0 / n_rows)                # /(B*T) mean

        mil = mil_ref[...]                                 # (4, B): va, vf, vaf, label
        y = mil[3:4, :]

        def bce(x):                                        # torch BCELoss (log clamp -100)
            lx = jnp.maximum(jnp.log(x), -100.0)
            l1x = jnp.maximum(jnp.log(1.0 - x), -100.0)
            t = -(y * lx + (1.0 - y) * l1x)
            return jnp.sum(t, axis=1, keepdims=True) * (1.0 / bsz)

        a_loss = bce(mil[0:1, :])
        f_loss = bce(mil[1:2, :])
        raf_loss = bce(mil[2:3, :])

        apn = apn_ref[...]                                 # (3, D): anchor/pos/neg

        def l2n(x):                                        # eps guard avoids NaN on zeros
            return x / jnp.maximum(
                jnp.sqrt(jnp.sum(x * x, axis=1, keepdims=True)), 1e-12)

        an, po, ne = l2n(apn[0:1, :]), l2n(apn[1:2, :]), l2n(apn[2:3, :])
        teps = 1e-6                                        # torch pairwise_distance eps
        d_ap = jnp.sqrt(jnp.sum((an - po + teps) ** 2, axis=1, keepdims=True))
        d_an = jnp.sqrt(jnp.sum((an - ne + teps) ** 2, axis=1, keepdims=True))
        trip = jnp.maximum(d_ap - d_an + 5.0, 0.0)         # margin=5

        res = jnp.where(lane128 == 2, a_loss, res)
        res = jnp.where(lane128 == 3, f_loss, res)
        res = jnp.where(lane128 == 4, raf_loss, res)
        res = jnp.where(lane128 == 5, trip, res)
        out_ref[...] = res


# ----------------------------------------------------------------------------
# Triplet anchor / positive / negative selection (tiny gather work, plain JAX)
# ----------------------------------------------------------------------------
def _triplet_vectors(vaf_result, label, seq_len):
    sigout = vaf_result['avf_out']       # (B, T)
    feature = vaf_result['satt_f']       # (B, T, D)
    B, T, _ = feature.shape

    valid = jnp.arange(T)[None, :] < seq_len[:, None]
    w_valid = valid.astype(jnp.float32)
    is_norm = (label == 0).astype(jnp.float32)
    is_abn = (label == 1).astype(jnp.float32)

    # anchor: per-normal-sample mean over valid frames, averaged over normals
    anchor_i = jnp.sum(feature * w_valid[:, :, None], axis=1) / jnp.maximum(
        jnp.sum(w_valid, axis=1, keepdims=True), 1.0)
    anchor = jnp.sum(anchor_i * is_norm[:, None], axis=0) / jnp.maximum(
        jnp.sum(is_norm), 1.0)

    # k = seq_len // 16 + 1 lowest / highest scoring valid frames (bounded top_k)
    k_max = T // 16 + 1
    k = (seq_len // 16 + 1).astype(jnp.float32)
    w_k = (jnp.arange(k_max)[None, :].astype(jnp.float32)
           < k[:, None]).astype(jnp.float32)

    _, idx_hi = lax.top_k(jnp.where(valid, sigout, -jnp.inf), k_max)
    feat_hi = jnp.take_along_axis(feature, idx_hi[:, :, None], axis=1)
    neg_i = jnp.sum(feat_hi * w_k[:, :, None], axis=1) / k[:, None]

    _, idx_lo = lax.top_k(jnp.where(valid, -sigout, -jnp.inf), k_max)
    feat_lo = jnp.take_along_axis(feature, idx_lo[:, :, None], axis=1)
    pos_i = jnp.sum(feat_lo * w_k[:, :, None], axis=1) / k[:, None]

    positive = jnp.sum(pos_i * is_abn[:, None], axis=0) / jnp.maximum(
        jnp.sum(is_abn), 1.0)
    negative = jnp.sum(neg_i * is_abn[:, None], axis=0) / jnp.maximum(
        jnp.sum(is_abn), 1.0)
    return anchor, positive, negative


# ----------------------------------------------------------------------------
# DISL_Loss forward
# ----------------------------------------------------------------------------
def disl_loss(v_result, va_result, vf_result, vaf_result, label, seq_len,
              lamda1, lamda2, lamda3):
    label = label.astype(jnp.float32)

    V = lax.stop_gradient(v_result['satt_f'])     # torch .detach()
    A = va_result['satt_f']
    Fm = vf_result['satt_f']
    B, T, m = V.shape
    o_m = A.shape[-1]
    assert Fm.shape[-1] == o_m and o_m <= m, \
        "match_sparsify requires O_m <= max_features"

    BT = B * T
    m_pad = _round_up(m, 128)                     # lane-dense feature dims
    o_pad = _round_up(o_m, 128)

    # Row tile: big enough to amortize per-step overhead, small enough to fit
    # double-buffered inputs well inside the 32 MiB scoped-VMEM limit (safe
    # for v7x's 64 MiB physical VMEM; v6e/v5e have headroom).
    bytes_per_row = 4 * (m_pad + 2 * o_pad)
    max_rows = max(8, ((6 * 1024 * 1024) // bytes_per_row) // 8 * 8)
    TR = min(512, max_rows, _round_up(BT, 8))
    BT_pad = _round_up(BT, TR)
    grid = (BT_pad // TR,)

    def pad2(x, rows, cols):
        r, c = x.shape
        return jnp.pad(x, ((0, rows - r), (0, cols - c)))

    # TODO(synk): for v5e, accept bf16 V/A/F storage and upcast in-kernel to
    # halve HBM bytes (compute stays f32).
    v_flat = pad2(V.reshape(BT, m), BT_pad, m_pad)
    a_flat = pad2(A.reshape(BT, o_m), BT_pad, o_pad)
    f_flat = pad2(Fm.reshape(BT, o_m), BT_pad, o_pad)

    # ------------------ kernel 1: greedy matching -------------------------
    idx = pl.pallas_call(
        functools.partial(_match_kernel, n_real_cols=m, o_m=o_m),
        out_shape=jax.ShapeDtypeStruct((2, m_pad), jnp.int32),
        grid=grid,
        in_specs=[pl.BlockSpec((TR, m_pad), lambda r: (r, 0)),
                  pl.BlockSpec((TR, o_pad), lambda r: (r, 0)),
                  pl.BlockSpec((TR, o_pad), lambda r: (r, 0))],
        out_specs=pl.BlockSpec((2, m_pad), lambda r: (0, 0)),
        scratch_shapes=[pltpu.VMEM((o_pad, m_pad), jnp.float32),
                        pltpu.VMEM((o_pad, m_pad), jnp.float32),
                        pltpu.VMEM((1, m_pad), jnp.float32)],
        compiler_params=pltpu.CompilerParams(
            dimension_semantics=("arbitrary",),
            vmem_limit_bytes=_VMEM_LIMIT),
    )(v_flat, a_flat, f_flat)

    # Full extended permutation (torch: matched ++ sorted unused indices);
    # tiny integer work on (2, m), stays in plain JAX.
    def extend(matched_row):
        matched = matched_row[:o_m]
        used = jnp.zeros((m,), bool).at[matched].set(True)
        remaining = jnp.sort(jnp.where(used, m, jnp.arange(m)))[: m - o_m]
        return jnp.concatenate([matched, remaining.astype(jnp.int32)])

    ext = jnp.stack([extend(idx[0]), extend(idx[1])], axis=0)         # (2, m)
    ext = jnp.pad(ext, ((0, 0), (0, m_pad - m)), constant_values=-1)

    # Lane-dense probability slab: rows [vo, ao, fo, seq_mask] of length B*T.
    seq_matrix = (jnp.arange(T)[None, :] < seq_len[:, None]).astype(jnp.float32)
    vo = lax.stop_gradient(v_result['avf_out'])
    probs = jnp.stack([vo.reshape(-1),
                       va_result['avf_out'].reshape(-1),
                       vf_result['avf_out'].reshape(-1),
                       seq_matrix.reshape(-1)], axis=0)               # (4, BT)
    probs = jnp.pad(probs, ((0, 0), (0, BT_pad - BT)))

    mil = jnp.stack([va_result['output'], vf_result['output'],
                     vaf_result['output'], label], axis=0)            # (4, B)
    anchor, positive, negative = _triplet_vectors(vaf_result, label, seq_len)
    apn = jnp.stack([anchor, positive, negative], axis=0)             # (3, D)
    D = apn.shape[1]

    # ------------------ kernel 2: fused loss reductions --------------------
    # TODO(synk): on v7x, add a leading "parallel" grid axis (per-core partial
    # (1, 128) outputs summed in the wrapper) to occupy the second TensorCore.
    out = pl.pallas_call(
        functools.partial(_loss_kernel, n_rows=BT, tile_rows=TR,
                          o_pad=o_pad, m_pad=m_pad, bsz=B),
        out_shape=jax.ShapeDtypeStruct((1, 128), jnp.float32),
        grid=grid,
        in_specs=[pl.BlockSpec((2, m_pad), lambda r: (0, 0)),
                  pl.BlockSpec((TR, m_pad), lambda r: (r, 0)),
                  pl.BlockSpec((TR, o_pad), lambda r: (r, 0)),
                  pl.BlockSpec((TR, o_pad), lambda r: (r, 0)),
                  pl.BlockSpec((4, TR), lambda r: (0, r)),
                  pl.BlockSpec((4, B), lambda r: (0, 0)),
                  pl.BlockSpec((3, D), lambda r: (0, 0))],
        out_specs=pl.BlockSpec((1, 128), lambda r: (0, 0)),
        scratch_shapes=[pltpu.VMEM((1, 128), jnp.float32)],
        compiler_params=pltpu.CompilerParams(
            dimension_semantics=("arbitrary",),
            vmem_limit_bytes=_VMEM_LIMIT),
    )(ext, v_flat, a_flat, f_flat, probs, mil, apn)[0]

    cos_total, ce_total = out[0], out[1]
    a_loss, f_loss, raf_loss, trip = out[2], out[3], out[4], out[5]

    ma_loss = cos_total + ce_total + 0.01 * (a_loss + f_loss)
    s = jnp.sum(label)
    triplet_loss = jnp.where((s == 0) | (s == label.shape[0]), 0.0, trip)

    total_loss = lamda1 * ma_loss + lamda2 * raf_loss + lamda3 * triplet_loss
    loss_dict = {
        'MA_loss': ma_loss,
        'M_MIL_loss': raf_loss,
        'Triplet_loss': triplet_loss,
    }
    return total_loss, loss_dict


# ----------------------------------------------------------------------------
# Example
# ----------------------------------------------------------------------------
if __name__ == "__main__":
    B, T, M, O_M, D = 4, 8, 32, 16, 32   # batch, time, V feats, A/F feats, vaf feats
    key = jax.random.PRNGKey(0)
    ks = jax.random.split(key, 12)
    sig = jax.nn.sigmoid

    v_result = {
        'output': sig(jax.random.normal(ks[0], (B,), jnp.float32)),
        'satt_f': jax.random.normal(ks[1], (B, T, M), jnp.float32),
        'avf_out': sig(jax.random.normal(ks[2], (B, T), jnp.float32)),
    }
    va_result = {
        'output': sig(jax.random.normal(ks[3], (B,), jnp.float32)),
        'satt_f': jax.random.normal(ks[4], (B, T, O_M), jnp.float32),
        'avf_out': sig(jax.random.normal(ks[5], (B, T), jnp.float32)),
    }
    vf_result = {
        'output': sig(jax.random.normal(ks[6], (B,), jnp.float32)),
        'satt_f': jax.random.normal(ks[7], (B, T, O_M), jnp.float32),
        'avf_out': sig(jax.random.normal(ks[8], (B, T), jnp.float32)),
    }
    vaf_result = {
        'output': sig(jax.random.normal(ks[9], (B,), jnp.float32)),
        'satt_f': jax.random.normal(ks[10], (B, T, D), jnp.float32),
        'avf_out': sig(jax.random.normal(ks[11], (B, T), jnp.float32)),
    }
    label = jnp.array([0.0, 1.0, 0.0, 1.0], jnp.float32)     # mixed classes
    seq_len = jnp.array([8, 5, 8, 6], jnp.int32)             # max(seq_len) == T

    loss_fn = jax.jit(disl_loss)
    total, loss_dict = loss_fn(v_result, va_result, vf_result, vaf_result,
                               label, seq_len, 1.0, 1.0, 1.0)
    total = jax.block_until_ready(total)
    _ = jax.block_until_ready(loss_dict['MA_loss'])
    _ = jax.block_until_ready(loss_dict['Triplet_loss'])
    print("KERNEL_OK")
</pallas_src>

<mosaic_0001>
module attributes {stable_mosaic.version = 11 : i64} {
  func.func @_match_kernel(%arg0: i32, %arg1: memref<32x128xf32, #tpu.memory_space<vmem>>, %arg2: memref<32x128xf32, #tpu.memory_space<vmem>>, %arg3: memref<32x128xf32, #tpu.memory_space<vmem>>, %arg4: memref<2x128xi32, #tpu.memory_space<vmem>>, %arg5: memref<128x128xf32, #tpu.memory_space<vmem>>, %arg6: memref<128x128xf32, #tpu.memory_space<vmem>>, %arg7: memref<1x128xf32, #tpu.memory_space<vmem>>) attributes {dimension_semantics = [#tpu.dimension_semantics<arbitrary>], iteration_bounds = array<i64: 1>, scalar_prefetch = 0 : i64, scratch_operands = 3 : i64, tpu.core_type = #tpu.core_type<tc>, window_params = [{transform_indices = @transform_0, window_bounds = array<i64: 32, 128>}, {transform_indices = @transform_1, window_bounds = array<i64: 32, 128>}, {transform_indices = @transform_2, window_bounds = array<i64: 32, 128>}, {pipeline_mode = #tpu.pipeline_mode<synchronous>, transform_indices = @transform_3, window_bounds = array<i64: 2, 128>}]} {
    %c0_i32 = arith.constant 0 : i32
    %0 = arith.cmpi eq, %arg0, %c0_i32 : i32
    %1 = arith.extui %0 : i1 to i32
    %c0_i32_0 = arith.constant 0 : i32
    %2 = arith.cmpi ne, %1, %c0_i32_0 : i32
    scf.if %2 {
      %cst_22 = arith.constant 0.000000e+00 : f32
      %23 = vector.broadcast %cst_22 : f32 to vector<128x128xf32>
      %c0_23 = arith.constant 0 : index
      %c0_24 = arith.constant 0 : index
      %24 = vector.load %arg5[%c0_23, %c0_24] : memref<128x128xf32, #tpu.memory_space<vmem>>, vector<128x128xf32>
      tpu.vector_store %arg5[%c0_23, %c0_24], %23 {strides = array<i32>} : memref<128x128xf32, #tpu.memory_space<vmem>>, vector<128x128xf32>,
      %cst_25 = arith.constant 0.000000e+00 : f32
      %25 = vector.broadcast %cst_25 : f32 to vector<128x128xf32>
      %c0_26 = arith.constant 0 : index
      %c0_27 = arith.constant 0 : index
      %26 = vector.load %arg6[%c0_26, %c0_27] : memref<128x128xf32, #tpu.memory_space<vmem>>, vector<128x128xf32>
      tpu.vector_store %arg6[%c0_26, %c0_27], %25 {strides = array<i32>} : memref<128x128xf32, #tpu.memory_space<vmem>>, vector<128x128xf32>,
      %cst_28 = arith.constant 0.000000e+00 : f32
      %27 = vector.broadcast %cst_28 : f32 to vector<1x128xf32>
      %c0_29 = arith.constant 0 : index
      %c0_30 = arith.constant 0 : index
      %28 = vector.load %arg7[%c0_29, %c0_30] : memref<1x128xf32, #tpu.memory_space<vmem>>, vector<1x128xf32>
      tpu.vector_store %arg7[%c0_29, %c0_30], %27 {strides = array<i32>} : memref<1x128xf32, #tpu.memory_space<vmem>>, vector<1x128xf32>,
    } else {
    }
    %c0 = arith.constant 0 : index
    %c0_1 = arith.constant 0 : index
    %3 = vector.load %arg1[%c0, %c0_1] : memref<32x128xf32, #tpu.memory_space<vmem>>, vector<32x128xf32>
    %c0_2 = arith.constant 0 : index
    %c0_3 = arith.constant 0 : index
    %4 = vector.load %arg2[%c0_2, %c0_3] : memref<32x128xf32, #tpu.memory_space<vmem>>, vector<32x128xf32>
    %c0_4 = arith.constant 0 : index
    %c0_5 = arith.constant 0 : index
    %5 = vector.load %arg3[%c0_4, %c0_5] : memref<32x128xf32, #tpu.memory_space<vmem>>, vector<32x128xf32>
    %c0_6 = arith.constant 0 : index
    %c0_7 = arith.constant 0 : index
    %6 = vector.load %arg5[%c0_6, %c0_7] : memref<128x128xf32, #tpu.memory_space<vmem>>, vector<128x128xf32>
    %cst = arith.constant dense<0.000000e+00> : vector<128x128xf32>
    %7 = tpu.matmul %4, %3, %cst {dimension_numbers = #tpu.dot_dimension_numbers<[0], [0], [1], [1], [0, 1, 1, 1], [], []>} : vector<32x128xf32>, vector<32x128xf32>, vector<128x128xf32> -> vector<128x128xf32>
    %8 = arith.addf %6, %7 : vector<128x128xf32>
    %c0_8 = arith.constant 0 : index
    %c0_9 = arith.constant 0 : index
    %9 = vector.load %arg5[%c0_8, %c0_9] : memref<128x128xf32, #tpu.memory_space<vmem>>, vector<128x128xf32>
    tpu.vector_store %arg5[%c0_8, %c0_9], %8 {strides = array<i32>} : memref<128x128xf32, #tpu.memory_space<vmem>>, vector<128x128xf32>,
    %c0_10 = arith.constant 0 : index
    %c0_11 = arith.constant 0 : index
    %10 = vector.load %arg6[%c0_10, %c0_11] : memref<128x128xf32, #tpu.memory_space<vmem>>, vector<128x128xf32>
    %cst_12 = arith.constant dense<0.000000e+00> : vector<128x128xf32>
    %11 = tpu.matmul %5, %3, %cst_12 {dimension_numbers = #tpu.dot_dimension_numbers<[0], [0], [1], [1], [0, 1, 1, 1], [], []>} : vector<32x128xf32>, vector<32x128xf32>, vector<128x128xf32> -> vector<128x128xf32>
    %12 = arith.addf %10, %11 : vector<128x128xf32>
    %c0_13 = arith.constant 0 : index
    %c0_14 = arith.constant 0 : index
    %13 = vector.load %arg6[%c0_13, %c0_14] : memref<128x128xf32, #tpu.memory_space<vmem>>, vector<128x128xf32>
    tpu.vector_store %arg6[%c0_13, %c0_14], %12 {strides = array<i32>} : memref<128x128xf32, #tpu.memory_space<vmem>>, vector<128x128xf32>,
    %c0_15 = arith.constant 0 : index
    %c0_16 = arith.constant 0 : index
    %14 = vector.load %arg7[%c0_15, %c0_16] : memref<1x128xf32, #tpu.memory_space<vmem>>, vector<1x128xf32>
    %15 = arith.mulf %3, %3 : vector<32x128xf32>
    %cst_17 = arith.constant dense<0.000000e+00> : vector<128xf32>
    %16 = vector.multi_reduction <add>, %15, %cst_17 [0] : vector<32x128xf32> to vector<128xf32>
    %17 = vector.shape_cast %16 : vector<128xf32> to vector<1x128xf32>
    %18 = arith.addf %14, %17 : vector<1x128xf32>
    %c0_18 = arith.constant 0 : index
    %c0_19 = arith.constant 0 : index
    %19 = vector.load %arg7[%c0_18, %c0_19] : memref<1x128xf32, #tpu.memory_space<vmem>>, vector<1x128xf32>
    tpu.vector_store %arg7[%c0_18, %c0_19], %18 {strides = array<i32>} : memref<1x128xf32, #tpu.memory_space<vmem>>, vector<1x128xf32>,
    %c0_i32_20 = arith.constant 0 : i32
    %20 = arith.cmpi eq, %arg0, %c0_i32_20 : i32
    %21 = arith.extui %20 : i1 to i32
    %c0_i32_21 = arith.constant 0 : i32
    %22 = arith.cmpi ne, %21, %c0_i32_21 : i32
    scf.if %22 {
      %c0_22 = arith.constant 0 : index
      %c0_23 = arith.constant 0 : index
      %23 = vector.load %arg7[%c0_22, %c0_23] : memref<1x128xf32, #tpu.memory_space<vmem>>, vector<1x128xf32>
      %24 = math.sqrt %23 : vector<1x128xf32>
      %cst_24 = arith.constant 9.99999996E-13 : f32
      %25 = vector.broadcast %cst_24 : f32 to vector<1x128xf32>
      %26 = arith.maximumf %24, %25 : vector<1x128xf32>
      %cst_25 = arith.constant 1.000000e+00 : f32
      %27 = vector.broadcast %cst_25 : f32 to vector<1x128xf32>
      %28 = arith.divf %27, %26 : vector<1x128xf32>
      %29 = tpu.iota {dimensions = array<i32: 1>} : vector<1x128xi32>
      %30 = arith.sitofp %29 : vector<1x128xi32> to vector<1x128xf32>
      %c32_i32 = arith.constant 32 : i32
      %31 = vector.broadcast %c32_i32 : i32 to vector<1x128xi32>
      %32 = arith.cmpi sge, %29, %31 : vector<1x128xi32>
      %cst_26 = arith.constant 1.000000e+00 : f32
      %cst_27 = arith.constant 0.000000e+00 : f32
      %33 = vector.broadcast %cst_26 : f32 to vector<1x128xf32>
      %34 = vector.broadcast %cst_27 : f32 to vector<1x128xf32>
      %35 = arith.select %32, %33, %34 : vector<1x128xi1>, vector<1x128xf32>
      %cst_28 = arith.constant 0.000000e+00 : f32
      %36 = vector.broadcast %cst_28 : f32 to vector<1x128xf32>
      %cst_29 = arith.constant 0.000000e+00 : f32
      %37 = vector.broadcast %cst_29 : f32 to vector<1x128xf32>
      %c0_i32_30 = arith.constant 0 : i32
      %38 = arith.index_cast %c0_i32_30 : i32 to index
      %c0_31 = arith.constant 0 : index
      %39 = vector.load %arg5[%38, %c0_31] : memref<128x128xf32, #tpu.memory_space<vmem>>, vector<1x128xf32>
      %40 = arith.mulf %39, %28 : vector<1x128xf32>
      %41 = arith.index_cast %c0_i32_30 : i32 to index
      %c0_32 = arith.constant 0 : index
      %42 = vector.load %arg6[%41, %c0_32] : memref<128x128xf32, #tpu.memory_space<vmem>>, vector<1x128xf32>
      %43 = arith.mulf %42, %28 : vector<1x128xf32>
      %cst_33 = arith.constant 5.000000e-01 : f32
      %44 = vector.broadcast %cst_33 : f32 to vector<1x128xf32>
      %45 = arith.cmpf ogt, %35, %44 : vector<1x128xf32>
      %cst_34 = arith.constant 0xFF800000 : f32
      %46 = vector.broadcast %cst_34 : f32 to vector<1x128xf32>
      %47 = arith.select %45, %46, %40 : vector<1x128xi1>, vector<1x128xf32>
      %cst_35 = arith.constant 5.000000e-01 : f32
      %48 = vector.broadcast %cst_35 : f32 to vector<1x128xf32>
      %49 = arith.cmpf ogt, %35, %48 : vector<1x128xf32>
      %cst_36 = arith.constant 0xFF800000 : f32
      %50 = vector.broadcast %cst_36 : f32 to vector<1x128xf32>
      %51 = arith.select %49, %50, %43 : vector<1x128xi1>, vector<1x128xf32>
      %cst_37 = arith.constant dense<0xFF800000> : vector<1xf32>
      %52 = vector.multi_reduction <maximumf>, %47, %cst_37 [1] : vector<1x128xf32> to vector<1xf32>
      %53 = vector.shape_cast %52 : vector<1xf32> to vector<1x1xf32>
      %cst_38 = arith.constant dense<0xFF800000> : vector<1xf32>
      %54 = vector.multi_reduction <maximumf>, %51, %cst_38 [1] : vector<1x128xf32> to vector<1xf32>
      %55 = vector.shape_cast %54 : vector<1xf32> to vector<1x1xf32>
      %56 = vector.broadcast %53 : vector<1x1xf32> to vector<1x128xf32>
      %57 = arith.cmpf oge, %47, %56 : vector<1x128xf32>
      %cst_39 = arith.constant 1.280000e+02 : f32
      %58 = vector.broadcast %cst_39 : f32 to vector<1x128xf32>
      %59 = arith.select %57, %30, %58 : vector<1x128xi1>, vector<1x128xf32>
      %cst_40 = arith.constant dense<0x7F800000> : vector<1xf32>
      %60 = vector.multi_reduction <minimumf>, %59, %cst_40 [1] : vector<1x128xf32> to vector<1xf32>
      %61 = vector.shape_cast %60 : vector<1xf32> to vector<1x1xf32>
      %62 = vector.broadcast %55 : vector<1x1xf32> to vector<1x128xf32>
      %63 = arith.cmpf oge, %51, %62 : vector<1x128xf32>
      %cst_41 = arith.constant 1.280000e+02 : f32
      %64 = vector.broadcast %cst_41 : f32 to vector<1x128xf32>
      %65 = arith.select %63, %30, %64 : vector<1x128xi1>, vector<1x128xf32>
      %cst_42 = arith.constant dense<0x7F800000> : vector<1xf32>
      %66 = vector.multi_reduction <minimumf>, %65, %cst_42 [1] : vector<1x128xf32> to vector<1xf32>
      %67 = vector.shape_cast %66 : vector<1xf32> to vector<1x1xf32>
      %68 = vector.broadcast %61 : vector<1x1xf32> to vector<1x128xf32>
      %69 = arith.cmpf oeq, %30, %68 : vector<1x128xf32>
      %cst_43 = arith.constant 1.000000e+00 : f32
      %70 = vector.broadcast %cst_43 : f32 to vector<1x128xf32>
      %71 = arith.select %69, %70, %35 : vector<1x128xi1>, vector<1x128xf32>
      %72 = vector.broadcast %67 : vector<1x1xf32> to vector<1x128xf32>
      %73 = arith.cmpf oeq, %30, %72 : vector<1x128xf32>
      %cst_44 = arith.constant 1.000000e+00 : f32
      %74 = vector.broadcast %cst_44 : f32 to vector<1x128xf32>
      %75 = arith.select %73, %74, %35 : vector<1x128xi1>, vector<1x128xf32>
      %76 = vector.broadcast %c0_i32_30 : i32 to vector<1x128xi32>
      %77 = arith.cmpi eq, %29, %76 : vector<1x128xi32>
      %78 = vector.shape_cast %61 : vector<1x1xf32> to vector<1x1xf32>
      %79 = vector.broadcast %78 : vector<1x1xf32> to vector<1x128xf32>
      %80 = arith.select %77, %79, %36 : vector<1x128xi1>, vector<1x128xf32>
      %81 = vector.broadcast %c0_i32_30 : i32 to vector<1x128xi32>
      %82 = arith.cmpi eq, %29, %81 : vector<1x128xi32>
      %83 = vector.shape_cast %67 : vector<1x1xf32> to vector<1x1xf32>
      %84 = vector.broadcast %83 : vector<1x1xf32> to vector<1x128xf32>
      %85 = arith.select %82, %84, %37 : vector<1x128xi1>, vector<1x128xf32>
      %c1_i32 = arith.constant 1 : i32
      %86 = arith.index_cast %c1_i32 : i32 to index
      %c0_45 = arith.constant 0 : index
      %87 = vector.load %arg5[%86, %c0_45] : memref<128x128xf32, #tpu.memory_space<vmem>>, vector<1x128xf32>
      %88 = arith.mulf %87, %28 : vector<1x128xf32>
      %89 = arith.index_cast %c1_i32 : i32 to index
      %c0_46 = arith.constant 0 : index
      %90 = vector.load %arg6[%89, %c0_46] : memref<128x128xf32, #tpu.memory_space<vmem>>, vector<1x128xf32>
      %91 = arith.mulf %90, %28 : vector<1x128xf32>
      %cst_47 = arith.constant 5.000000e-01 : f32
      %92 = vector.broadcast %cst_47 : f32 to vector<1x128xf32>
      %93 = arith.cmpf ogt, %71, %92 : vector<1x128xf32>
      %cst_48 = arith.constant 0xFF800000 : f32
      %94 = vector.broadcast %cst_48 : f32 to vector<1x128xf32>
      %95 = arith.select %93, %94, %88 : vector<1x128xi1>, vector<1x128xf32>
      %cst_49 = arith.constant 5.000000e-01 : f32
      %96 = vector.broadcast %cst_49 : f32 to vector<1x128xf32>
      %97 = arith.cmpf ogt, %75, %96 : vector<1x128xf32>
      %cst_50 = arith.constant 0xFF800000 : f32
      %98 = vector.broadcast %cst_50 : f32 to vector<1x128xf32>
      %99 = arith.select %97, %98, %91 : vector<1x128xi1>, vector<1x128xf32>
      %cst_51 = arith.constant dense<0xFF800000> : vector<1xf32>
      %100 = vector.multi_reduction <maximumf>, %95, %cst_51 [1] : vector<1x128xf32> to vector<1xf32>
      %101 = vector.shape_cast %100 : vector<1xf32> to vector<1x1xf32>
      %cst_52 = arith.constant dense<0xFF800000> : vector<1xf32>
      %102 = vector.multi_reduction <maximumf>, %99, %cst_52 [1] : vector<1x128xf32> to vector<1xf32>
      %103 = vector.shape_cast %102 : vector<1xf32> to vector<1x1xf32>
      %104 = vector.broadcast %101 : vector<1x1xf32> to vector<1x128xf32>
      %105 = arith.cmpf oge, %95, %104 : vector<1x128xf32>
      %cst_53 = arith.constant 1.280000e+02 : f32
      %106 = vector.broadcast %cst_53 : f32 to vector<1x128xf32>
      %107 = arith.select %105, %30, %106 : vector<1x128xi1>, vector<1x128xf32>
      %cst_54 = arith.constant dense<0x7F800000> : vector<1xf32>
      %108 = vector.multi_reduction <minimumf>, %107, %cst_54 [1] : vector<1x128xf32> to vector<1xf32>
      %109 = vector.shape_cast %108 : vector<1xf32> to vector<1x1xf32>
      %110 = vector.broadcast %103 : vector<1x1xf32> to vector<1x128xf32>
      %111 = arith.cmpf oge, %99, %110 : vector<1x128xf32>
      %cst_55 = arith.constant 1.280000e+02 : f32
      %112 = vector.broadcast %cst_55 : f32 to vector<1x128xf32>
      %113 = arith.select %111, %30, %112 : vector<1x128xi1>, vector<1x128xf32>
      %cst_56 = arith.constant dense<0x7F800000> : vector<1xf32>
      %114 = vector.multi_reduction <minimumf>, %113, %cst_56 [1] : vector<1x128xf32> to vector<1xf32>
      %115 = vector.shape_cast %114 : vector<1xf32> to vector<1x1xf32>
      %116 = vector.broadcast %109 : vector<1x1xf32> to vector<1x128xf32>
      %117 = arith.cmpf oeq, %30, %116 : vector<1x128xf32>
      %cst_57 = arith.constant 1.000000e+00 : f32
      %118 = vector.broadcast %cst_57 : f32 to vector<1x128xf32>
      %119 = arith.select %117, %118, %71 : vector<1x128xi1>, vector<1x128xf32>
      %120 = vector.broadcast %115 : vector<1x1xf32> to vector<1x128xf32>
      %121 = arith.cmpf oeq, %30, %120 : vector<1x128xf32>
      %cst_58 = arith.constant 1.000000e+00 : f32
      %122 = vector.broadcast %cst_58 : f32 to vector<1x128xf32>
      %123 = arith.select %121, %122, %75 : vector<1x128xi1>, vector<1x128xf32>
      %124 = vector.broadcast %c1_i32 : i32 to vector<1x128xi32>
      %125 = arith.cmpi eq, %29, %124 : vector<1x128xi32>
      %126 = vector.shape_cast %109 : vector<1x1xf32> to vector<1x1xf32>
      %127 = vector.broadcast %126 : vector<1x1xf32> to vector<1x128xf32>
      %128 = arith.select %125, %127, %80 : vector<1x128xi1>, vector<1x128xf32>
      %129 = vector.broadcast %c1_i32 : i32 to vector<1x128xi32>
      %130 = arith.cmpi eq, %29, %129 : vector<1x128xi32>
      %131 = vector.shape_cast %115 : vector<1x1xf32> to vector<1x1xf32>
      %132 = vector.broadcast %131 : vector<1x1xf32> to vector<1x128xf32>
      %133 = arith.select %130, %132, %85 : vector<1x128xi1>, vector<1x128xf32>
      %c2_i32 = arith.constant 2 : i32
      %134 = arith.index_cast %c2_i32 : i32 to index
      %c0_59 = arith.constant 0 : index
      %135 = vector.load %arg5[%134, %c0_59] : memref<128x128xf32, #tpu.memory_space<vmem>>, vector<1x128xf32>
      %136 = arith.mulf %135, %28 : vector<1x128xf32>
      %137 = arith.index_cast %c2_i32 : i32 to index
      %c0_60 = arith.constant 0 : index
      %138 = vector.load %arg6[%137, %c0_60] : memref<128x128xf32, #tpu.memory_space<vmem>>, vector<1x128xf32>
      %139 = arith.mulf %138, %28 : vector<1x128xf32>
      %cst_61 = arith.constant 5.000000e-01 : f32
      %140 = vector.broadcast %cst_61 : f32 to vector<1x128xf32>
      %141 = arith.cmpf ogt, %119, %140 : vector<1x128xf32>
      %cst_62 = arith.constant 0xFF800000 : f32
      %142 = vector.broadcast %cst_62 : f32 to vector<1x128xf32>
      %143 = arith.select %141, %142, %136 : vector<1x128xi1>, vector<1x128xf32>
      %cst_63 = arith.constant 5.000000e-01 : f32
      %144 = vector.broadcast %cst_63 : f32 to vector<1x128xf32>
      %145 = arith.cmpf ogt, %123, %144 : vector<1x128xf32>
      %cst_64 = arith.constant 0xFF800000 : f32
      %146 = vector.broadcast %cst_64 : f32 to vector<1x128xf32>
      %147 = arith.select %145, %146, %139 : vector<1x128xi1>, vector<1x128xf32>
      %cst_65 = arith.constant dense<0xFF800000> : vector<1xf32>
      %148 = vector.multi_reduction <maximumf>, %143, %cst_65 [1] : vector<1x128xf32> to vector<1xf32>
      %149 = vector.shape_cast %148 : vector<1xf32> to vector<1x1xf32>
      %cst_66 = arith.constant dense<0xFF800000> : vector<1xf32>
      %150 = vector.multi_reduction <maximumf>, %147, %cst_66 [1] : vector<1x128xf32> to vector<1xf32>
      %151 = vector.shape_cast %150 : vector<1xf32> to vector<1x1xf32>
      %152 = vector.broadcast %149 : vector<1x1xf32> to vector<1x128xf32>
      %153 = arith.cmpf oge, %143, %152 : vector<1x128xf32>
      %cst_67 = arith.constant 1.280000e+02 : f32
      %154 = vector.broadcast %cst_67 : f32 to vector<1x128xf32>
      %155 = arith.select %153, %30, %154 : vector<1x128xi1>, vector<1x128xf32>
      %cst_68 = arith.constant dense<0x7F800000> : vector<1xf32>
      %156 = vector.multi_reduction <minimumf>, %155, %cst_68 [1] : vector<1x128xf32> to vector<1xf32>
      %157 = vector.shape_cast %156 : vector<1xf32> to vector<1x1xf32>
      %158 = vector.broadcast %151 : vector<1x1xf32> to vector<1x128xf32>
      %159 = arith.cmpf oge, %147, %158 : vector<1x128xf32>
      %cst_69 = arith.constant 1.280000e+02 : f32
      %160 = vector.broadcast %cst_69 : f32 to vector<1x128xf32>
      %161 = arith.select %159, %30, %160 : vector<1x128xi1>, vector<1x128xf32>
      %cst_70 = arith.constant dense<0x7F800000> : vector<1xf32>
      %162 = vector.multi_reduction <minimumf>, %161, %cst_70 [1] : vector<1x128xf32> to vector<1xf32>
      %163 = vector.shape_cast %162 : vector<1xf32> to vector<1x1xf32>
      %164 = vector.broadcast %157 : vector<1x1xf32> to vector<1x128xf32>
      %165 = arith.cmpf oeq, %30, %164 : vector<1x128xf32>
      %cst_71 = arith.constant 1.000000e+00 : f32
      %166 = vector.broadcast %cst_71 : f32 to vector<1x128xf32>
      %167 = arith.select %165, %166, %119 : vector<1x128xi1>, vector<1x128xf32>
      %168 = vector.broadcast %163 : vector<1x1xf32> to vector<1x128xf32>
      %169 = arith.cmpf oeq, %30, %168 : vector<1x128xf32>
      %cst_72 = arith.constant 1.000000e+00 : f32
      %170 = vector.broadcast %cst_72 : f32 to vector<1x128xf32>
      %171 = arith.select %169, %170, %123 : vector<1x128xi1>, vector<1x128xf32>
      %172 = vector.broadcast %c2_i32 : i32 to vector<1x128xi32>
      %173 = arith.cmpi eq, %29, %172 : vector<1x128xi32>
      %174 = vector.shape_cast %157 : vector<1x1xf32> to vector<1x1xf32>
      %175 = vector.broadcast %174 : vector<1x1xf32> to vector<1x128xf32>
      %176 = arith.select %173, %175, %128 : vector<1x128xi1>, vector<1x128xf32>
      %177 = vector.broadcast %c2_i32 : i32 to vector<1x128xi32>
      %178 = arith.cmpi eq, %29, %177 : vector<1x128xi32>
      %179 = vector.shape_cast %163 : vector<1x1xf32> to vector<1x1xf32>
      %180 = vector.broadcast %179 : vector<1x1xf32> to vector<1x128xf32>
      %181 = arith.select %178, %180, %133 : vector<1x128xi1>, vector<1x128xf32>
      %c3_i32 = arith.constant 3 : i32
      %182 = arith.index_cast %c3_i32 : i32 to index
      %c0_73 = arith.constant 0 : index
      %183 = vector.load %arg5[%182, %c0_73] : memref<128x128xf32, #tpu.memory_space<vmem>>, vector<1x128xf32>
      %184 = arith.mulf %183, %28 : vector<1x128xf32>
      %185 = arith.index_cast %c3_i32 : i32 to index
      %c0_74 = arith.constant 0 : index
      %186 = vector.load %arg6[%185, %c0_74] : memref<128x128xf32, #tpu.memory_space<vmem>>, vector<1x128xf32>
      %187 = arith.mulf %186, %28 : vector<1x128xf32>
      %cst_75 = arith.constant 5.000000e-01 : f32
      %188 = vector.broadcast %cst_75 : f32 to vector<1x128xf32>
      %189 = arith.cmpf ogt, %167, %188 : vector<1x128xf32>
      %cst_76 = arith.constant 0xFF800000 : f32
      %190 = vector.broadcast %cst_76 : f32 to vector<1x128xf32>
      %191 = arith.select %189, %190, %184 : vector<1x128xi1>, vector<1x128xf32>
      %cst_77 = arith.constant 5.000000e-01 : f32
      %192 = vector.broadcast %cst_77 : f32 to vector<1x128xf32>
      %193 = arith.cmpf ogt, %171, %192 : vector<1x128xf32>
      %cst_78 = arith.constant 0xFF800000 : f32
      %194 = vector.broadcast %cst_78 : f32 to vector<1x128xf32>
      %195 = arith.select %193, %194, %187 : vector<1x128xi1>, vector<1x128xf32>
      %cst_79 = arith.constant dense<0xFF800000> : vector<1xf32>
      %196 = vector.multi_reduction <maximumf>, %191, %cst_79 [1] : vector<1x128xf32> to vector<1xf32>
      %197 = vector.shape_cast %196 : vector<1xf32> to vector<1x1xf32>
      %cst_80 = arith.constant dense<0xFF800000> : vector<1xf32>
      %198 = vector.multi_reduction <maximumf>, %195, %cst_80 [1] : vector<1x128xf32> to vector<1xf32>
      %199 = vector.shape_cast %198 : vector<1xf32> to vector<1x1xf32>
      %200 = vector.broadcast %197 : vector<1x1xf32> to vector<1x128xf32>
      %201 = arith.cmpf oge, %191, %200 : vector<1x128xf32>
      %cst_81 = arith.constant 1.280000e+02 : f32
      %202 = vector.broadcast %cst_81 : f32 to vector<1x128xf32>
      %203 = arith.select %201, %30, %202 : vector<1x128xi1>, vector<1x128xf32>
      %cst_82 = arith.constant dense<0x7F800000> : vector<1xf32>
      %204 = vector.multi_reduction <minimumf>, %203, %cst_82 [1] : vector<1x128xf32> to vector<1xf32>
      %205 = vector.shape_cast %204 : vector<1xf32> to vector<1x1xf32>
      %206 = vector.broadcast %199 : vector<1x1xf32> to vector<1x128xf32>
      %207 = arith.cmpf oge, %195, %206 : vector<1x128xf32>
      %cst_83 = arith.constant 1.280000e+02 : f32
      %208 = vector.broadcast %cst_83 : f32 to vector<1x128xf32>
      %209 = arith.select %207, %30, %208 : vector<1x128xi1>, vector<1x128xf32>
      %cst_84 = arith.constant dense<0x7F800000> : vector<1xf32>
      %210 = vector.multi_reduction <minimumf>, %209, %cst_84 [1] : vector<1x128xf32> to vector<1xf32>
      %211 = vector.shape_cast %210 : vector<1xf32> to vector<1x1xf32>
      %212 = vector.broadcast %205 : vector<1x1xf32> to vector<1x128xf32>
      %213 = arith.cmpf oeq, %30, %212 : vector<1x128xf32>
      %cst_85 = arith.constant 1.000000e+00 : f32
      %214 = vector.broadcast %cst_85 : f32 to vector<1x128xf32>
      %215 = arith.select %213, %214, %167 : vector<1x128xi1>, vector<1x128xf32>
      %216 = vector.broadcast %211 : vector<1x1xf32> to vector<1x128xf32>
      %217 = arith.cmpf oeq, %30, %216 : vector<1x128xf32>
      %cst_86 = arith.constant 1.000000e+00 : f32
      %218 = vector.broadcast %cst_86 : f32 to vector<1x128xf32>
      %219 = arith.select %217, %218, %171 : vector<1x128xi1>, vector<1x128xf32>
      %220 = vector.broadcast %c3_i32 : i32 to vector<1x128xi32>
      %221 = arith.cmpi eq, %29, %220 : vector<1x128xi32>
      %222 = vector.shape_cast %205 : vector<1x1xf32> to vector<1x1xf32>
      %223 = vector.broadcast %222 : vector<1x1xf32> to vector<1x128xf32>
      %224 = arith.select %221, %223, %176 : vector<1x128xi1>, vector<1x128xf32>
      %225 = vector.broadcast %c3_i32 : i32 to vector<1x128xi32>
      %226 = arith.cmpi eq, %29, %225 : vector<1x128xi32>
      %227 = vector.shape_cast %211 : vector<1x1xf32> to vector<1x1xf32>
      %228 = vector.broadcast %227 : vector<1x1xf32> to vector<1x128xf32>
      %229 = arith.select %226, %228, %181 : vector<1x128xi1>, vector<1x128xf32>
      %c4_i32 = arith.constant 4 : i32
      %230 = arith.index_cast %c4_i32 : i32 to index
      %c0_87 = arith.constant 0 : index
      %231 = vector.load %arg5[%230, %c0_87] : memref<128x128xf32, #tpu.memory_space<vmem>>, vector<1x128xf32>
      %232 = arith.mulf %231, %28 : vector<1x128xf32>
      %233 = arith.index_cast %c4_i32 : i32 to index
      %c0_88 = arith.constant 0 : index
      %234 = vector.load %arg6[%233, %c0_88] : memref<128x128xf32, #tpu.memory_space<vmem>>, vector<1x128xf32>
      %235 = arith.mulf %234, %28 : vector<1x128xf32>
      %cst_89 = arith.constant 5.000000e-01 : f32
      %236 = vector.broadcast %cst_89 : f32 to vector<1x128xf32>
      %237 = arith.cmpf ogt, %215, %236 : vector<1x128xf32>
      %cst_90 = arith.constant 0xFF800000 : f32
      %238 = vector.broadcast %cst_90 : f32 to vector<1x128xf32>
      %239 = arith.select %237, %238, %232 : vector<1x128xi1>, vector<1x128xf32>
      %cst_91 = arith.constant 5.000000e-01 : f32
      %240 = vector.broadcast %cst_91 : f32 to vector<1x128xf32>
      %241 = arith.cmpf ogt, %219, %240 : vector<1x128xf32>
      %cst_92 = arith.constant 0xFF800000 : f32
      %242 = vector.broadcast %cst_92 : f32 to vector<1x128xf32>
      %243 = arith.select %241, %242, %235 : vector<1x128xi1>, vector<1x128xf32>
      %cst_93 = arith.constant dense<0xFF800000> : vector<1xf32>
      %244 = vector.multi_reduction <maximumf>, %239, %cst_93 [1] : vector<1x128xf32> to vector<1xf32>
      %245 = vector.shape_cast %244 : vector<1xf32> to vector<1x1xf32>
      %cst_94 = arith.constant dense<0xFF800000> : vector<1xf32>
      %246 = vector.multi_reduction <maximumf>, %243, %cst_94 [1] : vector<1x128xf32> to vector<1xf32>
      %247 = vector.shape_cast %246 : vector<1xf32> to vector<1x1xf32>
      %248 = vector.broadcast %245 : vector<1x1xf32> to vector<1x128xf32>
      %249 = arith.cmpf oge, %239, %248 : vector<1x128xf32>
      %cst_95 = arith.constant 1.280000e+02 : f32
      %250 = vector.broadcast %cst_95 : f32 to vector<1x128xf32>
      %251 = arith.select %249, %30, %250 : vector<1x128xi1>, vector<1x128xf32>
      %cst_96 = arith.constant dense<0x7F800000> : vector<1xf32>
      %252 = vector.multi_reduction <minimumf>, %251, %cst_96 [1] : vector<1x128xf32> to vector<1xf32>
      %253 = vector.shape_cast %252 : vector<1xf32> to vector<1x1xf32>
      %254 = vector.broadcast %247 : vector<1x1xf32> to vector<1x128xf32>
      %255 = arith.cmpf oge, %243, %254 : vector<1x128xf32>
      %cst_97 = arith.constant 1.280000e+02 : f32
      %256 = vector.broadcast %cst_97 : f32 to vector<1x128xf32>
      %257 = arith.select %255, %30, %256 : vector<1x128xi1>, vector<1x128xf32>
      %cst_98 = arith.constant dense<0x7F800000> : vector<1xf32>
      %258 = vector.multi_reduction <minimumf>, %257, %cst_98 [1] : vector<1x128xf32> to vector<1xf32>
      %259 = vector.shape_cast %258 : vector<1xf32> to vector<1x1xf32>
      %260 = vector.broadcast %253 : vector<1x1xf32> to vector<1x128xf32>
      %261 = arith.cmpf oeq, %30, %260 : vector<1x128xf32>
      %cst_99 = arith.constant 1.000000e+00 : f32
      %262 = vector.broadcast %cst_99 : f32 to vector<1x128xf32>
      %263 = arith.select %261, %262, %215 : vector<1x128xi1>, vector<1x128xf32>
      %264 = vector.broadcast %259 : vector<1x1xf32> to vector<1x128xf32>
      %265 = arith.cmpf oeq, %30, %264 : vector<1x128xf32>
      %cst_100 = arith.constant 1.000000e+00 : f32
      %266 = vector.broadcast %cst_100 : f32 to vector<1x128xf32>
      %267 = arith.select %265, %266, %219 : vector<1x128xi1>, vector<1x128xf32>
      %268 = vector.broadcast %c4_i32 : i32 to vector<1x128xi32>
      %269 = arith.cmpi eq, %29, %268 : vector<1x128xi32>
      %270 = vector.shape_cast %253 : vector<1x1xf32> to vector<1x1xf32>
      %271 = vector.broadcast %270 : vector<1x1xf32> to vector<1x128xf32>
      %272 = arith.select %269, %271, %224 : vector<1x128xi1>, vector<1x128xf32>
      %273 = vector.broadcast %c4_i32 : i32 to vector<1x128xi32>
      %274 = arith.cmpi eq, %29, %273 : vector<1x128xi32>
      %275 = vector.shape_cast %259 : vector<1x1xf32> to vector<1x1xf32>
      %276 = vector.broadcast %275 : vector<1x1xf32> to vector<1x128xf32>
      %277 = arith.select %274, %276, %229 : vector<1x128xi1>, vector<1x128xf32>
      %c5_i32 = arith.constant 5 : i32
      %278 = arith.index_cast %c5_i32 : i32 to index
      %c0_101 = arith.constant 0 : index
      %279 = vector.load %arg5[%278, %c0_101] : memref<128x128xf32, #tpu.memory_space<vmem>>, vector<1x128xf32>
      %280 = arith.mulf %279, %28 : vector<1x128xf32>
      %281 = arith.index_cast %c5_i32 : i32 to index
      %c0_102 = arith.constant 0 : index
      %282 = vector.load %arg6[%281, %c0_102] : memref<128x128xf32, #tpu.memory_space<vmem>>, vector<1x128xf32>
      %283 = arith.mulf %282, %28 : vector<1x128xf32>
      %cst_103 = arith.constant 5.000000e-01 : f32
      %284 = vector.broadcast %cst_103 : f32 to vector<1x128xf32>
      %285 = arith.cmpf ogt, %263, %284 : vector<1x128xf32>
      %cst_104 = arith.constant 0xFF800000 : f32
      %286 = vector.broadcast %cst_104 : f32 to vector<1x128xf32>
      %287 = arith.select %285, %286, %280 : vector<1x128xi1>, vector<1x128xf32>
      %cst_105 = arith.constant 5.000000e-01 : f32
      %288 = vector.broadcast %cst_105 : f32 to vector<1x128xf32>
      %289 = arith.cmpf ogt, %267, %288 : vector<1x128xf32>
      %cst_106 = arith.constant 0xFF800000 : f32
      %290 = vector.broadcast %cst_106 : f32 to vector<1x128xf32>
      %291 = arith.select %289, %290, %283 : vector<1x128xi1>, vector<1x128xf32>
      %cst_107 = arith.constant dense<0xFF800000> : vector<1xf32>
      %292 = vector.multi_reduction <maximumf>, %287, %cst_107 [1] : vector<1x128xf32> to vector<1xf32>
      %293 = vector.shape_cast %292 : vector<1xf32> to vector<1x1xf32>
      %cst_108 = arith.constant dense<0xFF800000> : vector<1xf32>
      %294 = vector.multi_reduction <maximumf>, %291, %cst_108 [1] : vector<1x128xf32> to vector<1xf32>
      %295 = vector.shape_cast %294 : vector<1xf32> to vector<1x1xf32>
      %296 = vector.broadcast %293 : vector<1x1xf32> to vector<1x128xf32>
      %297 = arith.cmpf oge, %287, %296 : vector<1x128xf32>
      %cst_109 = arith.constant 1.280000e+02 : f32
      %298 = vector.broadcast %cst_109 : f32 to vector<1x128xf32>
      %299 = arith.select %297, %30, %298 : vector<1x128xi1>, vector<1x128xf32>
      %cst_110 = arith.constant dense<0x7F800000> : vector<1xf32>
      %300 = vector.multi_reduction <minimumf>, %299, %cst_110 [1] : vector<1x128xf32> to vector<1xf32>
      %301 = vector.shape_cast %300 : vector<1xf32> to vector<1x1xf32>
      %302 = vector.broadcast %295 : vector<1x1xf32> to vector<1x128xf32>
      %303 = arith.cmpf oge, %291, %302 : vector<1x128xf32>
      %cst_111 = arith.constant 1.280000e+02 : f32
      %304 = vector.broadcast %cst_111 : f32 to vector<1x128xf32>
      %305 = arith.select %303, %30, %304 : vector<1x128xi1>, vector<1x128xf32>
      %cst_112 = arith.constant dense<0x7F800000> : vector<1xf32>
      %306 = vector.multi_reduction <minimumf>, %305, %cst_112 [1] : vector<1x128xf32> to vector<1xf32>
      %307 = vector.shape_cast %306 : vector<1xf32> to vector<1x1xf32>
      %308 = vector.broadcast %301 : vector<1x1xf32> to vector<1x128xf32>
      %309 = arith.cmpf oeq, %30, %308 : vector<1x128xf32>
      %cst_113 = arith.constant 1.000000e+00 : f32
      %310 = vector.broadcast %cst_113 : f32 to vector<1x128xf32>
      %311 = arith.select %309, %310, %263 : vector<1x128xi1>, vector<1x128xf32>
      %312 = vector.broadcast %307 : vector<1x1xf32> to vector<1x128xf32>
      %313 = arith.cmpf oeq, %30, %312 : vector<1x128xf32>
      %cst_114 = arith.constant 1.000000e+00 : f32
      %314 = vector.broadcast %cst_114 : f32 to vector<1x128xf32>
      %315 = arith.select %313, %314, %267 : vector<1x128xi1>, vector<1x128xf32>
      %316 = vector.broadcast %c5_i32 : i32 to vector<1x128xi32>
      %317 = arith.cmpi eq, %29, %316 : vector<1x128xi32>
      %318 = vector.shape_cast %301 : vector<1x1xf32> to vector<1x1xf32>
      %319 = vector.broadcast %318 : vector<1x1xf32> to vector<1x128xf32>
      %320 = arith.select %317, %319, %272 : vector<1x128xi1>, vector<1x128xf32>
      %321 = vector.broadcast %c5_i32 : i32 to vector<1x128xi32>
      %322 = arith.cmpi eq, %29, %321 : vector<1x128xi32>
      %323 = vector.shape_cast %307 : vector<1x1xf32> to vector<1x1xf32>
      %324 = vector.broadcast %323 : vector<1x1xf32> to vector<1x128xf32>
      %325 = arith.select %322, %324, %277 : vector<1x128xi1>, vector<1x128xf32>
      %c6_i32 = arith.constant 6 : i32
      %326 = arith.index_cast %c6_i32 : i32 to index
      %c0_115 = arith.constant 0 : index
      %327 = vector.load %arg5[%326, %c0_115] : memref<128x128xf32, #tpu.memory_space<vmem>>, vector<1x128xf32>
      %328 = arith.mulf %327, %28 : vector<1x128xf32>
      %329 = arith.index_cast %c6_i32 : i32 to index
      %c0_116 = arith.constant 0 : index
      %330 = vector.load %arg6[%329, %c0_116] : memref<128x128xf32, #tpu.memory_space<vmem>>, vector<1x128xf32>
      %331 = arith.mulf %330, %28 : vector<1x128xf32>
      %cst_117 = arith.constant 5.000000e-01 : f32
      %332 = vector.broadcast %cst_117 : f32 to vector<1x128xf32>
      %333 = arith.cmpf ogt, %311, %332 : vector<1x128xf32>
      %cst_118 = arith.constant 0xFF800000 : f32
      %334 = vector.broadcast %cst_118 : f32 to vector<1x128xf32>
      %335 = arith.select %333, %334, %328 : vector<1x128xi1>, vector<1x128xf32>
      %cst_119 = arith.constant 5.000000e-01 : f32
      %336 = vector.broadcast %cst_119 : f32 to vector<1x128xf32>
      %337 = arith.cmpf ogt, %315, %336 : vector<1x128xf32>
      %cst_120 = arith.constant 0xFF800000 : f32
      %338 = vector.broadcast %cst_120 : f32 to vector<1x128xf32>
      %339 = arith.select %337, %338, %331 : vector<1x128xi1>, vector<1x128xf32>
      %cst_121 = arith.constant dense<0xFF800000> : vector<1xf32>
      %340 = vector.multi_reduction <maximumf>, %335, %cst_121 [1] : vector<1x128xf32> to vector<1xf32>
      %341 = vector.shape_cast %340 : vector<1xf32> to vector<1x1xf32>
      %cst_122 = arith.constant dense<0xFF800000> : vector<1xf32>
      %342 = vector.multi_reduction <maximumf>, %339, %cst_122 [1] : vector<1x128xf32> to vector<1xf32>
      %343 = vector.shape_cast %342 : vector<1xf32> to vector<1x1xf32>
      %344 = vector.broadcast %341 : vector<1x1xf32> to vector<1x128xf32>
      %345 = arith.cmpf oge, %335, %344 : vector<1x128xf32>
      %cst_123 = arith.constant 1.280000e+02 : f32
      %346 = vector.broadcast %cst_123 : f32 to vector<1x128xf32>
      %347 = arith.select %345, %30, %346 : vector<1x128xi1>, vector<1x128xf32>
      %cst_124 = arith.constant dense<0x7F800000> : vector<1xf32>
      %348 = vector.multi_reduction <minimumf>, %347, %cst_124 [1] : vector<1x128xf32> to vector<1xf32>
      %349 = vector.shape_cast %348 : vector<1xf32> to vector<1x1xf32>
      %350 = vector.broadcast %343 : vector<1x1xf32> to vector<1x128xf32>
      %351 = arith.cmpf oge, %339, %350 : vector<1x128xf32>
      %cst_125 = arith.constant 1.280000e+02 : f32
      %352 = vector.broadcast %cst_125 : f32 to vector<1x128xf32>
      %353 = arith.select %351, %30, %352 : vector<1x128xi1>, vector<1x128xf32>
      %cst_126 = arith.constant dense<0x7F800000> : vector<1xf32>
      %354 = vector.multi_reduction <minimumf>, %353, %cst_126 [1] : vector<1x128xf32> to vector<1xf32>
      %355 = vector.shape_cast %354 : vector<1xf32> to vector<1x1xf32>
      %356 = vector.broadcast %349 : vector<1x1xf32> to vector<1x128xf32>
      %357 = arith.cmpf oeq, %30, %356 : vector<1x128xf32>
      %cst_127 = arith.constant 1.000000e+00 : f32
      %358 = vector.broadcast %cst_127 : f32 to vector<1x128xf32>
      %359 = arith.select %357, %358, %311 : vector<1x128xi1>, vector<1x128xf32>
      %360 = vector.broadcast %355 : vector<1x1xf32> to vector<1x128xf32>
      %361 = arith.cmpf oeq, %30, %360 : vector<1x128xf32>
      %cst_128 = arith.constant 1.000000e+00 : f32
      %362 = vector.broadcast %cst_128 : f32 to vector<1x128xf32>
      %363 = arith.select %361, %362, %315 : vector<1x128xi1>, vector<1x128xf32>
      %364 = vector.broadcast %c6_i32 : i32 to vector<1x128xi32>
      %365 = arith.cmpi eq, %29, %364 : vector<1x128xi32>
      %366 = vector.shape_cast %349 : vector<1x1xf32> to vector<1x1xf32>
      %367 = vector.broadcast %366 : vector<1x1xf32> to vector<1x128xf32>
      %368 = arith.select %365, %367, %320 : vector<1x128xi1>, vector<1x128xf32>
      %369 = vector.broadcast %c6_i32 : i32 to vector<1x128xi32>
      %370 = arith.cmpi eq, %29, %369 : vector<1x128xi32>
      %371 = vector.shape_cast %355 : vector<1x1xf32> to vector<1x1xf32>
      %372 = vector.broadcast %371 : vector<1x1xf32> to vector<1x128xf32>
      %373 = arith.select %370, %372, %325 : vector<1x128xi1>, vector<1x128xf32>
      %c7_i32 = arith.constant 7 : i32
      %374 = arith.index_cast %c7_i32 : i32 to index
      %c0_129 = arith.constant 0 : index
      %375 = vector.load %arg5[%374, %c0_129] : memref<128x128xf32, #tpu.memory_space<vmem>>, vector<1x128xf32>
      %376 = arith.mulf %375, %28 : vector<1x128xf32>
      %377 = arith.index_cast %c7_i32 : i32 to index
      %c0_130 = arith.constant 0 : index
      %378 = vector.load %arg6[%377, %c0_130] : memref<128x128xf32, #tpu.memory_space<vmem>>, vector<1x128xf32>
      %379 = arith.mulf %378, %28 : vector<1x128xf32>
      %cst_131 = arith.constant 5.000000e-01 : f32
      %380 = vector.broadcast %cst_131 : f32 to vector<1x128xf32>
      %381 = arith.cmpf ogt, %359, %380 : vector<1x128xf32>
      %cst_132 = arith.constant 0xFF800000 : f32
      %382 = vector.broadcast %cst_132 : f32 to vector<1x128xf32>
      %383 = arith.select %381, %382, %376 : vector<1x128xi1>, vector<1x128xf32>
      %cst_133 = arith.constant 5.000000e-01 : f32
      %384 = vector.broadcast %cst_133 : f32 to vector<1x128xf32>
      %385 = arith.cmpf ogt, %363, %384 : vector<1x128xf32>
      %cst_134 = arith.constant 0xFF800000 : f32
      %386 = vector.broadcast %cst_134 : f32 to vector<1x128xf32>
      %387 = arith.select %385, %386, %379 : vector<1x128xi1>, vector<1x128xf32>
      %cst_135 = arith.constant dense<0xFF800000> : vector<1xf32>
      %388 = vector.multi_reduction <maximumf>, %383, %cst_135 [1] : vector<1x128xf32> to vector<1xf32>
      %389 = vector.shape_cast %388 : vector<1xf32> to vector<1x1xf32>
      %cst_136 = arith.constant dense<0xFF800000> : vector<1xf32>
      %390 = vector.multi_reduction <maximumf>, %387, %cst_136 [1] : vector<1x128xf32> to vector<1xf32>
      %391 = vector.shape_cast %390 : vector<1xf32> to vector<1x1xf32>
      %392 = vector.broadcast %389 : vector<1x1xf32> to vector<1x128xf32>
      %393 = arith.cmpf oge, %383, %392 : vector<1x128xf32>
      %cst_137 = arith.constant 1.280000e+02 : f32
      %394 = vector.broadcast %cst_137 : f32 to vector<1x128xf32>
      %395 = arith.select %393, %30, %394 : vector<1x128xi1>, vector<1x128xf32>
      %cst_138 = arith.constant dense<0x7F800000> : vector<1xf32>
      %396 = vector.multi_reduction <minimumf>, %395, %cst_138 [1] : vector<1x128xf32> to vector<1xf32>
      %397 = vector.shape_cast %396 : vector<1xf32> to vector<1x1xf32>
      %398 = vector.broadcast %391 : vector<1x1xf32> to vector<1x128xf32>
      %399 = arith.cmpf oge, %387, %398 : vector<1x128xf32>
      %cst_139 = arith.constant 1.280000e+02 : f32
      %400 = vector.broadcast %cst_139 : f32 to vector<1x128xf32>
      %401 = arith.select %399, %30, %400 : vector<1x128xi1>, vector<1x128xf32>
      %cst_140 = arith.constant dense<0x7F800000> : vector<1xf32>
      %402 = vector.multi_reduction <minimumf>, %401, %cst_140 [1] : vector<1x128xf32> to vector<1xf32>
      %403 = vector.shape_cast %402 : vector<1xf32> to vector<1x1xf32>
      %404 = vector.broadcast %397 : vector<1x1xf32> to vector<1x128xf32>
      %405 = arith.cmpf oeq, %30, %404 : vector<1x128xf32>
      %cst_141 = arith.constant 1.000000e+00 : f32
      %406 = vector.broadcast %cst_141 : f32 to vector<1x128xf32>
      %407 = arith.select %405, %406, %359 : vector<1x128xi1>, vector<1x128xf32>
      %408 = vector.broadcast %403 : vector<1x1xf32> to vector<1x128xf32>
      %409 = arith.cmpf oeq, %30, %408 : vector<1x128xf32>
      %cst_142 = arith.constant 1.000000e+00 : f32
      %410 = vector.broadcast %cst_142 : f32 to vector<1x128xf32>
      %411 = arith.select %409, %410, %363 : vector<1x128xi1>, vector<1x128xf32>
      %412 = vector.broadcast %c7_i32 : i32 to vector<1x128xi32>
      %413 = arith.cmpi eq, %29, %412 : vector<1x128xi32>
      %414 = vector.shape_cast %397 : vector<1x1xf32> to vector<1x1xf32>
      %415 = vector.broadcast %414 : vector<1x1xf32> to vector<1x128xf32>
      %416 = arith.select %413, %415, %368 : vector<1x128xi1>, vector<1x128xf32>
      %417 = vector.broadcast %c7_i32 : i32 to vector<1x128xi32>
      %418 = arith.cmpi eq, %29, %417 : vector<1x128xi32>
      %419 = vector.shape_cast %403 : vector<1x1xf32> to vector<1x1xf32>
      %420 = vector.broadcast %419 : vector<1x1xf32> to vector<1x128xf32>
      %421 = arith.select %418, %420, %373 : vector<1x128xi1>, vector<1x128xf32>
      %c8_i32 = arith.constant 8 : i32
      %422 = arith.index_cast %c8_i32 : i32 to index
      %c0_143 = arith.constant 0 : index
      %423 = vector.load %arg5[%422, %c0_143] : memref<128x128xf32, #tpu.memory_space<vmem>>, vector<1x128xf32>
      %424 = arith.mulf %423, %28 : vector<1x128xf32>
      %425 = arith.index_cast %c8_i32 : i32 to index
      %c0_144 = arith.constant 0 : index
      %426 = vector.load %arg6[%425, %c0_144] : memref<128x128xf32, #tpu.memory_space<vmem>>, vector<1x128xf32>
      %427 = arith.mulf %426, %28 : vector<1x128xf32>
      %cst_145 = arith.constant 5.000000e-01 : f32
      %428 = vector.broadcast %cst_145 : f32 to vector<1x128xf32>
      %429 = arith.cmpf ogt, %407, %428 : vector<1x128xf32>
      %cst_146 = arith.constant 0xFF800000 : f32
      %430 = vector.broadcast %cst_146 : f32 to vector<1x128xf32>
      %431 = arith.select %429, %430, %424 : vector<1x128xi1>, vector<1x128xf32>
      %cst_147 = arith.constant 5.000000e-01 : f32
      %432 = vector.broadcast %cst_147 : f32 to vector<1x128xf32>
      %433 = arith.cmpf ogt, %411, %432 : vector<1x128xf32>
      %cst_148 = arith.constant 0xFF800000 : f32
      %434 = vector.broadcast %cst_148 : f32 to vector<1x128xf32>
      %435 = arith.select %433, %434, %427 : vector<1x128xi1>, vector<1x128xf32>
      %cst_149 = arith.constant dense<0xFF800000> : vector<1xf32>
      %436 = vector.multi_reduction <maximumf>, %431, %cst_149 [1] : vector<1x128xf32> to vector<1xf32>
      %437 = vector.shape_cast %436 : vector<1xf32> to vector<1x1xf32>
      %cst_150 = arith.constant dense<0xFF800000> : vector<1xf32>
      %438 = vector.multi_reduction <maximumf>, %435, %cst_150 [1] : vector<1x128xf32> to vector<1xf32>
      %439 = vector.shape_cast %438 : vector<1xf32> to vector<1x1xf32>
      %440 = vector.broadcast %437 : vector<1x1xf32> to vector<1x128xf32>
      %441 = arith.cmpf oge, %431, %440 : vector<1x128xf32>
      %cst_151 = arith.constant 1.280000e+02 : f32
      %442 = vector.broadcast %cst_151 : f32 to vector<1x128xf32>
      %443 = arith.select %441, %30, %442 : vector<1x128xi1>, vector<1x128xf32>
      %cst_152 = arith.constant dense<0x7F800000> : vector<1xf32>
      %444 = vector.multi_reduction <minimumf>, %443, %cst_152 [1] : vector<1x128xf32> to vector<1xf32>
      %445 = vector.shape_cast %444 : vector<1xf32> to vector<1x1xf32>
      %446 = vector.broadcast %439 : vector<1x1xf32> to vector<1x128xf32>
      %447 = arith.cmpf oge, %435, %446 : vector<1x128xf32>
      %cst_153 = arith.constant 1.280000e+02 : f32
      %448 = vector.broadcast %cst_153 : f32 to vector<1x128xf32>
      %449 = arith.select %447, %30, %448 : vector<1x128xi1>, vector<1x128xf32>
      %cst_154 = arith.constant dense<0x7F800000> : vector<1xf32>
      %450 = vector.multi_reduction <minimumf>, %449, %cst_154 [1] : vector<1x128xf32> to vector<1xf32>
      %451 = vector.shape_cast %450 : vector<1xf32> to vector<1x1xf32>
      %452 = vector.broadcast %445 : vector<1x1xf32> to vector<1x128xf32>
      %453 = arith.cmpf oeq, %30, %452 : vector<1x128xf32>
      %cst_155 = arith.constant 1.000000e+00 : f32
      %454 = vector.broadcast %cst_155 : f32 to vector<1x128xf32>
      %455 = arith.select %453, %454, %407 : vector<1x128xi1>, vector<1x128xf32>
      %456 = vector.broadcast %451 : vector<1x1xf32> to vector<1x128xf32>
      %457 = arith.cmpf oeq, %30, %456 : vector<1x128xf32>
      %cst_156 = arith.constant 1.000000e+00 : f32
      %458 = vector.broadcast %cst_156 : f32 to vector<1x128xf32>
      %459 = arith.select %457, %458, %411 : vector<1x128xi1>, vector<1x128xf32>
      %460 = vector.broadcast %c8_i32 : i32 to vector<1x128xi32>
      %461 = arith.cmpi eq, %29, %460 : vector<1x128xi32>
      %462 = vector.shape_cast %445 : vector<1x1xf32> to vector<1x1xf32>
      %463 = vector.broadcast %462 : vector<1x1xf32> to vector<1x128xf32>
      %464 = arith.select %461, %463, %416 : vector<1x128xi1>, vector<1x128xf32>
      %465 = vector.broadcast %c8_i32 : i32 to vector<1x128xi32>
      %466 = arith.cmpi eq, %29, %465 : vector<1x128xi32>
      %467 = vector.shape_cast %451 : vector<1x1xf32> to vector<1x1xf32>
      %468 = vector.broadcast %467 : vector<1x1xf32> to vector<1x128xf32>
      %469 = arith.select %466, %468, %421 : vector<1x128xi1>, vector<1x128xf32>
      %c9_i32 = arith.constant 9 : i32
      %470 = arith.index_cast %c9_i32 : i32 to index
      %c0_157 = arith.constant 0 : index
      %471 = vector.load %arg5[%470, %c0_157] : memref<128x128xf32, #tpu.memory_space<vmem>>, vector<1x128xf32>
      %472 = arith.mulf %471, %28 : vector<1x128xf32>
      %473 = arith.index_cast %c9_i32 : i32 to index
      %c0_158 = arith.constant 0 : index
      %474 = vector.load %arg6[%473, %c0_158] : memref<128x128xf32, #tpu.memory_space<vmem>>, vector<1x128xf32>
      %475 = arith.mulf %474, %28 : vector<1x128xf32>
      %cst_159 = arith.constant 5.000000e-01 : f32
      %476 = vector.broadcast %cst_159 : f32 to vector<1x128xf32>
      %477 = arith.cmpf ogt, %455, %476 : vector<1x128xf32>
      %cst_160 = arith.constant 0xFF800000 : f32
      %478 = vector.broadcast %cst_160 : f32 to vector<1x128xf32>
      %479 = arith.select %477, %478, %472 : vector<1x128xi1>, vector<1x128xf32>
      %cst_161 = arith.constant 5.000000e-01 : f32
      %480 = vector.broadcast %cst_161 : f32 to vector<1x128xf32>
      %481 = arith.cmpf ogt, %459, %480 : vector<1x128xf32>
      %cst_162 = arith.constant 0xFF800000 : f32
      %482 = vector.broadcast %cst_162 : f32 to vector<1x128xf32>
      %483 = arith.select %481, %482, %475 : vector<1x128xi1>, vector<1x128xf32>
      %cst_163 = arith.constant dense<0xFF800000> : vector<1xf32>
      %484 = vector.multi_reduction <maximumf>, %479, %cst_163 [1] : vector<1x128xf32> to vector<1xf32>
      %485 = vector.shape_cast %484 : vector<1xf32> to vector<1x1xf32>
      %cst_164 = arith.constant dense<0xFF800000> : vector<1xf32>
      %486 = vector.multi_reduction <maximumf>, %483, %cst_164 [1] : vector<1x128xf32> to vector<1xf32>
      %487 = vector.shape_cast %486 : vector<1xf32> to vector<1x1xf32>
      %488 = vector.broadcast %485 : vector<1x1xf32> to vector<1x128xf32>
      %489 = arith.cmpf oge, %479, %488 : vector<1x128xf32>
      %cst_165 = arith.constant 1.280000e+02 : f32
      %490 = vector.broadcast %cst_165 : f32 to vector<1x128xf32>
      %491 = arith.select %489, %30, %490 : vector<1x128xi1>, vector<1x128xf32>
      %cst_166 = arith.constant dense<0x7F800000> : vector<1xf32>
      %492 = vector.multi_reduction <minimumf>, %491, %cst_166 [1] : vector<1x128xf32> to vector<1xf32>
      %493 = vector.shape_cast %492 : vector<1xf32> to vector<1x1xf32>
      %494 = vector.broadcast %487 : vector<1x1xf32> to vector<1x128xf32>
      %495 = arith.cmpf oge, %483, %494 : vector<1x128xf32>
      %cst_167 = arith.constant 1.280000e+02 : f32
      %496 = vector.broadcast %cst_167 : f32 to vector<1x128xf32>
      %497 = arith.select %495, %30, %496 : vector<1x128xi1>, vector<1x128xf32>
      %cst_168 = arith.constant dense<0x7F800000> : vector<1xf32>
      %498 = vector.multi_reduction <minimumf>, %497, %cst_168 [1] : vector<1x128xf32> to vector<1xf32>
      %499 = vector.shape_cast %498 : vector<1xf32> to vector<1x1xf32>
      %500 = vector.broadcast %493 : vector<1x1xf32> to vector<1x128xf32>
      %501 = arith.cmpf oeq, %30, %500 : vector<1x128xf32>
      %cst_169 = arith.constant 1.000000e+00 : f32
      %502 = vector.broadcast %cst_169 : f32 to vector<1x128xf32>
      %503 = arith.select %501, %502, %455 : vector<1x128xi1>, vector<1x128xf32>
      %504 = vector.broadcast %499 : vector<1x1xf32> to vector<1x128xf32>
      %505 = arith.cmpf oeq, %30, %504 : vector<1x128xf32>
      %cst_170 = arith.constant 1.000000e+00 : f32
      %506 = vector.broadcast %cst_170 : f32 to vector<1x128xf32>
      %507 = arith.select %505, %506, %459 : vector<1x128xi1>, vector<1x128xf32>
      %508 = vector.broadcast %c9_i32 : i32 to vector<1x128xi32>
      %509 = arith.cmpi eq, %29, %508 : vector<1x128xi32>
      %510 = vector.shape_cast %493 : vector<1x1xf32> to vector<1x1xf32>
      %511 = vector.broadcast %510 : vector<1x1xf32> to vector<1x128xf32>
      %512 = arith.select %509, %511, %464 : vector<1x128xi1>, vector<1x128xf32>
      %513 = vector.broadcast %c9_i32 : i32 to vector<1x128xi32>
      %514 = arith.cmpi eq, %29, %513 : vector<1x128xi32>
      %515 = vector.shape_cast %499 : vector<1x1xf32> to vector<1x1xf32>
      %516 = vector.broadcast %515 : vector<1x1xf32> to vector<1x128xf32>
      %517 = arith.select %514, %516, %469 : vector<1x128xi1>, vector<1x128xf32>
      %c10_i32 = arith.constant 10 : i32
      %518 = arith.index_cast %c10_i32 : i32 to index
      %c0_171 = arith.constant 0 : index
      %519 = vector.load %arg5[%518, %c0_171] : memref<128x128xf32, #tpu.memory_space<vmem>>, vector<1x128xf32>
      %520 = arith.mulf %519, %28 : vector<1x128xf32>
      %521 = arith.index_cast %c10_i32 : i32 to index
      %c0_172 = arith.constant 0 : index
      %522 = vector.load %arg6[%521, %c0_172] : memref<128x128xf32, #tpu.memory_space<vmem>>, vector<1x128xf32>
      %523 = arith.mulf %522, %28 : vector<1x128xf32>
      %cst_173 = arith.constant 5.000000e-01 : f32
      %524 = vector.broadcast %cst_173 : f32 to vector<1x128xf32>
      %525 = arith.cmpf ogt, %503, %524 : vector<1x128xf32>
      %cst_174 = arith.constant 0xFF800000 : f32
      %526 = vector.broadcast %cst_174 : f32 to vector<1x128xf32>
      %527 = arith.select %525, %526, %520 : vector<1x128xi1>, vector<1x128xf32>
      %cst_175 = arith.constant 5.000000e-01 : f32
      %528 = vector.broadcast %cst_175 : f32 to vector<1x128xf32>
      %529 = arith.cmpf ogt, %507, %528 : vector<1x128xf32>
      %cst_176 = arith.constant 0xFF800000 : f32
      %530 = vector.broadcast %cst_176 : f32 to vector<1x128xf32>
      %531 = arith.select %529, %530, %523 : vector<1x128xi1>, vector<1x128xf32>
      %cst_177 = arith.constant dense<0xFF800000> : vector<1xf32>
      %532 = vector.multi_reduction <maximumf>, %527, %cst_177 [1] : vector<1x128xf32> to vector<1xf32>
      %533 = vector.shape_cast %532 : vector<1xf32> to vector<1x1xf32>
      %cst_178 = arith.constant dense<0xFF800000> : vector<1xf32>
      %534 = vector.multi_reduction <maximumf>, %531, %cst_178 [1] : vector<1x128xf32> to vector<1xf32>
      %535 = vector.shape_cast %534 : vector<1xf32> to vector<1x1xf32>
      %536 = vector.broadcast %533 : vector<1x1xf32> to vector<1x128xf32>
      %537 = arith.cmpf oge, %527, %536 : vector<1x128xf32>
      %cst_179 = arith.constant 1.280000e+02 : f32
      %538 = vector.broadcast %cst_179 : f32 to vector<1x128xf32>
      %539 = arith.select %537, %30, %538 : vector<1x128xi1>, vector<1x128xf32>
      %cst_180 = arith.constant dense<0x7F800000> : vector<1xf32>
      %540 = vector.multi_reduction <minimumf>, %539, %cst_180 [1] : vector<1x128xf32> to vector<1xf32>
      %541 = vector.shape_cast %540 : vector<1xf32> to vector<1x1xf32>
      %542 = vector.broadcast %535 : vector<1x1xf32> to vector<1x128xf32>
      %543 = arith.cmpf oge, %531, %542 : vector<1x128xf32>
      %cst_181 = arith.constant 1.280000e+02 : f32
      %544 = vector.broadcast %cst_181 : f32 to vector<1x128xf32>
      %545 = arith.select %543, %30, %544 : vector<1x128xi1>, vector<1x128xf32>
      %cst_182 = arith.constant dense<0x7F800000> : vector<1xf32>
      %546 = vector.multi_reduction <minimumf>, %545, %cst_182 [1] : vector<1x128xf32> to vector<1xf32>
      %547 = vector.shape_cast %546 : vector<1xf32> to vector<1x1xf32>
      %548 = vector.broadcast %541 : vector<1x1xf32> to vector<1x128xf32>
      %549 = arith.cmpf oeq, %30, %548 : vector<1x128xf32>
      %cst_183 = arith.constant 1.000000e+00 : f32
      %550 = vector.broadcast %cst_183 : f32 to vector<1x128xf32>
      %551 = arith.select %549, %550, %503 : vector<1x128xi1>, vector<1x128xf32>
      %552 = vector.broadcast %547 : vector<1x1xf32> to vector<1x128xf32>
      %553 = arith.cmpf oeq, %30, %552 : vector<1x128xf32>
      %cst_184 = arith.constant 1.000000e+00 : f32
      %554 = vector.broadcast %cst_184 : f32 to vector<1x128xf32>
      %555 = arith.select %553, %554, %507 : vector<1x128xi1>, vector<1x128xf32>
      %556 = vector.broadcast %c10_i32 : i32 to vector<1x128xi32>
      %557 = arith.cmpi eq, %29, %556 : vector<1x128xi32>
      %558 = vector.shape_cast %541 : vector<1x1xf32> to vector<1x1xf32>
      %559 = vector.broadcast %558 : vector<1x1xf32> to vector<1x128xf32>
      %560 = arith.select %557, %559, %512 : vector<1x128xi1>, vector<1x128xf32>
      %561 = vector.broadcast %c10_i32 : i32 to vector<1x128xi32>
      %562 = arith.cmpi eq, %29, %561 : vector<1x128xi32>
      %563 = vector.shape_cast %547 : vector<1x1xf32> to vector<1x1xf32>
      %564 = vector.broadcast %563 : vector<1x1xf32> to vector<1x128xf32>
      %565 = arith.select %562, %564, %517 : vector<1x128xi1>, vector<1x128xf32>
      %c11_i32 = arith.constant 11 : i32
      %566 = arith.index_cast %c11_i32 : i32 to index
      %c0_185 = arith.constant 0 : index
      %567 = vector.load %arg5[%566, %c0_185] : memref<128x128xf32, #tpu.memory_space<vmem>>, vector<1x128xf32>
      %568 = arith.mulf %567, %28 : vector<1x128xf32>
      %569 = arith.index_cast %c11_i32 : i32 to index
      %c0_186 = arith.constant 0 : index
      %570 = vector.load %arg6[%569, %c0_186] : memref<128x128xf32, #tpu.memory_space<vmem>>, vector<1x128xf32>
      %571 = arith.mulf %570, %28 : vector<1x128xf32>
      %cst_187 = arith.constant 5.000000e-01 : f32
      %572 = vector.broadcast %cst_187 : f32 to vector<1x128xf32>
      %573 = arith.cmpf ogt, %551, %572 : vector<1x128xf32>
      %cst_188 = arith.constant 0xFF800000 : f32
      %574 = vector.broadcast %cst_188 : f32 to vector<1x128xf32>
      %575 = arith.select %573, %574, %568 : vector<1x128xi1>, vector<1x128xf32>
      %cst_189 = arith.constant 5.000000e-01 : f32
      %576 = vector.broadcast %cst_189 : f32 to vector<1x128xf32>
      %577 = arith.cmpf ogt, %555, %576 : vector<1x128xf32>
      %cst_190 = arith.constant 0xFF800000 : f32
      %578 = vector.broadcast %cst_190 : f32 to vector<1x128xf32>
      %579 = arith.select %577, %578, %571 : vector<1x128xi1>, vector<1x128xf32>
      %cst_191 = arith.constant dense<0xFF800000> : vector<1xf32>
      %580 = vector.multi_reduction <maximumf>, %575, %cst_191 [1] : vector<1x128xf32> to vector<1xf32>
      %581 = vector.shape_cast %580 : vector<1xf32> to vector<1x1xf32>
      %cst_192 = arith.constant dense<0xFF800000> : vector<1xf32>
      %582 = vector.multi_reduction <maximumf>, %579, %cst_192 [1] : vector<1x128xf32> to vector<1xf32>
      %583 = vector.shape_cast %582 : vector<1xf32> to vector<1x1xf32>
      %584 = vector.broadcast %581 : vector<1x1xf32> to vector<1x128xf32>
      %585 = arith.cmpf oge, %575, %584 : vector<1x128xf32>
      %cst_193 = arith.constant 1.280000e+02 : f32
      %586 = vector.broadcast %cst_193 : f32 to vector<1x128xf32>
      %587 = arith.select %585, %30, %586 : vector<1x128xi1>, vector<1x128xf32>
      %cst_194 = arith.constant dense<0x7F800000> : vector<1xf32>
      %588 = vector.multi_reduction <minimumf>, %587, %cst_194 [1] : vector<1x128xf32> to vector<1xf32>
      %589 = vector.shape_cast %588 : vector<1xf32> to vector<1x1xf32>
      %590 = vector.broadcast %583 : vector<1x1xf32> to vector<1x128xf32>
      %591 = arith.cmpf oge, %579, %590 : vector<1x128xf32>
      %cst_195 = arith.constant 1.280000e+02 : f32
      %592 = vector.broadcast %cst_195 : f32 to vector<1x128xf32>
      %593 = arith.select %591, %30, %592 : vector<1x128xi1>, vector<1x128xf32>
      %cst_196 = arith.constant dense<0x7F800000> : vector<1xf32>
      %594 = vector.multi_reduction <minimumf>, %593, %cst_196 [1] : vector<1x128xf32> to vector<1xf32>
      %595 = vector.shape_cast %594 : vector<1xf32> to vector<1x1xf32>
      %596 = vector.broadcast %589 : vector<1x1xf32> to vector<1x128xf32>
      %597 = arith.cmpf oeq, %30, %596 : vector<1x128xf32>
      %cst_197 = arith.constant 1.000000e+00 : f32
      %598 = vector.broadcast %cst_197 : f32 to vector<1x128xf32>
      %599 = arith.select %597, %598, %551 : vector<1x128xi1>, vector<1x128xf32>
      %600 = vector.broadcast %595 : vector<1x1xf32> to vector<1x128xf32>
      %601 = arith.cmpf oeq, %30, %600 : vector<1x128xf32>
      %cst_198 = arith.constant 1.000000e+00 : f32
      %602 = vector.broadcast %cst_198 : f32 to vector<1x128xf32>
      %603 = arith.select %601, %602, %555 : vector<1x128xi1>, vector<1x128xf32>
      %604 = vector.broadcast %c11_i32 : i32 to vector<1x128xi32>
      %605 = arith.cmpi eq, %29, %604 : vector<1x128xi32>
      %606 = vector.shape_cast %589 : vector<1x1xf32> to vector<1x1xf32>
      %607 = vector.broadcast %606 : vector<1x1xf32> to vector<1x128xf32>
      %608 = arith.select %605, %607, %560 : vector<1x128xi1>, vector<1x128xf32>
      %609 = vector.broadcast %c11_i32 : i32 to vector<1x128xi32>
      %610 = arith.cmpi eq, %29, %609 : vector<1x128xi32>
      %611 = vector.shape_cast %595 : vector<1x1xf32> to vector<1x1xf32>
      %612 = vector.broadcast %611 : vector<1x1xf32> to vector<1x128xf32>
      %613 = arith.select %610, %612, %565 : vector<1x128xi1>, vector<1x128xf32>
      %c12_i32 = arith.constant 12 : i32
      %614 = arith.index_cast %c12_i32 : i32 to index
      %c0_199 = arith.constant 0 : index
      %615 = vector.load %arg5[%614, %c0_199] : memref<128x128xf32, #tpu.memory_space<vmem>>, vector<1x128xf32>
      %616 = arith.mulf %615, %28 : vector<1x128xf32>
      %617 = arith.index_cast %c12_i32 : i32 to index
      %c0_200 = arith.constant 0 : index
      %618 = vector.load %arg6[%617, %c0_200] : memref<128x128xf32, #tpu.memory_space<vmem>>, vector<1x128xf32>
      %619 = arith.mulf %618, %28 : vector<1x128xf32>
      %cst_201 = arith.constant 5.000000e-01 : f32
      %620 = vector.broadcast %cst_201 : f32 to vector<1x128xf32>
      %621 = arith.cmpf ogt, %599, %620 : vector<1x128xf32>
      %cst_202 = arith.constant 0xFF800000 : f32
      %622 = vector.broadcast %cst_202 : f32 to vector<1x128xf32>
      %623 = arith.select %621, %622, %616 : vector<1x128xi1>, vector<1x128xf32>
      %cst_203 = arith.constant 5.000000e-01 : f32
      %624 = vector.broadcast %cst_203 : f32 to vector<1x128xf32>
      %625 = arith.cmpf ogt, %603, %624 : vector<1x128xf32>
      %cst_204 = arith.constant 0xFF800000 : f32
      %626 = vector.broadcast %cst_204 : f32 to vector<1x128xf32>
      %627 = arith.select %625, %626, %619 : vector<1x128xi1>, vector<1x128xf32>
      %cst_205 = arith.constant dense<0xFF800000> : vector<1xf32>
      %628 = vector.multi_reduction <maximumf>, %623, %cst_205 [1] : vector<1x128xf32> to vector<1xf32>
      %629 = vector.shape_cast %628 : vector<1xf32> to vector<1x1xf32>
      %cst_206 = arith.constant dense<0xFF800000> : vector<1xf32>
      %630 = vector.multi_reduction <maximumf>, %627, %cst_206 [1] : vector<1x128xf32> to vector<1xf32>
      %631 = vector.shape_cast %630 : vector<1xf32> to vector<1x1xf32>
      %632 = vector.broadcast %629 : vector<1x1xf32> to vector<1x128xf32>
      %633 = arith.cmpf oge, %623, %632 : vector<1x128xf32>
      %cst_207 = arith.constant 1.280000e+02 : f32
      %634 = vector.broadcast %cst_207 : f32 to vector<1x128xf32>
      %635 = arith.select %633, %30, %634 : vector<1x128xi1>, vector<1x128xf32>
      %cst_208 = arith.constant dense<0x7F800000> : vector<1xf32>
      %636 = vector.multi_reduction <minimumf>, %635, %cst_208 [1] : vector<1x128xf32> to vector<1xf32>
      %637 = vector.shape_cast %636 : vector<1xf32> to vector<1x1xf32>
      %638 = vector.broadcast %631 : vector<1x1xf32> to vector<1x128xf32>
      %639 = arith.cmpf oge, %627, %638 : vector<1x128xf32>
      %cst_209 = arith.constant 1.280000e+02 : f32
      %640 = vector.broadcast %cst_209 : f32 to vector<1x128xf32>
      %641 = arith.select %639, %30, %640 : vector<1x128xi1>, vector<1x128xf32>
      %cst_210 = arith.constant dense<0x7F800000> : vector<1xf32>
      %642 = vector.multi_reduction <minimumf>, %641, %cst_210 [1] : vector<1x128xf32> to vector<1xf32>
      %643 = vector.shape_cast %642 : vector<1xf32> to vector<1x1xf32>
      %644 = vector.broadcast %637 : vector<1x1xf32> to vector<1x128xf32>
      %645 = arith.cmpf oeq, %30, %644 : vector<1x128xf32>
      %cst_211 = arith.constant 1.000000e+00 : f32
      %646 = vector.broadcast %cst_211 : f32 to vector<1x128xf32>
      %647 = arith.select %645, %646, %599 : vector<1x128xi1>, vector<1x128xf32>
      %648 = vector.broadcast %643 : vector<1x1xf32> to vector<1x128xf32>
      %649 = arith.cmpf oeq, %30, %648 : vector<1x128xf32>
      %cst_212 = arith.constant 1.000000e+00 : f32
      %650 = vector.broadcast %cst_212 : f32 to vector<1x128xf32>
      %651 = arith.select %649, %650, %603 : vector<1x128xi1>, vector<1x128xf32>
      %652 = vector.broadcast %c12_i32 : i32 to vector<1x128xi32>
      %653 = arith.cmpi eq, %29, %652 : vector<1x128xi32>
      %654 = vector.shape_cast %637 : vector<1x1xf32> to vector<1x1xf32>
      %655 = vector.broadcast %654 : vector<1x1xf32> to vector<1x128xf32>
      %656 = arith.select %653, %655, %608 : vector<1x128xi1>, vector<1x128xf32>
      %657 = vector.broadcast %c12_i32 : i32 to vector<1x128xi32>
      %658 = arith.cmpi eq, %29, %657 : vector<1x128xi32>
      %659 = vector.shape_cast %643 : vector<1x1xf32> to vector<1x1xf32>
      %660 = vector.broadcast %659 : vector<1x1xf32> to vector<1x128xf32>
      %661 = arith.select %658, %660, %613 : vector<1x128xi1>, vector<1x128xf32>
      %c13_i32 = arith.constant 13 : i32
      %662 = arith.index_cast %c13_i32 : i32 to index
      %c0_213 = arith.constant 0 : index
      %663 = vector.load %arg5[%662, %c0_213] : memref<128x128xf32, #tpu.memory_space<vmem>>, vector<1x128xf32>
      %664 = arith.mulf %663, %28 : vector<1x128xf32>
      %665 = arith.index_cast %c13_i32 : i32 to index
      %c0_214 = arith.constant 0 : index
      %666 = vector.load %arg6[%665, %c0_214] : memref<128x128xf32, #tpu.memory_space<vmem>>, vector<1x128xf32>
      %667 = arith.mulf %666, %28 : vector<1x128xf32>
      %cst_215 = arith.constant 5.000000e-01 : f32
      %668 = vector.broadcast %cst_215 : f32 to vector<1x128xf32>
      %669 = arith.cmpf ogt, %647, %668 : vector<1x128xf32>
      %cst_216 = arith.constant 0xFF800000 : f32
      %670 = vector.broadcast %cst_216 : f32 to vector<1x128xf32>
      %671 = arith.select %669, %670, %664 : vector<1x128xi1>, vector<1x128xf32>
      %cst_217 = arith.constant 5.000000e-01 : f32
      %672 = vector.broadcast %cst_217 : f32 to vector<1x128xf32>
      %673 = arith.cmpf ogt, %651, %672 : vector<1x128xf32>
      %cst_218 = arith.constant 0xFF800000 : f32
      %674 = vector.broadcast %cst_218 : f32 to vector<1x128xf32>
      %675 = arith.select %673, %674, %667 : vector<1x128xi1>, vector<1x128xf32>
      %cst_219 = arith.constant dense<0xFF800000> : vector<1xf32>
      %676 = vector.multi_reduction <maximumf>, %671, %cst_219 [1] : vector<1x128xf32> to vector<1xf32>
      %677 = vector.shape_cast %676 : vector<1xf32> to vector<1x1xf32>
      %cst_220 = arith.constant dense<0xFF800000> : vector<1xf32>
      %678 = vector.multi_reduction <maximumf>, %675, %cst_220 [1] : vector<1x128xf32> to vector<1xf32>
      %679 = vector.shape_cast %678 : vector<1xf32> to vector<1x1xf32>
      %680 = vector.broadcast %677 : vector<1x1xf32> to vector<1x128xf32>
      %681 = arith.cmpf oge, %671, %680 : vector<1x128xf32>
      %cst_221 = arith.constant 1.280000e+02 : f32
      %682 = vector.broadcast %cst_221 : f32 to vector<1x128xf32>
      %683 = arith.select %681, %30, %682 : vector<1x128xi1>, vector<1x128xf32>
      %cst_222 = arith.constant dense<0x7F800000> : vector<1xf32>
      %684 = vector.multi_reduction <minimumf>, %683, %cst_222 [1] : vector<1x128xf32> to vector<1xf32>
      %685 = vector.shape_cast %684 : vector<1xf32> to vector<1x1xf32>
      %686 = vector.broadcast %679 : vector<1x1xf32> to vector<1x128xf32>
      %687 = arith.cmpf oge, %675, %686 : vector<1x128xf32>
      %cst_223 = arith.constant 1.280000e+02 : f32
      %688 = vector.broadcast %cst_223 : f32 to vector<1x128xf32>
      %689 = arith.select %687, %30, %688 : vector<1x128xi1>, vector<1x128xf32>
      %cst_224 = arith.constant dense<0x7F800000> : vector<1xf32>
      %690 = vector.multi_reduction <minimumf>, %689, %cst_224 [1] : vector<1x128xf32> to vector<1xf32>
      %691 = vector.shape_cast %690 : vector<1xf32> to vector<1x1xf32>
      %692 = vector.broadcast %685 : vector<1x1xf32> to vector<1x128xf32>
      %693 = arith.cmpf oeq, %30, %692 : vector<1x128xf32>
      %cst_225 = arith.constant 1.000000e+00 : f32
      %694 = vector.broadcast %cst_225 : f32 to vector<1x128xf32>
      %695 = arith.select %693, %694, %647 : vector<1x128xi1>, vector<1x128xf32>
      %696 = vector.broadcast %691 : vector<1x1xf32> to vector<1x128xf32>
      %697 = arith.cmpf oeq, %30, %696 : vector<1x128xf32>
      %cst_226 = arith.constant 1.000000e+00 : f32
      %698 = vector.broadcast %cst_226 : f32 to vector<1x128xf32>
      %699 = arith.select %697, %698, %651 : vector<1x128xi1>, vector<1x128xf32>
      %700 = vector.broadcast %c13_i32 : i32 to vector<1x128xi32>
      %701 = arith.cmpi eq, %29, %700 : vector<1x128xi32>
      %702 = vector.shape_cast %685 : vector<1x1xf32> to vector<1x1xf32>
      %703 = vector.broadcast %702 : vector<1x1xf32> to vector<1x128xf32>
      %704 = arith.select %701, %703, %656 : vector<1x128xi1>, vector<1x128xf32>
      %705 = vector.broadcast %c13_i32 : i32 to vector<1x128xi32>
      %706 = arith.cmpi eq, %29, %705 : vector<1x128xi32>
      %707 = vector.shape_cast %691 : vector<1x1xf32> to vector<1x1xf32>
      %708 = vector.broadcast %707 : vector<1x1xf32> to vector<1x128xf32>
      %709 = arith.select %706, %708, %661 : vector<1x128xi1>, vector<1x128xf32>
      %c14_i32 = arith.constant 14 : i32
      %710 = arith.index_cast %c14_i32 : i32 to index
      %c0_227 = arith.constant 0 : index
      %711 = vector.load %arg5[%710, %c0_227] : memref<128x128xf32, #tpu.memory_space<vmem>>, vector<1x128xf32>
      %712 = arith.mulf %711, %28 : vector<1x128xf32>
      %713 = arith.index_cast %c14_i32 : i32 to index
      %c0_228 = arith.constant 0 : index
      %714 = vector.load %arg6[%713, %c0_228] : memref<128x128xf32, #tpu.memory_space<vmem>>, vector<1x128xf32>
      %715 = arith.mulf %714, %28 : vector<1x128xf32>
      %cst_229 = arith.constant 5.000000e-01 : f32
      %716 = vector.broadcast %cst_229 : f32 to vector<1x128xf32>
      %717 = arith.cmpf ogt, %695, %716 : vector<1x128xf32>
      %cst_230 = arith.constant 0xFF800000 : f32
      %718 = vector.broadcast %cst_230 : f32 to vector<1x128xf32>
      %719 = arith.select %717, %718, %712 : vector<1x128xi1>, vector<1x128xf32>
      %cst_231 = arith.constant 5.000000e-01 : f32
      %720 = vector.broadcast %cst_231 : f32 to vector<1x128xf32>
      %721 = arith.cmpf ogt, %699, %720 : vector<1x128xf32>
      %cst_232 = arith.constant 0xFF800000 : f32
      %722 = vector.broadcast %cst_232 : f32 to vector<1x128xf32>
      %723 = arith.select %721, %722, %715 : vector<1x128xi1>, vector<1x128xf32>
      %cst_233 = arith.constant dense<0xFF800000> : vector<1xf32>
      %724 = vector.multi_reduction <maximumf>, %719, %cst_233 [1] : vector<1x128xf32> to vector<1xf32>
      %725 = vector.shape_cast %724 : vector<1xf32> to vector<1x1xf32>
      %cst_234 = arith.constant dense<0xFF800000> : vector<1xf32>
      %726 = vector.multi_reduction <maximumf>, %723, %cst_234 [1] : vector<1x128xf32> to vector<1xf32>
      %727 = vector.shape_cast %726 : vector<1xf32> to vector<1x1xf32>
      %728 = vector.broadcast %725 : vector<1x1xf32> to vector<1x128xf32>
      %729 = arith.cmpf oge, %719, %728 : vector<1x128xf32>
      %cst_235 = arith.constant 1.280000e+02 : f32
      %730 = vector.broadcast %cst_235 : f32 to vector<1x128xf32>
      %731 = arith.select %729, %30, %730 : vector<1x128xi1>, vector<1x128xf32>
      %cst_236 = arith.constant dense<0x7F800000> : vector<1xf32>
      %732 = vector.multi_reduction <minimumf>, %731, %cst_236 [1] : vector<1x128xf32> to vector<1xf32>
      %733 = vector.shape_cast %732 : vector<1xf32> to vector<1x1xf32>
      %734 = vector.broadcast %727 : vector<1x1xf32> to vector<1x128xf32>
      %735 = arith.cmpf oge, %723, %734 : vector<1x128xf32>
      %cst_237 = arith.constant 1.280000e+02 : f32
      %736 = vector.broadcast %cst_237 : f32 to vector<1x128xf32>
      %737 = arith.select %735, %30, %736 : vector<1x128xi1>, vector<1x128xf32>
      %cst_238 = arith.constant dense<0x7F800000> : vector<1xf32>
      %738 = vector.multi_reduction <minimumf>, %737, %cst_238 [1] : vector<1x128xf32> to vector<1xf32>
      %739 = vector.shape_cast %738 : vector<1xf32> to vector<1x1xf32>
      %740 = vector.broadcast %733 : vector<1x1xf32> to vector<1x128xf32>
      %741 = arith.cmpf oeq, %30, %740 : vector<1x128xf32>
      %cst_239 = arith.constant 1.000000e+00 : f32
      %742 = vector.broadcast %cst_239 : f32 to vector<1x128xf32>
      %743 = arith.select %741, %742, %695 : vector<1x128xi1>, vector<1x128xf32>
      %744 = vector.broadcast %739 : vector<1x1xf32> to vector<1x128xf32>
      %745 = arith.cmpf oeq, %30, %744 : vector<1x128xf32>
      %cst_240 = arith.constant 1.000000e+00 : f32
      %746 = vector.broadcast %cst_240 : f32 to vector<1x128xf32>
      %747 = arith.select %745, %746, %699 : vector<1x128xi1>, vector<1x128xf32>
      %748 = vector.broadcast %c14_i32 : i32 to vector<1x128xi32>
      %749 = arith.cmpi eq, %29, %748 : vector<1x128xi32>
      %750 = vector.shape_cast %733 : vector<1x1xf32> to vector<1x1xf32>
      %751 = vector.broadcast %750 : vector<1x1xf32> to vector<1x128xf32>
      %752 = arith.select %749, %751, %704 : vector<1x128xi1>, vector<1x128xf32>
      %753 = vector.broadcast %c14_i32 : i32 to vector<1x128xi32>
      %754 = arith.cmpi eq, %29, %753 : vector<1x128xi32>
      %755 = vector.shape_cast %739 : vector<1x1xf32> to vector<1x1xf32>
      %756 = vector.broadcast %755 : vector<1x1xf32> to vector<1x128xf32>
      %757 = arith.select %754, %756, %709 : vector<1x128xi1>, vector<1x128xf32>
      %c15_i32 = arith.constant 15 : i32
      %758 = arith.index_cast %c15_i32 : i32 to index
      %c0_241 = arith.constant 0 : index
      %759 = vector.load %arg5[%758, %c0_241] : memref<128x128xf32, #tpu.memory_space<vmem>>, vector<1x128xf32>
      %760 = arith.mulf %759, %28 : vector<1x128xf32>
      %761 = arith.index_cast %c15_i32 : i32 to index
      %c0_242 = arith.constant 0 : index
      %762 = vector.load %arg6[%761, %c0_242] : memref<128x128xf32, #tpu.memory_space<vmem>>, vector<1x128xf32>
      %763 = arith.mulf %762, %28 : vector<1x128xf32>
      %cst_243 = arith.constant 5.000000e-01 : f32
      %764 = vector.broadcast %cst_243 : f32 to vector<1x128xf32>
      %765 = arith.cmpf ogt, %743, %764 : vector<1x128xf32>
      %cst_244 = arith.constant 0xFF800000 : f32
      %766 = vector.broadcast %cst_244 : f32 to vector<1x128xf32>
      %767 = arith.select %765, %766, %760 : vector<1x128xi1>, vector<1x128xf32>
      %cst_245 = arith.constant 5.000000e-01 : f32
      %768 = vector.broadcast %cst_245 : f32 to vector<1x128xf32>
      %769 = arith.cmpf ogt, %747, %768 : vector<1x128xf32>
      %cst_246 = arith.constant 0xFF800000 : f32
      %770 = vector.broadcast %cst_246 : f32 to vector<1x128xf32>
      %771 = arith.select %769, %770, %763 : vector<1x128xi1>, vector<1x128xf32>
      %cst_247 = arith.constant dense<0xFF800000> : vector<1xf32>
      %772 = vector.multi_reduction <maximumf>, %767, %cst_247 [1] : vector<1x128xf32> to vector<1xf32>
      %773 = vector.shape_cast %772 : vector<1xf32> to vector<1x1xf32>
      %cst_248 = arith.constant dense<0xFF800000> : vector<1xf32>
      %774 = vector.multi_reduction <maximumf>, %771, %cst_248 [1] : vector<1x128xf32> to vector<1xf32>
      %775 = vector.shape_cast %774 : vector<1xf32> to vector<1x1xf32>
      %776 = vector.broadcast %773 : vector<1x1xf32> to vector<1x128xf32>
      %777 = arith.cmpf oge, %767, %776 : vector<1x128xf32>
      %cst_249 = arith.constant 1.280000e+02 : f32
      %778 = vector.broadcast %cst_249 : f32 to vector<1x128xf32>
      %779 = arith.select %777, %30, %778 : vector<1x128xi1>, vector<1x128xf32>
      %cst_250 = arith.constant dense<0x7F800000> : vector<1xf32>
      %780 = vector.multi_reduction <minimumf>, %779, %cst_250 [1] : vector<1x128xf32> to vector<1xf32>
      %781 = vector.shape_cast %780 : vector<1xf32> to vector<1x1xf32>
      %782 = vector.broadcast %775 : vector<1x1xf32> to vector<1x128xf32>
      %783 = arith.cmpf oge, %771, %782 : vector<1x128xf32>
      %cst_251 = arith.constant 1.280000e+02 : f32
      %784 = vector.broadcast %cst_251 : f32 to vector<1x128xf32>
      %785 = arith.select %783, %30, %784 : vector<1x128xi1>, vector<1x128xf32>
      %cst_252 = arith.constant dense<0x7F800000> : vector<1xf32>
      %786 = vector.multi_reduction <minimumf>, %785, %cst_252 [1] : vector<1x128xf32> to vector<1xf32>
      %787 = vector.shape_cast %786 : vector<1xf32> to vector<1x1xf32>
      %788 = vector.broadcast %781 : vector<1x1xf32> to vector<1x128xf32>
      %789 = arith.cmpf oeq, %30, %788 : vector<1x128xf32>
      %cst_253 = arith.constant 1.000000e+00 : f32
      %790 = vector.broadcast %cst_253 : f32 to vector<1x128xf32>
      %791 = arith.select %789, %790, %743 : vector<1x128xi1>, vector<1x128xf32>
      %792 = vector.broadcast %787 : vector<1x1xf32> to vector<1x128xf32>
      %793 = arith.cmpf oeq, %30, %792 : vector<1x128xf32>
      %cst_254 = arith.constant 1.000000e+00 : f32
      %794 = vector.broadcast %cst_254 : f32 to vector<1x128xf32>
      %795 = arith.select %793, %794, %747 : vector<1x128xi1>, vector<1x128xf32>
      %796 = vector.broadcast %c15_i32 : i32 to vector<1x128xi32>
      %797 = arith.cmpi eq, %29, %796 : vector<1x128xi32>
      %798 = vector.shape_cast %781 : vector<1x1xf32> to vector<1x1xf32>
      %799 = vector.broadcast %798 : vector<1x1xf32> to vector<1x128xf32>
      %800 = arith.select %797, %799, %752 : vector<1x128xi1>, vector<1x128xf32>
      %801 = vector.broadcast %c15_i32 : i32 to vector<1x128xi32>
      %802 = arith.cmpi eq, %29, %801 : vector<1x128xi32>
      %803 = vector.shape_cast %787 : vector<1x1xf32> to vector<1x1xf32>
      %804 = vector.broadcast %803 : vector<1x1xf32> to vector<1x128xf32>
      %805 = arith.select %802, %804, %757 : vector<1x128xi1>, vector<1x128xf32>
      %c16_i32 = arith.constant 16 : i32
      %806 = tpu.iota {dimensions = array<i32: 0>} : vector<2x128xi32>
      %c0_i32_255 = arith.constant 0 : i32
      %807 = vector.broadcast %c0_i32_255 : i32 to vector<2x128xi32>
      %808 = arith.cmpi eq, %806, %807 : vector<2x128xi32>
      %809 = vector.shape_cast %800 : vector<1x128xf32> to vector<1x128xf32>
      %810 = vector.broadcast %809 : vector<1x128xf32> to vector<2x128xf32>
      %811 = vector.shape_cast %805 : vector<1x128xf32> to vector<1x128xf32>
      %812 = vector.broadcast %811 : vector<1x128xf32> to vector<2x128xf32>
      %813 = arith.select %808, %810, %812 : vector<2x128xi1>, vector<2x128xf32>
      %814 = arith.fptosi %813 : vector<2x128xf32> to vector<2x128xi32>
      %c0_256 = arith.constant 0 : index
      %c0_257 = arith.constant 0 : index
      %815 = vector.load %arg4[%c0_256, %c0_257] : memref<2x128xi32, #tpu.memory_space<vmem>>, vector<2x128xi32>
      tpu.vector_store %arg4[%c0_256, %c0_257], %814 {strides = array<i32>} : memref<2x128xi32, #tpu.memory_space<vmem>>, vector<2x128xi32>,
    } else {
    }
    return
  }
  func.func @transform_0(%arg0: i32) -> (i32, i32) {
    %c0_i32 = arith.constant 0 : i32
    %c0_i32_0 = arith.constant 0 : i32
    return %arg0, %c0_i32 : i32, i32
  }
  func.func @transform_1(%arg0: i32) -> (i32, i32) {
    %c0_i32 = arith.constant 0 : i32
    %c0_i32_0 = arith.constant 0 : i32
    return %arg0, %c0_i32 : i32, i32
  }
  func.func @transform_2(%arg0: i32) -> (i32, i32) {
    %c0_i32 = arith.constant 0 : i32
    %c0_i32_0 = arith.constant 0 : i32
    return %arg0, %c0_i32 : i32, i32
  }
  func.func @transform_3(%arg0: i32) -> (i32, i32) {
    %c0_i32 = arith.constant 0 : i32
    %c0_i32_0 = arith.constant 0 : i32
    %c0_i32_1 = arith.constant 0 : i32
    return %c0_i32, %c0_i32_0 : i32, i32
  }
}

module attributes {stable_mosaic.version = 11 : i64} {
  func.func @_loss_kernel(%arg0: i32, %arg1: memref<2x128xi32, #tpu.memory_space<vmem>>, %arg2: memref<32x128xf32, #tpu.memory_space<vmem>>, %arg3: memref<32x128xf32, #tpu.memory_space<vmem>>, %arg4: memref<32x128xf32, #tpu.memory_space<vmem>>, %arg5: memref<4x32xf32, #tpu.memory_space<vmem>>, %arg6: memref<4x4xf32, #tpu.memory_space<vmem>>, %arg7: memref<3x32xf32, #tpu.memory_space<vmem>>, %arg8: memref<1x128xf32, #tpu.memory_space<vmem>>, %arg9: memref<1x128xf32, #tpu.memory_space<vmem>>) attributes {dimension_semantics = [#tpu.dimension_semantics<arbitrary>], iteration_bounds = array<i64: 1>, scalar_prefetch = 0 : i64, scratch_operands = 1 : i64, tpu.core_type = #tpu.core_type<tc>, window_params = [{pipeline_mode = #tpu.pipeline_mode<synchronous>, transform_indices = @transform_0, window_bounds = array<i64: 2, 128>}, {transform_indices = @transform_1, window_bounds = array<i64: 32, 128>}, {transform_indices = @transform_2, window_bounds = array<i64: 32, 128>}, {transform_indices = @transform_3, window_bounds = array<i64: 32, 128>}, {transform_indices = @transform_4, window_bounds = array<i64: 4, 32>}, {pipeline_mode = #tpu.pipeline_mode<synchronous>, transform_indices = @transform_5, window_bounds = array<i64: 4, 4>}, {pipeline_mode = #tpu.pipeline_mode<synchronous>, transform_indices = @transform_6, window_bounds = array<i64: 3, 32>}, {pipeline_mode = #tpu.pipeline_mode<synchronous>, transform_indices = @transform_7, window_bounds = array<i64: 1, 128>}]} {
    %c32_i32 = arith.constant 32 : i32
    %0 = arith.muli %arg0, %c32_i32 : i32
    %1 = tpu.iota {dimensions = array<i32: 1>} : vector<1x128xi32>
    %c0_i32 = arith.constant 0 : i32
    %2 = arith.cmpi eq, %arg0, %c0_i32 : i32
    %3 = arith.extui %2 : i1 to i32
    %c0_i32_0 = arith.constant 0 : i32
    %4 = arith.cmpi ne, %3, %c0_i32_0 : i32
    scf.if %4 {
      %cst_44 = arith.constant 0.000000e+00 : f32
      %138 = vector.broadcast %cst_44 : f32 to vector<1x128xf32>
      %c0_45 = arith.constant 0 : index
      %c0_46 = arith.constant 0 : index
      %139 = vector.load %arg9[%c0_45, %c0_46] : memref<1x128xf32, #tpu.memory_space<vmem>>, vector<1x128xf32>
      tpu.vector_store %arg9[%c0_45, %c0_46], %138 {strides = array<i32>} : memref<1x128xf32, #tpu.memory_space<vmem>>, vector<1x128xf32>,
    } else {
    }
    %c0 = arith.constant 0 : index
    %c0_1 = arith.constant 0 : index
    %5 = vector.load %arg1[%c0, %c0_1] : memref<2x128xi32, #tpu.memory_space<vmem>>, vector<2x128xi32>
    %6 = tpu.iota {dimensions = array<i32: 0>} : vector<128x128xi32>
    %7 = vector.extract_strided_slice %5 {offsets = [0, 0], sizes = [1, 128], strides = [1, 1]} : vector<2x128xi32> to vector<1x128xi32>
    %8 = vector.broadcast %7 : vector<1x128xi32> to vector<128x128xi32>
    %9 = arith.cmpi eq, %6, %8 : vector<128x128xi32>
    %10 = arith.extui %9 : vector<128x128xi1> to vector<128x128xi32>
    %11 = arith.sitofp %10 : vector<128x128xi32> to vector<128x128xf32>
    %12 = vector.extract_strided_slice %5 {offsets = [1, 0], sizes = [1, 128], strides = [1, 1]} : vector<2x128xi32> to vector<1x128xi32>
    %13 = vector.broadcast %12 : vector<1x128xi32> to vector<128x128xi32>
    %14 = arith.cmpi eq, %6, %13 : vector<128x128xi32>
    %15 = arith.extui %14 : vector<128x128xi1> to vector<128x128xi32>
    %16 = arith.sitofp %15 : vector<128x128xi32> to vector<128x128xf32>
    %c0_2 = arith.constant 0 : index
    %c0_3 = arith.constant 0 : index
    %17 = vector.load %arg2[%c0_2, %c0_3] : memref<32x128xf32, #tpu.memory_space<vmem>>, vector<32x128xf32>
    %c0_4 = arith.constant 0 : index
    %c0_5 = arith.constant 0 : index
    %18 = vector.load %arg3[%c0_4, %c0_5] : memref<32x128xf32, #tpu.memory_space<vmem>>, vector<32x128xf32>
    %c0_6 = arith.constant 0 : index
    %c0_7 = arith.constant 0 : index
    %19 = vector.load %arg4[%c0_6, %c0_7] : memref<32x128xf32, #tpu.memory_space<vmem>>, vector<32x128xf32>
    %cst = arith.constant dense<0.000000e+00> : vector<32x128xf32>
    %20 = tpu.matmul %18, %11, %cst {dimension_numbers = #tpu.dot_dimension_numbers<[1], [0], [0], [1], [0, 0, 1, 1], [], []>} : vector<32x128xf32>, vector<128x128xf32>, vector<32x128xf32> -> vector<32x128xf32>
    %cst_8 = arith.constant dense<0.000000e+00> : vector<32x128xf32>
    %21 = tpu.matmul %19, %16, %cst_8 {dimension_numbers = #tpu.dot_dimension_numbers<[1], [0], [0], [1], [0, 0, 1, 1], [], []>} : vector<32x128xf32>, vector<128x128xf32>, vector<32x128xf32> -> vector<32x128xf32>
    %22 = tpu.iota {dimensions = array<i32: 0>} : vector<32x1xi32>
    %23 = vector.broadcast %0 : i32 to vector<32x1xi32>
    %24 = arith.addi %22, %23 : vector<32x1xi32>
    %c32_i32_9 = arith.constant 32 : i32
    %25 = vector.broadcast %c32_i32_9 : i32 to vector<32x1xi32>
    %26 = arith.cmpi slt, %24, %25 : vector<32x1xi32>
    %27 = arith.extui %26 : vector<32x1xi1> to vector<32x1xi32>
    %28 = arith.sitofp %27 : vector<32x1xi32> to vector<32x1xf32>
    %29 = arith.mulf %17, %17 : vector<32x128xf32>
    %cst_10 = arith.constant dense<0.000000e+00> : vector<32xf32>
    %30 = vector.multi_reduction <add>, %29, %cst_10 [1] : vector<32x128xf32> to vector<32xf32>
    %31 = vector.shape_cast %30 : vector<32xf32> to vector<32x1xf32>
    %32 = math.sqrt %31 : vector<32x1xf32>
    %33 = arith.mulf %18, %18 : vector<32x128xf32>
    %cst_11 = arith.constant dense<0.000000e+00> : vector<32xf32>
    %34 = vector.multi_reduction <add>, %33, %cst_11 [1] : vector<32x128xf32> to vector<32xf32>
    %35 = vector.shape_cast %34 : vector<32xf32> to vector<32x1xf32>
    %36 = math.sqrt %35 : vector<32x1xf32>
    %37 = arith.mulf %19, %19 : vector<32x128xf32>
    %cst_12 = arith.constant dense<0.000000e+00> : vector<32xf32>
    %38 = vector.multi_reduction <add>, %37, %cst_12 [1] : vector<32x128xf32> to vector<32xf32>
    %39 = vector.shape_cast %38 : vector<32xf32> to vector<32x1xf32>
    %40 = math.sqrt %39 : vector<32x1xf32>
    %41 = arith.mulf %17, %20 : vector<32x128xf32>
    %cst_13 = arith.constant dense<0.000000e+00> : vector<32xf32>
    %42 = vector.multi_reduction <add>, %41, %cst_13 [1] : vector<32x128xf32> to vector<32xf32>
    %43 = vector.shape_cast %42 : vector<32xf32> to vector<32x1xf32>
    %44 = arith.mulf %32, %36 : vector<32x1xf32>
    %cst_14 = arith.constant 9.99999993E-9 : f32
    %45 = vector.broadcast %cst_14 : f32 to vector<32x1xf32>
    %46 = arith.maximumf %44, %45 : vector<32x1xf32>
    %47 = arith.divf %43, %46 : vector<32x1xf32>
    %cst_15 = arith.constant 3.000000e+00 : f32
    %48 = vector.broadcast %cst_15 : f32 to vector<32x1xf32>
    %49 = arith.subf %48, %47 : vector<32x1xf32>
    %50 = arith.mulf %17, %21 : vector<32x128xf32>
    %cst_16 = arith.constant dense<0.000000e+00> : vector<32xf32>
    %51 = vector.multi_reduction <add>, %50, %cst_16 [1] : vector<32x128xf32> to vector<32xf32>
    %52 = vector.shape_cast %51 : vector<32xf32> to vector<32x1xf32>
    %53 = arith.mulf %32, %40 : vector<32x1xf32>
    %cst_17 = arith.constant 9.99999993E-9 : f32
    %54 = vector.broadcast %cst_17 : f32 to vector<32x1xf32>
    %55 = arith.maximumf %53, %54 : vector<32x1xf32>
    %56 = arith.divf %52, %55 : vector<32x1xf32>
    %57 = arith.subf %49, %56 : vector<32x1xf32>
    %58 = arith.mulf %20, %21 : vector<32x128xf32>
    %cst_18 = arith.constant dense<0.000000e+00> : vector<32xf32>
    %59 = vector.multi_reduction <add>, %58, %cst_18 [1] : vector<32x128xf32> to vector<32xf32>
    %60 = vector.shape_cast %59 : vector<32xf32> to vector<32x1xf32>
    %61 = arith.mulf %36, %40 : vector<32x1xf32>
    %cst_19 = arith.constant 9.99999993E-9 : f32
    %62 = vector.broadcast %cst_19 : f32 to vector<32x1xf32>
    %63 = arith.maximumf %61, %62 : vector<32x1xf32>
    %64 = arith.divf %60, %63 : vector<32x1xf32>
    %65 = arith.subf %57, %64 : vector<32x1xf32>
    %66 = arith.mulf %28, %65 : vector<32x1xf32>
    %cst_20 = arith.constant dense<0.000000e+00> : vector<1xf32>
    %67 = vector.multi_reduction <add>, %66, %cst_20 [0] : vector<32x1xf32> to vector<1xf32>
    %68 = vector.shape_cast %67 : vector<1xf32> to vector<1x1xf32>
    %69 = tpu.iota {dimensions = array<i32: 1>} : vector<1x32xi32>
    %70 = vector.broadcast %0 : i32 to vector<1x32xi32>
    %71 = arith.addi %69, %70 : vector<1x32xi32>
    %c32_i32_21 = arith.constant 32 : i32
    %72 = vector.broadcast %c32_i32_21 : i32 to vector<1x32xi32>
    %73 = arith.cmpi slt, %71, %72 : vector<1x32xi32>
    %74 = arith.extui %73 : vector<1x32xi1> to vector<1x32xi32>
    %75 = arith.sitofp %74 : vector<1x32xi32> to vector<1x32xf32>
    %c0_22 = arith.constant 0 : index
    %c0_23 = arith.constant 0 : index
    %76 = vector.load %arg5[%c0_22, %c0_23] : memref<4x32xf32, #tpu.memory_space<vmem>>, vector<4x32xf32>
    %77 = vector.extract_strided_slice %76 {offsets = [3, 0], sizes = [1, 32], strides = [1, 1]} : vector<4x32xf32> to vector<1x32xf32>
    %78 = vector.extract_strided_slice %76 {offsets = [0, 0], sizes = [1, 32], strides = [1, 1]} : vector<4x32xf32> to vector<1x32xf32>
    %79 = arith.mulf %78, %77 : vector<1x32xf32>
    %cst_24 = arith.constant 9.99999997E-7 : f32
    %cst_25 = arith.constant 0.999998986 : f32
    %80 = vector.broadcast %cst_24 : f32 to vector<1x32xf32>
    %81 = arith.maximumf %80, %79 : vector<1x32xf32>
    %82 = vector.broadcast %cst_25 : f32 to vector<1x32xf32>
    %83 = arith.minimumf %82, %81 : vector<1x32xf32>
    %84 = vector.extract_strided_slice %76 {offsets = [1, 0], sizes = [1, 32], strides = [1, 1]} : vector<4x32xf32> to vector<1x32xf32>
    %85 = arith.mulf %84, %77 : vector<1x32xf32>
    %cst_26 = arith.constant 9.99999997E-7 : f32
    %cst_27 = arith.constant 0.999998986 : f32
    %86 = vector.broadcast %cst_26 : f32 to vector<1x32xf32>
    %87 = arith.maximumf %86, %85 : vector<1x32xf32>
    %88 = vector.broadcast %cst_27 : f32 to vector<1x32xf32>
    %89 = arith.minimumf %88, %87 : vector<1x32xf32>
    %90 = vector.extract_strided_slice %76 {offsets = [2, 0], sizes = [1, 32], strides = [1, 1]} : vector<4x32xf32> to vector<1x32xf32>
    %91 = arith.mulf %90, %77 : vector<1x32xf32>
    %cst_28 = arith.constant 9.99999997E-7 : f32
    %cst_29 = arith.constant 0.999998986 : f32
    %92 = vector.broadcast %cst_28 : f32 to vector<1x32xf32>
    %93 = arith.maximumf %92, %91 : vector<1x32xf32>
    %94 = vector.broadcast %cst_29 : f32 to vector<1x32xf32>
    %95 = arith.minimumf %94, %93 : vector<1x32xf32>
    %96 = math.log %83 : vector<1x32xf32>
    %cst_30 = arith.constant 1.000000e+00 : f32
    %97 = vector.broadcast %cst_30 : f32 to vector<1x32xf32>
    %98 = arith.subf %97, %83 : vector<1x32xf32>
    %99 = math.log %98 : vector<1x32xf32>
    %100 = math.log %89 : vector<1x32xf32>
    %cst_31 = arith.constant 1.000000e+00 : f32
    %101 = vector.broadcast %cst_31 : f32 to vector<1x32xf32>
    %102 = arith.subf %101, %89 : vector<1x32xf32>
    %103 = math.log %102 : vector<1x32xf32>
    %104 = arith.addf %89, %95 : vector<1x32xf32>
    %105 = arith.mulf %104, %96 : vector<1x32xf32>
    %cst_32 = arith.constant 2.000000e+00 : f32
    %106 = vector.broadcast %cst_32 : f32 to vector<1x32xf32>
    %107 = arith.subf %106, %104 : vector<1x32xf32>
    %108 = arith.mulf %107, %99 : vector<1x32xf32>
    %109 = arith.addf %105, %108 : vector<1x32xf32>
    %110 = arith.mulf %95, %100 : vector<1x32xf32>
    %111 = arith.addf %109, %110 : vector<1x32xf32>
    %cst_33 = arith.constant 1.000000e+00 : f32
    %112 = vector.broadcast %cst_33 : f32 to vector<1x32xf32>
    %113 = arith.subf %112, %95 : vector<1x32xf32>
    %114 = arith.mulf %113, %103 : vector<1x32xf32>
    %115 = arith.addf %111, %114 : vector<1x32xf32>
    %cst_34 = arith.constant 0.000000e+00 : f32
    %116 = vector.broadcast %cst_34 : f32 to vector<1x32xf32>
    %117 = arith.subf %116, %115 : vector<1x32xf32>
    %118 = arith.mulf %75, %117 : vector<1x32xf32>
    %cst_35 = arith.constant dense<0.000000e+00> : vector<1xf32>
    %119 = vector.multi_reduction <add>, %118, %cst_35 [1] : vector<1x32xf32> to vector<1xf32>
    %120 = vector.shape_cast %119 : vector<1xf32> to vector<1x1xf32>
    %c0_36 = arith.constant 0 : index
    %c0_37 = arith.constant 0 : index
    %121 = vector.load %arg9[%c0_36, %c0_37] : memref<1x128xf32, #tpu.memory_space<vmem>>, vector<1x128xf32>
    %c0_i32_38 = arith.constant 0 : i32
    %122 = vector.broadcast %c0_i32_38 : i32 to vector<1x128xi32>
    %123 = arith.cmpi eq, %1, %122 : vector<1x128xi32>
    %c1_i32 = arith.constant 1 : i32
    %124 = vector.broadcast %c1_i32 : i32 to vector<1x128xi32>
    %125 = arith.cmpi eq, %1, %124 : vector<1x128xi32>
    %cst_39 = arith.constant 0.000000e+00 : f32
    %126 = vector.shape_cast %120 : vector<1x1xf32> to vector<1x1xf32>
    %127 = vector.broadcast %126 : vector<1x1xf32> to vector<1x128xf32>
    %128 = vector.broadcast %cst_39 : f32 to vector<1x128xf32>
    %129 = arith.select %125, %127, %128 : vector<1x128xi1>, vector<1x128xf32>
    %130 = vector.shape_cast %68 : vector<1x1xf32> to vector<1x1xf32>
    %131 = vector.broadcast %130 : vector<1x1xf32> to vector<1x128xf32>
    %132 = arith.select %123, %131, %129 : vector<1x128xi1>, vector<1x128xf32>
    %133 = arith.addf %121, %132 : vector<1x128xf32>
    %c0_40 = arith.constant 0 : index
    %c0_41 = arith.constant 0 : index
    %134 = vector.load %arg9[%c0_40, %c0_41] : memref<1x128xf32, #tpu.memory_space<vmem>>, vector<1x128xf32>
    tpu.vector_store %arg9[%c0_40, %c0_41], %133 {strides = array<i32>} : memref<1x128xf32, #tpu.memory_space<vmem>>, vector<1x128xf32>,
    %c0_i32_42 = arith.constant 0 : i32
    %135 = arith.cmpi eq, %arg0, %c0_i32_42 : i32
    %136 = arith.extui %135 : i1 to i32
    %c0_i32_43 = arith.constant 0 : i32
    %137 = arith.cmpi ne, %136, %c0_i32_43 : i32
    scf.if %137 {
      %c0_44 = arith.constant 0 : index
      %c0_45 = arith.constant 0 : index
      %138 = vector.load %arg9[%c0_44, %c0_45] : memref<1x128xf32, #tpu.memory_space<vmem>>, vector<1x128xf32>
      %cst_46 = arith.constant 3.125000e-02 : f32
      %139 = vector.broadcast %cst_46 : f32 to vector<1x128xf32>
      %140 = arith.mulf %138, %139 : vector<1x128xf32>
      %c0_47 = arith.constant 0 : index
      %c0_48 = arith.constant 0 : index
      %141 = vector.load %arg6[%c0_47, %c0_48] : memref<4x4xf32, #tpu.memory_space<vmem>>, vector<4x4xf32>
      %142 = vector.extract_strided_slice %141 {offsets = [3, 0], sizes = [1, 4], strides = [1, 1]} : vector<4x4xf32> to vector<1x4xf32>
      %143 = vector.extract_strided_slice %141 {offsets = [0, 0], sizes = [1, 4], strides = [1, 1]} : vector<4x4xf32> to vector<1x4xf32>
      %144 = math.log %143 : vector<1x4xf32>
      %cst_49 = arith.constant -1.000000e+02 : f32
      %145 = vector.broadcast %cst_49 : f32 to vector<1x4xf32>
      %146 = arith.maximumf %144, %145 : vector<1x4xf32>
      %cst_50 = arith.constant 1.000000e+00 : f32
      %147 = vector.broadcast %cst_50 : f32 to vector<1x4xf32>
      %148 = arith.subf %147, %143 : vector<1x4xf32>
      %149 = math.log %148 : vector<1x4xf32>
      %cst_51 = arith.constant -1.000000e+02 : f32
      %150 = vector.broadcast %cst_51 : f32 to vector<1x4xf32>
      %151 = arith.maximumf %149, %150 : vector<1x4xf32>
      %152 = arith.mulf %142, %146 : vector<1x4xf32>
      %cst_52 = arith.constant 1.000000e+00 : f32
      %153 = vector.broadcast %cst_52 : f32 to vector<1x4xf32>
      %154 = arith.subf %153, %142 : vector<1x4xf32>
      %155 = arith.mulf %154, %151 : vector<1x4xf32>
      %156 = arith.addf %152, %155 : vector<1x4xf32>
      %cst_53 = arith.constant 0.000000e+00 : f32
      %157 = vector.broadcast %cst_53 : f32 to vector<1x4xf32>
      %158 = arith.subf %157, %156 : vector<1x4xf32>
      %cst_54 = arith.constant dense<0.000000e+00> : vector<1xf32>
      %159 = vector.multi_reduction <add>, %158, %cst_54 [1] : vector<1x4xf32> to vector<1xf32>
      %160 = vector.shape_cast %159 : vector<1xf32> to vector<1x1xf32>
      %cst_55 = arith.constant 2.500000e-01 : f32
      %161 = vector.broadcast %cst_55 : f32 to vector<1x1xf32>
      %162 = arith.mulf %160, %161 : vector<1x1xf32>
      %163 = vector.extract_strided_slice %141 {offsets = [1, 0], sizes = [1, 4], strides = [1, 1]} : vector<4x4xf32> to vector<1x4xf32>
      %164 = math.log %163 : vector<1x4xf32>
      %cst_56 = arith.constant -1.000000e+02 : f32
      %165 = vector.broadcast %cst_56 : f32 to vector<1x4xf32>
      %166 = arith.maximumf %164, %165 : vector<1x4xf32>
      %cst_57 = arith.constant 1.000000e+00 : f32
      %167 = vector.broadcast %cst_57 : f32 to vector<1x4xf32>
      %168 = arith.subf %167, %163 : vector<1x4xf32>
      %169 = math.log %168 : vector<1x4xf32>
      %cst_58 = arith.constant -1.000000e+02 : f32
      %170 = vector.broadcast %cst_58 : f32 to vector<1x4xf32>
      %171 = arith.maximumf %169, %170 : vector<1x4xf32>
      %172 = arith.mulf %142, %166 : vector<1x4xf32>
      %cst_59 = arith.constant 1.000000e+00 : f32
      %173 = vector.broadcast %cst_59 : f32 to vector<1x4xf32>
      %174 = arith.subf %173, %142 : vector<1x4xf32>
      %175 = arith.mulf %174, %171 : vector<1x4xf32>
      %176 = arith.addf %172, %175 : vector<1x4xf32>
      %cst_60 = arith.constant 0.000000e+00 : f32
      %177 = vector.broadcast %cst_60 : f32 to vector<1x4xf32>
      %178 = arith.subf %177, %176 : vector<1x4xf32>
      %cst_61 = arith.constant dense<0.000000e+00> : vector<1xf32>
      %179 = vector.multi_reduction <add>, %178, %cst_61 [1] : vector<1x4xf32> to vector<1xf32>
      %180 = vector.shape_cast %179 : vector<1xf32> to vector<1x1xf32>
      %cst_62 = arith.constant 2.500000e-01 : f32
      %181 = vector.broadcast %cst_62 : f32 to vector<1x1xf32>
      %182 = arith.mulf %180, %181 : vector<1x1xf32>
      %183 = vector.extract_strided_slice %141 {offsets = [2, 0], sizes = [1, 4], strides = [1, 1]} : vector<4x4xf32> to vector<1x4xf32>
      %184 = math.log %183 : vector<1x4xf32>
      %cst_63 = arith.constant -1.000000e+02 : f32
      %185 = vector.broadcast %cst_63 : f32 to vector<1x4xf32>
      %186 = arith.maximumf %184, %185 : vector<1x4xf32>
      %cst_64 = arith.constant 1.000000e+00 : f32
      %187 = vector.broadcast %cst_64 : f32 to vector<1x4xf32>
      %188 = arith.subf %187, %183 : vector<1x4xf32>
      %189 = math.log %188 : vector<1x4xf32>
      %cst_65 = arith.constant -1.000000e+02 : f32
      %190 = vector.broadcast %cst_65 : f32 to vector<1x4xf32>
      %191 = arith.maximumf %189, %190 : vector<1x4xf32>
      %192 = arith.mulf %142, %186 : vector<1x4xf32>
      %cst_66 = arith.constant 1.000000e+00 : f32
      %193 = vector.broadcast %cst_66 : f32 to vector<1x4xf32>
      %194 = arith.subf %193, %142 : vector<1x4xf32>
      %195 = arith.mulf %194, %191 : vector<1x4xf32>
      %196 = arith.addf %192, %195 : vector<1x4xf32>
      %cst_67 = arith.constant 0.000000e+00 : f32
      %197 = vector.broadcast %cst_67 : f32 to vector<1x4xf32>
      %198 = arith.subf %197, %196 : vector<1x4xf32>
      %cst_68 = arith.constant dense<0.000000e+00> : vector<1xf32>
      %199 = vector.multi_reduction <add>, %198, %cst_68 [1] : vector<1x4xf32> to vector<1xf32>
      %200 = vector.shape_cast %199 : vector<1xf32> to vector<1x1xf32>
      %cst_69 = arith.constant 2.500000e-01 : f32
      %201 = vector.broadcast %cst_69 : f32 to vector<1x1xf32>
      %202 = arith.mulf %200, %201 : vector<1x1xf32>
      %c0_70 = arith.constant 0 : index
      %c0_71 = arith.constant 0 : index
      %203 = vector.load %arg7[%c0_70, %c0_71] : memref<3x32xf32, #tpu.memory_space<vmem>>, vector<3x32xf32>
      %204 = vector.extract_strided_slice %203 {offsets = [0, 0], sizes = [1, 32], strides = [1, 1]} : vector<3x32xf32> to vector<1x32xf32>
      %205 = arith.mulf %204, %204 : vector<1x32xf32>
      %cst_72 = arith.constant dense<0.000000e+00> : vector<1xf32>
      %206 = vector.multi_reduction <add>, %205, %cst_72 [1] : vector<1x32xf32> to vector<1xf32>
      %207 = vector.shape_cast %206 : vector<1xf32> to vector<1x1xf32>
      %208 = math.sqrt %207 : vector<1x1xf32>
      %cst_73 = arith.constant 9.99999996E-13 : f32
      %209 = vector.broadcast %cst_73 : f32 to vector<1x1xf32>
      %210 = arith.maximumf %208, %209 : vector<1x1xf32>
      %211 = vector.broadcast %210 : vector<1x1xf32> to vector<1x32xf32>
      %212 = arith.divf %204, %211 : vector<1x32xf32>
      %213 = vector.extract_strided_slice %203 {offsets = [1, 0], sizes = [1, 32], strides = [1, 1]} : vector<3x32xf32> to vector<1x32xf32>
      %214 = arith.mulf %213, %213 : vector<1x32xf32>
      %cst_74 = arith.constant dense<0.000000e+00> : vector<1xf32>
      %215 = vector.multi_reduction <add>, %214, %cst_74 [1] : vector<1x32xf32> to vector<1xf32>
      %216 = vector.shape_cast %215 : vector<1xf32> to vector<1x1xf32>
      %217 = math.sqrt %216 : vector<1x1xf32>
      %cst_75 = arith.constant 9.99999996E-13 : f32
      %218 = vector.broadcast %cst_75 : f32 to vector<1x1xf32>
      %219 = arith.maximumf %217, %218 : vector<1x1xf32>
      %220 = vector.broadcast %219 : vector<1x1xf32> to vector<1x32xf32>
      %221 = arith.divf %213, %220 : vector<1x32xf32>
      %222 = vector.extract_strided_slice %203 {offsets = [2, 0], sizes = [1, 32], strides = [1, 1]} : vector<3x32xf32> to vector<1x32xf32>
      %223 = arith.mulf %222, %222 : vector<1x32xf32>
      %cst_76 = arith.constant dense<0.000000e+00> : vector<1xf32>
      %224 = vector.multi_reduction <add>, %223, %cst_76 [1] : vector<1x32xf32> to vector<1xf32>
      %225 = vector.shape_cast %224 : vector<1xf32> to vector<1x1xf32>
      %226 = math.sqrt %225 : vector<1x1xf32>
      %cst_77 = arith.constant 9.99999996E-13 : f32
      %227 = vector.broadcast %cst_77 : f32 to vector<1x1xf32>
      %228 = arith.maximumf %226, %227 : vector<1x1xf32>
      %229 = vector.broadcast %228 : vector<1x1xf32> to vector<1x32xf32>
      %230 = arith.divf %222, %229 : vector<1x32xf32>
      %231 = arith.subf %212, %221 : vector<1x32xf32>
      %cst_78 = arith.constant 9.99999997E-7 : f32
      %232 = vector.broadcast %cst_78 : f32 to vector<1x32xf32>
      %233 = arith.addf %231, %232 : vector<1x32xf32>
      %234 = arith.mulf %233, %233 : vector<1x32xf32>
      %cst_79 = arith.constant dense<0.000000e+00> : vector<1xf32>
      %235 = vector.multi_reduction <add>, %234, %cst_79 [1] : vector<1x32xf32> to vector<1xf32>
      %236 = vector.shape_cast %235 : vector<1xf32> to vector<1x1xf32>
      %237 = math.sqrt %236 : vector<1x1xf32>
      %238 = arith.subf %212, %230 : vector<1x32xf32>
      %cst_80 = arith.constant 9.99999997E-7 : f32
      %239 = vector.broadcast %cst_80 : f32 to vector<1x32xf32>
      %240 = arith.addf %238, %239 : vector<1x32xf32>
      %241 = arith.mulf %240, %240 : vector<1x32xf32>
      %cst_81 = arith.constant dense<0.000000e+00> : vector<1xf32>
      %242 = vector.multi_reduction <add>, %241, %cst_81 [1] : vector<1x32xf32> to vector<1xf32>
      %243 = vector.shape_cast %242 : vector<1xf32> to vector<1x1xf32>
      %244 = math.sqrt %243 : vector<1x1xf32>
      %245 = arith.subf %237, %244 : vector<1x1xf32>
      %cst_82 = arith.constant 5.000000e+00 : f32
      %246 = vector.broadcast %cst_82 : f32 to vector<1x1xf32>
      %247 = arith.addf %245, %246 : vector<1x1xf32>
      %cst_83 = arith.constant 0.000000e+00 : f32
      %248 = vector.broadcast %cst_83 : f32 to vector<1x1xf32>
      %249 = arith.maximumf %247, %248 : vector<1x1xf32>
      %c2_i32 = arith.constant 2 : i32
      %250 = vector.broadcast %c2_i32 : i32 to vector<1x128xi32>
      %251 = arith.cmpi eq, %1, %250 : vector<1x128xi32>
      %252 = vector.shape_cast %162 : vector<1x1xf32> to vector<1x1xf32>
      %253 = vector.broadcast %252 : vector<1x1xf32> to vector<1x128xf32>
      %254 = arith.select %251, %253, %140 : vector<1x128xi1>, vector<1x128xf32>
      %c3_i32 = arith.constant 3 : i32
      %255 = vector.broadcast %c3_i32 : i32 to vector<1x128xi32>
      %256 = arith.cmpi eq, %1, %255 : vector<1x128xi32>
      %257 = vector.shape_cast %182 : vector<1x1xf32> to vector<1x1xf32>
      %258 = vector.broadcast %257 : vector<1x1xf32> to vector<1x128xf32>
      %259 = arith.select %256, %258, %254 : vector<1x128xi1>, vector<1x128xf32>
      %c4_i32 = arith.constant 4 : i32
      %260 = vector.broadcast %c4_i32 : i32 to vector<1x128xi32>
      %261 = arith.cmpi eq, %1, %260 : vector<1x128xi32>
      %262 = vector.shape_cast %202 : vector<1x1xf32> to vector<1x1xf32>
      %263 = vector.broadcast %262 : vector<1x1xf32> to vector<1x128xf32>
      %264 = arith.select %261, %263, %259 : vector<1x128xi1>, vector<1x128xf32>
      %c5_i32 = arith.constant 5 : i32
      %265 = vector.broadcast %c5_i32 : i32 to vector<1x128xi32>
      %266 = arith.cmpi eq, %1, %265 : vector<1x128xi32>
      %267 = vector.shape_cast %249 : vector<1x1xf32> to vector<1x1xf32>
      %268 = vector.broadcast %267 : vector<1x1xf32> to vector<1x128xf32>
      %269 = arith.select %266, %268, %264 : vector<1x128xi1>, vector<1x128xf32>
      %c0_84 = arith.constant 0 : index
      %c0_85 = arith.constant 0 : index
      %270 = vector.load %arg8[%c0_84, %c0_85] : memref<1x128xf32, #tpu.memory_space<vmem>>, vector<1x128xf32>
      tpu.vector_store %arg8[%c0_84, %c0_85], %269 {strides = array<i32>} : memref<1x128xf32, #tpu.memory_space<vmem>>, vector<1x128xf32>,
    } else {
    }
    return
  }
  func.func @transform_0(%arg0: i32) -> (i32, i32) {
    %c0_i32 = arith.constant 0 : i32
    %c0_i32_0 = arith.constant 0 : i32
    %c0_i32_1 = arith.constant 0 : i32
    return %c0_i32, %c0_i32_0 : i32, i32
  }
  func.func @transform_1(%arg0: i32) -> (i32, i32) {
    %c0_i32 = arith.constant 0 : i32
    %c0_i32_0 = arith.constant 0 : i32
    return %arg0, %c0_i32 : i32, i32
  }
  func.func @transform_2(%arg0: i32) -> (i32, i32) {
    %c0_i32 = arith.constant 0 : i32
    %c0_i32_0 = arith.constant 0 : i32
    return %arg0, %c0_i32 : i32, i32
  }
  func.func @transform_3(%arg0: i32) -> (i32, i32) {
    %c0_i32 = arith.constant 0 : i32
    %c0_i32_0 = arith.constant 0 : i32
    return %arg0, %c0_i32 : i32, i32
  }
  func.func @transform_4(%arg0: i32) -> (i32, i32) {
    %c0_i32 = arith.constant 0 : i32
    %c0_i32_0 = arith.constant 0 : i32
    return %c0_i32, %arg0 : i32, i32
  }
  func.func @transform_5(%arg0: i32) -> (i32, i32) {
    %c0_i32 = arith.constant 0 : i32
    %c0_i32_0 = arith.constant 0 : i32
    %c0_i32_1 = arith.constant 0 : i32
    return %c0_i32, %c0_i32_0 : i32, i32
  }
  func.func @transform_6(%arg0: i32) -> (i32, i32) {
    %c0_i32 = arith.constant 0 : i32
    %c0_i32_0 = arith.constant 0 : i32
    %c0_i32_1 = arith.constant 0 : i32
    return %c0_i32, %c0_i32_0 : i32, i32
  }
  func.func @transform_7(%arg0: i32) -> (i32, i32) {
    %c0_i32 = arith.constant 0 : i32
    %c0_i32_0 = arith.constant 0 : i32
    %c0_i32_1 = arith.constant 0 : i32
    return %c0_i32, %c0_i32_0 : i32, i32
  }
}

</mosaic_0001>

<bundles_post_ra>
// kernel: disl_loss.3
= control target key start
LH: loop header
LB: loop body
LE: loop exit
PB: predicated region body
PF: predicated region fallthrough
CT: control target
= control target key end

     0   :  { %v27_v0 = vlaneseq  ;;  %v1152_v14 = vmov 1.0|1.0   ;;  %v1153_v62 = vmov 0.0   ;;  %s1628_s0 = inlined_call_operand.vmem [shape: s32[2,128], index: 0, kind: input, shape index: {}]   ;;  %s1629_s2 = inlined_call_operand.vmem [shape: f32[32,128], index: 2, kind: input, shape index: {}]   ;;  %s1630_s3 = inlined_call_operand.vmem [shape: f32[32,128], index: 3, kind: input, shape index: {}]   ;;  %s1631_s6 = inlined_call_operand.vmem [shape: f32[3,32], index: 6, kind: input, shape index: {}]   ;;  %s1632_s1 = inlined_call_operand.vmem [shape: f32[32,128], index: 1, kind: input, shape index: {}]   ;;  %s1633_s4 = inlined_call_operand.vmem [shape: f32[4,32], index: 4, kind: input, shape index: {}]   ;;  %s1634_s5 = inlined_call_operand.vmem [shape: f32[4,4], index: 5, kind: input, shape index: {}]   ;;  %s1635_s7 = inlined_call_operand.vmem [shape: f32[1,128], index: 7, kind: output, shape index: {}]  }
   0x1   :  { %v1198_v1 = vld [vmem:[%s1629_s2] sm:$0xff]  ;;  %v1314_v31 = vld [vmem:[%s1632_s1 + $0x8] sm:$0xff]  ;;  %v1369_v44 = vld [vmem:[%s1632_s1 + $0x10] sm:$0xff]  ;;  %33 = vst [vmem:[#allocation2] sm:$0x1] %v1153_v62 }
   0x2   :  { %v1203_v2 = vld [vmem:[%s1630_s3] sm:$0xff]  ;;  %v1206_v3 = vshrl.u32 %v27_v0, 7  ;;  %965 = vmatprep.mubr.f32.mxu0 %v1198_v1  ;;  %v356_v37 = vmul.f32 %v1314_v31, %v1314_v31  ;;  %v395_v39 = vmul.f32 %v1198_v1, %v1198_v1  ;;  %v161_v43 = vld [vmem:[%s1629_s2 + $0x8] sm:$0xff]  ;;  %v357_v47 = vmul.f32 %v1369_v44, %v1369_v44  ;;  %v162_v49 = vld [vmem:[%s1629_s2 + $0x10] sm:$0xff] }
   0x3   :  { %1003 = vmatprep.mubr.f32.mxu1 %v1203_v2  ;;  %v34_v4 = vld [vmem:[%s1628_s0] sm:$0x3]  ;;  %v396_v45 = vmul.f32 %v161_v43, %v161_v43  ;;  %v397_v50 = vmul.f32 %v162_v49, %v162_v49  ;;  %v435_v51 = vmul.f32 %v1203_v2, %v1203_v2  ;;  %v165_v52 = vld [vmem:[%s1630_s3 + $0x8] sm:$0xff]  ;;  %v1422_v53 = vld [vmem:[%s1632_s1 + $0x18] sm:$0xff] }
   0x4   :  { %v37_v5 = vadd.s32 8, %v1206_v3  ;;  %v54_v6 = vsub.s32 0, %v1206_v3  ;;  %v106_v7 = vsub.s32 1, %v1206_v3  ;;  %v38_v8 = vadd.s32 16, %v1206_v3  ;;  %v1259_v18 = vld [vmem:[%s1631_s6] sm:$0x7] }
   0x5   :  { %v39_v9 = vadd.s32 24, %v1206_v3  ;;  %v40_v12 = vadd.s32 32, %v1206_v3  ;;  %v41_v13 = vadd.s32 40, %v1206_v3  ;;  %v42_v15 = vadd.s32 48, %v1206_v3  ;;  %v1298_v29 = vld [vmem:[%s1632_s1] sm:$0xff]  ;;  %v163_v56 = vld [vmem:[%s1629_s2 + $0x18] sm:$0xff] }
   0x6   :  { %v1220_v10 = vrot.slane %v34_v4, %v54_v6  ;;  %v1222_v11 = vrot.slane %v34_v4, %v106_v7  ;;  %v43_v16 = vadd.s32 56, %v1206_v3  ;;  %v44_v20 = vadd.s32 64, %v1206_v3  ;;  %v166_v57 = vld [vmem:[%s1630_s3 + $0x10] sm:$0xff]  ;;  %v167_v60 = vld [vmem:[%s1630_s3 + $0x18] sm:$0xff]  ;;  %v588_v63 = vld [vmem:[%s1633_s4] sm:$0xf] }
   0x7   :  { %v45_v21 = vadd.s32 72, %v1206_v3  ;;  %v729_v22 = vmul.f32 %v1259_v18, %v1259_v18  ;;  %v46_v24 = vadd.s32 80, %v1206_v3  ;;  %v47_v25 = vadd.s32 88, %v1206_v3 }
   0x8   :  { %vm56_vm0 = vcmp.eq.s32.totalorder %v1206_v3, %v1220_v10  ;;  %vm57_vm1 = vcmp.eq.s32.totalorder %v37_v5, %v1220_v10  ;;  %vm108_vm2 = vcmp.eq.s32.totalorder %v1206_v3, %v1222_v11  ;;  %vm109_vm3 = vcmp.eq.s32.totalorder %v37_v5, %v1222_v11 }
   0x9   :  { %vm1009_vm4 = vmpackc.low %vm57_vm1, %vm56_vm0  ;;  %vm58_vm5 = vcmp.eq.s32.totalorder %v38_v8, %v1220_v10  ;;  %vm59_vm6 = vcmp.eq.s32.totalorder %v39_v9, %v1220_v10  ;;  %vm110_vm7 = vcmp.eq.s32.totalorder %v38_v8, %v1222_v11  ;;  %vm111_vm8 = vcmp.eq.s32.totalorder %v39_v9, %v1222_v11 }
   0xa   :  { %1010 = vmatprep.subr.msk.bf16.mxu0 %vm1009_vm4, %v1152_v14  ;;  %vm1041_vm9 = vmpackc.low %vm109_vm3, %vm108_vm2  ;;  %vm60_vm10 = vcmp.eq.s32.totalorder %v40_v12, %v1220_v10  ;;  %vm61_vm11 = vcmp.eq.s32.totalorder %v41_v13, %v1220_v10  ;;  %vm112_vm13 = vcmp.eq.s32.totalorder %v40_v12, %v1222_v11  ;;  %vm113_vm14 = vcmp.eq.s32.totalorder %v41_v13, %v1222_v11 }
   0xb   :  { %1042 = vmatprep.subr.msk.bf16.mxu1 %vm1041_vm9, %v1152_v14  ;;  %1012 = vmatpush3.bf16.msk.msra.mxu0 %vm1009_vm4, %v1152_v14  ;;  %vm1013_vm12 = vmpackc.low %vm59_vm6, %vm58_vm5  ;;  %vm62_vm2 = vcmp.eq.s32.totalorder %v42_v15, %v1220_v10  ;;  %vm63_vm3 = vcmp.eq.s32.totalorder %v43_v16, %v1220_v10  ;;  %vm114_vm4 = vcmp.eq.s32.totalorder %v42_v15, %v1222_v11  ;;  %vm648_vm6 = vcmask 254977  }
   0xc   :  { %1044 = vmatpush3.bf16.msk.msra.mxu1 %vm1041_vm9, %v1152_v14  ;;  %1014 = vmatprep.subr.msk.bf16.mxu0 %vm1013_vm12, %v1152_v14  ;;  %vm1045_vm15 = vmpackc.low %vm111_vm8, %vm110_vm7  ;;  %vm115_vm5 = vcmp.eq.s32.totalorder %v43_v16, %v1222_v11  ;;  %vm730_vm7 = vcmask 253952   ;;  %vm757_vm9 = vcmask 256002   ;;  %v744_v27 = vsel %vm648_vm6, %v729_v22, 0.0 }
   0xd   :  { %1046 = vmatprep.subr.msk.bf16.mxu1 %vm1045_vm15, %v1152_v14  ;;  %vm1252_vm0 = vmpackc.low %vm61_vm11, %vm60_vm10  ;;  %vm64_vm11 = vcmp.eq.s32.totalorder %v44_v20, %v1220_v10  ;;  %v731_v28 = vsel %vm730_vm7, %v729_v22, 0.0  ;;  %745 = vadd.xlane.f32.xlu0 %v744_v27  ;;  %v758_v30 = vsel %vm757_vm9, %v729_v22, 0.0  ;;  %v355_v33 = vmul.f32 %v1298_v29, %v1298_v29 }
   0xe   :  { %vm1261_vm1 = vmpackc.low %vm113_vm14, %vm112_vm13  ;;  %vm116_vm13 = vcmp.eq.s32.totalorder %v44_v20, %v1222_v11  ;;  %vm117_vm14 = vcmp.eq.s32.totalorder %v45_v21, %v1222_v11  ;;  %732 = vadd.xlane.f32.xlu1 %v731_v28  ;;  %v48_v35 = vadd.s32 96, %v1206_v3  ;;  %v49_v36 = vadd.s32 104, %v1206_v3  ;;  %v1452_v28 = vld [vmem:[%s1634_s5] sm:$0xf] }
   0xf   :  { %1016 = vmatpush3.bf16.msk.msra.mxu0 %vm1013_vm12, %v1152_v14  ;;  %vm1281_vm8 = vmpackc.low %vm63_vm3, %vm62_vm2  ;;  %vm65_vm12 = vcmp.eq.s32.totalorder %v45_v21, %v1220_v10  ;;  %vm67_vm2 = vcmp.eq.s32.totalorder %v47_v25, %v1220_v10  ;;  %vm118_vm3 = vcmp.eq.s32.totalorder %v46_v24, %v1222_v11  ;;  %v50_v41 = vadd.s32 112, %v1206_v3 }
  0x10   :  { %1048 = vmatpush3.bf16.msk.msra.mxu1 %vm1045_vm15, %v1152_v14  ;;  %1018 = vmatprep.subr.msk.bf16.mxu0 %vm1252_vm0, %v1152_v14  ;;  %vm1287_vm10 = vmpackc.low %vm115_vm5, %vm114_vm4  ;;  %vm119_vm4 = vcmp.eq.s32.totalorder %v47_v25, %v1222_v11  ;;  %vm68_vm9 = vcmp.eq.s32.totalorder %v48_v35, %v1220_v10  ;;  %v51_v42 = vadd.s32 120, %v1206_v3  ;;  %v436_v54 = vmul.f32 %v165_v52, %v165_v52 }
  0x11   :  { %1050 = vmatprep.subr.msk.bf16.mxu1 %vm1261_vm1, %v1152_v14  ;;  %vm1319_vm15 = vmpackc.low %vm65_vm12, %vm64_vm11  ;;  %759 = vadd.xlane.f32.xlu0 %v758_v30  ;;  %vm120_vm11 = vcmp.eq.s32.totalorder %v48_v35, %v1222_v11  ;;  %vm121_vm12 = vcmp.eq.s32.totalorder %v49_v36, %v1222_v11  ;;  %v358_v55 = vmul.f32 %v1422_v53, %v1422_v53  ;;  %v590_v1 = vrot.slane %v588_v63, 3 }
  0x12   :  { %359 = vadd.xlane.f32.xlu1 %v355_v33  ;;  %v398_v58 = vmul.f32 %v163_v56, %v163_v56  ;;  %v437_v59 = vmul.f32 %v166_v57, %v166_v57  ;;  %v438_v61 = vmul.f32 %v167_v60, %v167_v60  ;;  %v595_v5 = vrot.slane %v588_v63, 2 }
  0x13   :  { %1020 = vmatpush3.bf16.msk.msra.mxu0 %vm1252_vm0, %v1152_v14  ;;  %vm1325_vm0 = vmpackc.low %vm117_vm14, %vm116_vm13  ;;  %v592_v4 = vmul.f32 %v590_v1, %v588_v63  ;;  %v600_v13 = vrot.slane %v588_v63, 1 }
  0x14   :  { %1052 = vmatpush3.bf16.msk.msra.mxu1 %vm1261_vm1, %v1152_v14  ;;  %1022 = vmatprep.subr.msk.bf16.mxu0 %vm1281_vm8, %v1152_v14  ;;  %vm66_vm1 = vcmp.eq.s32.totalorder %v46_v24, %v1220_v10  ;;  %vm1391_vm14 = vmpackc.low %vm121_vm12, %vm120_vm11 }
  0x15   :  { %1054 = vmatprep.subr.msk.bf16.mxu1 %vm1287_vm10, %v1152_v14  ;;  %vm1349_vm5 = vmpackc.low %vm67_vm2, %vm66_vm1  ;;  %361 = vadd.xlane.f32.xlu0 %v356_v37  ;;  %vm122_vm1 = vcmp.eq.s32.totalorder %v50_v41, %v1222_v11  ;;  %vm123_vm2 = vcmp.eq.s32.totalorder %v51_v42, %v1222_v11  ;;  %v593_v9 = vmax.f32 %v592_v4, 1e-06  ;;  %v602_v19 = vmul.f32 %v600_v13, %v588_v63 }
  0x16   :  { %399 = vadd.xlane.f32.xlu1 %v395_v39  ;;  %v1455_v37 = vsub.f32 1.0, %v1452_v28 }
  0x17   :  { %1024 = vmatpush3.bf16.msk.msra.mxu0 %vm1281_vm8, %v1152_v14  ;;  %vm1355_vm8 = vmpackc.low %vm119_vm4, %vm118_vm3  ;;  %v594_v11 = vmin.f32 %v593_v9, 0.999999  ;;  %v603_v26 = vmax.f32 %v602_v19, 1e-06 }
  0x18   :  { %1056 = vmatpush3.bf16.msk.msra.mxu1 %vm1287_vm10, %v1152_v14  ;;  %1026 = vmatprep.subr.msk.bf16.mxu0 %vm1319_vm15, %v1152_v14  ;;  %vm69_vm10 = vcmp.eq.s32.totalorder %v49_v36, %v1220_v10  ;;  %vm1069_vm4 = vmpackc.low %vm123_vm2, %vm122_vm1 }
  0x19   :  { %1058 = vmatprep.subr.msk.bf16.mxu1 %vm1325_vm0, %v1152_v14  ;;  %vm1385_vm13 = vmpackc.low %vm69_vm10, %vm68_vm9  ;;  %401 = vadd.xlane.f32.xlu0 %v396_v45  ;;  %v607_v15 = vsub.f32 1.0, %v594_v11  ;;  %v604_v35 = vmin.f32 %v603_v26, 0.999999 }
  0x1a   :  { %363 = vadd.xlane.f32.xlu1 %v357_v47 }
  0x1b   :  { %1028 = vmatpush3.bf16.msk.msra.mxu0 %vm1319_vm15, %v1152_v14  ;;  %vm70_vm15 = vcmp.eq.s32.totalorder %v50_v41, %v1220_v10  ;;  %v637_v1 = vsub.f32 1.0, %v604_v35 }
  0x1c   :  { %1060 = vmatpush3.bf16.msk.msra.mxu1 %vm1325_vm0, %v1152_v14  ;;  %1030 = vmatprep.subr.msk.bf16.mxu0 %vm1349_vm5, %v1152_v14  ;;  %vm71_vm0 = vcmp.eq.s32.totalorder %v51_v42, %v1220_v10  ;;  %v597_v10 = vmul.f32 %v595_v5, %v588_v63 }
  0x1d   :  { %1062 = vmatprep.subr.msk.bf16.mxu1 %vm1355_vm8, %v1152_v14  ;;  %vm1037_vm3 = vmpackc.low %vm71_vm0, %vm70_vm15  ;;  %403 = vadd.xlane.f32.xlu0 %v397_v50 }
  0x1e   :  { %439 = vadd.xlane.f32.xlu1 %v435_v51  ;;  %v598_v12 = vmax.f32 %v597_v10, 1e-06 }
  0x1f   :  { %1032 = vmatpush3.bf16.msk.msra.mxu0 %vm1349_vm5, %v1152_v14 }
  0x20   :  { %1064 = vmatpush3.bf16.msk.msra.mxu1 %vm1355_vm8, %v1152_v14  ;;  %1034 = vmatprep.subr.msk.bf16.mxu0 %vm1385_vm13, %v1152_v14  ;;  %v599_v16 = vmin.f32 %v598_v12, 0.999999 }
  0x21   :  { %1066 = vmatprep.subr.msk.bf16.mxu1 %vm1391_vm14, %v1152_v14  ;;  %441 = vadd.xlane.f32.xlu0 %v436_v54 }
  0x22   :  { %365 = vadd.xlane.f32.xlu1 %v358_v55  ;;  %v612_v23 = vsub.f32 1.0, %v599_v16 }
  0x23   :  { %1036 = vmatpush3.bf16.msk.msra.mxu0 %vm1385_vm13, %v1152_v14 }
  0x24   :  { %1068 = vmatpush3.bf16.msk.msra.mxu1 %vm1391_vm14, %v1152_v14  ;;  %1038 = vmatprep.subr.msk.bf16.mxu0 %vm1037_vm3, %v1152_v14  ;;  %vm699_vm14 = vcmask 27651  }
  0x25   :  { %1070 = vmatprep.subr.msk.bf16.mxu1 %vm1069_vm4, %v1152_v14  ;;  %405 = vadd.xlane.f32.xlu0 %v398_v58 }
  0x26   :  { %443 = vadd.xlane.f32.xlu1 %v437_v59 }
  0x27   :  { %1040 = vmatpush3.bf16.msk.msra.mxu0 %vm1037_vm3, %v1152_v14 }
  0x28   :  { %1072 = vmatpush3.bf16.msk.msra.mxu1 %vm1069_vm4, %v1152_v14 }
  0x29   :  { %445 = vadd.xlane.f32.xlu0 %v438_v61 }
  0x2a   :  { %966 = vmatmul.mubr.f32.vlgmr.msra.gmra.mrb[0].mxu0 %v161_v43  ;;  %v616_v43 = vrot.slane %v604_v35, 1 }
  0x2b   :  { %1004 = vmatmul.mubr.f32.vlgmr.msra.gmra.mrb[0].mxu1 %v165_v52  ;;  %968 = vmatprep.mubr.f32.mxu0 %v162_v49 }
  0x2c   :  { %1006 = vmatprep.mubr.f32.mxu1 %v166_v57  ;;  %v618_v51 = vadd.f32 %v616_v43, %v599_v16  ;;  %v1468_v43 = vand.u32 127, %v27_v0 }
  0x2e   :  { %969 = vmatmul.mubr.f32.gmra.mrb[2].mxu0 %v163_v56  ;;  %v623_v56 = vsub.f32 2.0, %v618_v51  ;;  %vm585_vm13 = vcmp.lt.s32.totalorder %v1468_v43, 32 }
  0x2f   :  { %1007 = vmatmul.mubr.f32.gmra.mrb[2].mxu1 %v167_v60 }
  0x9a   :  { %v746_v2 = vpop.xlane.xlu0 %745 }
  0x9b   :  { %1076 = vrsqrt.f32 %v746_v2  ;;  %v733_v7 = vpop.xlane.xlu1 %732  ;;  %vm749_vm5 = vcmp.eq.f32.partialorder %v746_v2, inf  ;;  %v752_v22 = vand.u32 2147483648, %v746_v2  ;;  %vm751_vm8 = vcmp.eq.f32.partialorder %v746_v2, 0.0 }
  0x9c   :  { %1078 = vrsqrt.f32 %v733_v7  ;;  %vm736_vm9 = vcmp.eq.f32.partialorder %v733_v7, inf  ;;  %v739_v32 = vand.u32 2147483648, %v733_v7  ;;  %vm738_vm11 = vcmp.eq.f32.partialorder %v733_v7, 0.0 }
  0x9e   :  { %v760_v8 = vpop.xlane.xlu0 %759 }
  0x9f   :  { %1080 = vrsqrt.f32 %v760_v8  ;;  %vm763_vm10 = vcmp.eq.f32.partialorder %v760_v8, inf  ;;  %v766_v34 = vand.u32 2147483648, %v760_v8  ;;  %vm765_vm12 = vcmp.eq.f32.partialorder %v760_v8, 0.0 }
  0xa0   :  { %1082 = vlog2.f32 %v594_v11 }
  0xa1   :  { %1084 = vlog2.f32 %v607_v15 }
  0xa2   :  { %1086 = vlog2.f32 %v599_v16 }
  0xa3   :  { %1088 = vlog2.f32 %v612_v23 }
  0xa4   :  { %1090 = vlog2.f32 %v1452_v28 }
  0xa5   :  { %v1077_v14 = vpop.eup %1076  ;;  %1092 = vlog2.f32 %v1455_v37 }
  0xa6   :  { %v748_v17 = vmul.f32 %v1077_v14, %v746_v2  ;;  %v1079_v20 = vpop.eup %1078 }
  0xa7   :  { %v735_v25 = vmul.f32 %v1079_v20, %v733_v7 }
  0xa8   :  { %v750_v24 = vsel %vm749_vm5, %v746_v2, %v748_v17 }
  0xa9   :  { %v1081_v21 = vpop.eup %1080  ;;  %v753_v30 = vsel %vm751_vm8, %v752_v22, %v750_v24  ;;  %v737_v33 = vsel %vm736_vm9, %v733_v7, %v735_v25 }
  0xaa   :  { %v762_v27 = vmul.f32 %v1081_v21, %v760_v8  ;;  %v754_v38 = vmax.f32 %v753_v30, 1e-12  ;;  %v1083_v39 = vpop.eup %1082  ;;  %v740_v40 = vsel %vm738_vm11, %v739_v32, %v737_v33 }
  0xab   :  { %v1085_v41 = vpop.eup %1084  ;;  %v741_v46 = vmax.f32 %v740_v40, 1e-12  ;;  %v606_v48 = vmul.f32 0.6931472, %v1083_v39 }
  0xac   :  { %v764_v36 = vsel %vm763_vm10, %v760_v8, %v762_v27  ;;  %v1087_v45 = vpop.eup %1086  ;;  %1094 = vrcp.f32 %v754_v38  ;;  %v609_v49 = vmul.f32 0.6931472, %v1085_v41 }
  0xad   :  { %v767_v42 = vsel %vm765_vm12, %v766_v34, %v764_v36  ;;  %v611_v50 = vmul.f32 0.6931472, %v1087_v45  ;;  %v1089_v52 = vpop.eup %1088  ;;  %1096 = vrcp.f32 %v741_v46  ;;  %v620_v54 = vrot.slane %v606_v48, 7 }
  0xae   :  { %v768_v47 = vmax.f32 %v767_v42, 1e-12  ;;  %v614_v55 = vmul.f32 0.6931472, %v1089_v52  ;;  %v625_v57 = vrot.slane %v609_v49, 7  ;;  %v1091_v59 = vpop.eup %1090 }
  0xaf   :  { %v630_v58 = vrot.slane %v611_v50, 7  ;;  %v1093_v60 = vpop.eup %1092  ;;  %v622_v63 = vmul.f32 %v620_v54, %v618_v51  ;;  %v683_v15 = vmul.f32 0.6931472, %v1091_v59 }
  0xb0   :  { %1098 = vrcp.f32 %v768_v47  ;;  %v627_v8 = vmul.f32 %v625_v57, %v623_v56  ;;  %v639_v10 = vrot.slane %v614_v55, 7  ;;  %v687_v19 = vmul.f32 0.6931472, %v1093_v60 }
  0xb1   :  { %v632_v9 = vmul.f32 %v630_v58, %v604_v35  ;;  %v684_v33 = vmax.f32 %v683_v15, -100.0  ;;  %v892_v60 = vsel %vm585_vm13, 1.0, %v1153_v62 }
  0xb2   :  { %v628_v24 = vadd.f32 %v627_v8, %v622_v63  ;;  %v641_v26 = vmul.f32 %v639_v10, %v637_v1  ;;  %v688_v36 = vmax.f32 %v687_v19, -100.0 }
  0xb3   :  { %v634_v25 = vrot.slane %v632_v9, 1  ;;  %v690_v45 = vrot.slane %v684_v33, 5  ;;  %v704_v58 = vrot.slane %v684_v33, 6 }
  0xb4   :  { %v643_v39 = vrot.slane %v641_v26, 1  ;;  %v694_v48 = vrot.slane %v688_v36, 5  ;;  %v719_v55 = vrot.slane %v688_v36, 7  ;;  %v707_v59 = vrot.slane %v688_v36, 6 }
  0xb5   :  { %v636_v38 = vadd.f32 %v634_v25, %v628_v24 }
  0xb6   :  { %v1095_v2 = vpop.eup %1094  ;;  %v696_v54 = vmul.f32 %v694_v48, %v1455_v37  ;;  %v721_v1 = vmul.f32 %v719_v55, %v1455_v37 }
  0xb7   :  { %v756_v17 = vmul.f32 %v1095_v2, %v1259_v18  ;;  %v1097_v20 = vpop.eup %1096  ;;  %v645_v49 = vadd.f32 %v643_v39, %v636_v38 }
  0xb8   :  { %v743_v34 = vmul.f32 %v1097_v20, %v1259_v18 }
  0xb9   :  { %v772_v35 = vrot.slane %v756_v17, 1  ;;  %v646_v56 = vsub.f32 0.0, %v645_v49  ;;  %v1486_v17 = vpop.xlane.xlu0 %361 }
  0xba   :  { %v1099_v27 = vpop.eup %1098  ;;  %vm376_vm15 = vcmp.eq.f32.partialorder %v1486_v17, inf  ;;  %vm378_vm0 = vcmp.eq.f32.partialorder %v1486_v17, 0.0 }
  0xbb   :  { %v770_v40 = vmul.f32 %v1099_v27, %v1259_v18  ;;  %v774_v47 = vsub.f32 %v743_v34, %v772_v35  ;;  %v692_v18 = vmul.f32 %v690_v45, %v1452_v28 }
  0xbd   :  { %v788_v50 = vrot.slane %v770_v40, 2  ;;  %v775_v0 = vadd.f32 1e-06, %v774_v47  ;;  %v1490_v20 = vpop.xlane.xlu0 %401 }
  0xbe   :  { %vm416_vm2 = vcmp.eq.f32.partialorder %v1490_v20, inf  ;;  %vm418_vm4 = vcmp.eq.f32.partialorder %v1490_v20, 0.0  ;;  %v419_v49 = vand.u32 2147483648, %v1490_v20 }
  0xbf   :  { %v790_v57 = vsub.f32 %v743_v34, %v788_v50 }
  0xc1   :  { %v791_v2 = vadd.f32 1e-06, %v790_v57 }
  0xc3   :  { %v792_v10 = vmul.f32 %v791_v2, %v791_v2 }
  0xfd   :  { %v967_v61 = vpop.f32.mrb[0].mxu0 }
  0xfe   :  { %v1005_v4 = vpop.f32.mrb[0].mxu1  ;;  %v234_v5 = vpop.f32.mrb[1].mxu0  ;;  %v476_v7 = vmul.f32 %v967_v61, %v1314_v31 }
  0xff   :  { %v319_v11 = vpop.f32.mrb[1].mxu1  ;;  %v508_v12 = vmul.f32 %v1005_v4, %v1314_v31  ;;  %v540_v13 = vmul.f32 %v1005_v4, %v967_v61  ;;  %v475_v41 = vmul.f32 %v234_v5, %v1298_v29  ;;  %v697_v61 = vadd.f32 %v696_v54, %v692_v18 }
 0x100   :  { %481 = vadd.xlane.f32.xlu0 %v476_v7  ;;  %v539_v14 = vmul.f32 %v319_v11, %v234_v5  ;;  %v507_v21 = vmul.f32 %v319_v11, %v1298_v29  ;;  %v716_v29 = vrot.slane %v684_v33, 7  ;;  %v706_v4 = vmul.f32 %v704_v58, %v1452_v28 }
 0x101   :  { %513 = vadd.xlane.f32.xlu1 %v508_v12  ;;  %v970_v16 = vpop.f32.mrb[2].mxu0  ;;  %v709_v5 = vmul.f32 %v707_v59, %v1455_v37  ;;  %v698_v8 = vsub.f32 0.0, %v697_v61 }
 0x102   :  { %v1008_v22 = vpop.f32.mrb[2].mxu1  ;;  %v244_v23 = vpop.f32.mrb[3].mxu0  ;;  %v478_v42 = vmul.f32 %v970_v16, %v1422_v53  ;;  %v718_v63 = vmul.f32 %v716_v29, %v1452_v28 }
 0x103   :  { %v329_v30 = vpop.f32.mrb[3].mxu1  ;;  %v542_v31 = vmul.f32 %v1008_v22, %v970_v16  ;;  %v477_v46 = vmul.f32 %v244_v23, %v1369_v44  ;;  %v510_v51 = vmul.f32 %v1008_v22, %v1422_v53  ;;  %v776_v53 = vmul.f32 %v775_v0, %v775_v0  ;;  %v1484_v16 = vpop.xlane.xlu1 %359 }
 0x104   :  { %511 = vadd.xlane.f32.xlu0 %v507_v21  ;;  %v541_v32 = vmul.f32 %v329_v30, %v244_v23  ;;  %v509_v52 = vmul.f32 %v329_v30, %v1369_v44  ;;  %v647_v44 = vmul.f32 %v892_v60, %v646_v56  ;;  %v722_v62 = vadd.f32 %v721_v1, %v718_v63  ;;  %v1494_v22 = vpop.xlane.xlu0 %403 }
 0x105   :  { %545 = vadd.xlane.f32.xlu1 %v540_v13  ;;  %v777_v7 = vsel %vm730_vm7, %v776_v53, 0.0  ;;  %v710_v11 = vadd.f32 %v709_v5, %v706_v4  ;;  %v700_v12 = vsel %vm699_vm14, %v698_v8, 0.0  ;;  %1100 = vrsqrt.f32 %v1484_v16 }
 0x106   :  { %v649_v9 = vsel %vm648_vm6, %v647_v44, 0.0  ;;  %v723_v13 = vsub.f32 0.0, %v722_v62  ;;  %1102 = vrsqrt.f32 %v1486_v17  ;;  %vm369_vm6 = vcmp.eq.f32.partialorder %v1484_v16, inf }
 0x107   :  { %v711_v28 = vsub.f32 0.0, %v710_v11  ;;  %v1488_v19 = vpop.xlane.xlu1 %399  ;;  %v372_v40 = vand.u32 2147483648, %v1484_v16  ;;  %vm423_vm8 = vcmp.eq.f32.partialorder %v1494_v22, inf  ;;  %vm425_vm10 = vcmp.eq.f32.partialorder %v1494_v22, 0.0 }
 0x108   :  { %543 = vadd.xlane.f32.xlu0 %v539_v14  ;;  %v793_v14 = vsel %vm730_vm7, %v792_v10, 0.0  ;;  %v724_v37 = vsel %vm699_vm14, %v723_v13, 0.0  ;;  %1104 = vrsqrt.f32 %v1488_v19  ;;  %v1502_v24 = vpop.xlane.xlu0 %441  ;;  %vm371_vm7 = vcmp.eq.f32.partialorder %v1484_v16, 0.0 }
 0x109   :  { %479 = vadd.xlane.f32.xlu1 %v475_v41  ;;  %v712_v15 = vsel %vm699_vm14, %v711_v28, 0.0  ;;  %1106 = vrsqrt.f32 %v1490_v20  ;;  %vm409_vm1 = vcmp.eq.f32.partialorder %v1488_v19, inf  ;;  %vm411_vm3 = vcmp.eq.f32.partialorder %v1488_v19, 0.0 }
 0x10a   :  { %1108 = vrsqrt.f32 %v1502_v24  ;;  %v412_v45 = vand.u32 2147483648, %v1488_v19  ;;  %v426_v0 = vand.u32 2147483648, %v1494_v22  ;;  %vm456_vm13 = vcmp.eq.f32.partialorder %v1502_v24, inf }
 0x10b   :  { %v1492_v21 = vpop.xlane.xlu1 %363  ;;  %vm458_vm14 = vcmp.eq.f32.partialorder %v1502_v24, 0.0  ;;  %v459_v59 = vand.u32 2147483648, %v1502_v24 }
 0x10c   :  { %485 = vadd.xlane.f32.xlu0 %v478_v42  ;;  %v1506_v26 = vpop.xlane.xlu0 %405  ;;  %v379_v42 = vand.u32 2147483648, %v1486_v17  ;;  %vm383_vm5 = vcmp.eq.f32.partialorder %v1492_v21, inf  ;;  %v386_v29 = vand.u32 2147483648, %v1492_v21  ;;  %vm385_vm9 = vcmp.eq.f32.partialorder %v1492_v21, 0.0 }
 0x10d   :  { %483 = vadd.xlane.f32.xlu1 %v477_v46 }
 0x10f   :  { %v1496_v23 = vpop.xlane.xlu1 %439  ;;  %v1101_v27 = vpop.eup %1100 }
 0x110   :  { %517 = vadd.xlane.f32.xlu0 %v510_v51  ;;  %1110 = vrsqrt.f32 %v1496_v23  ;;  %v1516_v34 = vpop.xlane.xlu0 %445  ;;  %v368_v35 = vmul.f32 %v1101_v27, %v1484_v16  ;;  %vm449_vm11 = vcmp.eq.f32.partialorder %v1496_v23, inf  ;;  %vm451_vm12 = vcmp.eq.f32.partialorder %v1496_v23, 0.0 }
 0x111   :  { %515 = vadd.xlane.f32.xlu1 %v509_v52  ;;  %1112 = vrsqrt.f32 %v1492_v21  ;;  %v452_v57 = vand.u32 2147483648, %v1496_v23 }
 0x112   :  { %1114 = vrsqrt.f32 %v1494_v22  ;;  %v370_v47 = vsel %vm369_vm6, %v1484_v16, %v368_v35 }
 0x113   :  { %v1504_v25 = vpop.xlane.xlu1 %365  ;;  %v373_v8 = vsel %vm371_vm7, %v372_v40, %v370_v47  ;;  %vm470_vm7 = vcmp.eq.f32.partialorder %v1516_v34, inf }
 0x114   :  { %549 = vadd.xlane.f32.xlu0 %v542_v31  ;;  %v1103_v31 = vpop.eup %1102  ;;  %1116 = vrsqrt.f32 %v1504_v25  ;;  %vm390_vm6 = vcmp.eq.f32.partialorder %v1504_v25, inf  ;;  %v393_v61 = vand.u32 2147483648, %v1504_v25 }
 0x115   :  { %547 = vadd.xlane.f32.xlu1 %v541_v32  ;;  %v1105_v32 = vpop.eup %1104  ;;  %v375_v36 = vmul.f32 %v1103_v31, %v1486_v17 }
 0x116   :  { %v1107_v33 = vpop.eup %1106  ;;  %v408_v38 = vmul.f32 %v1105_v32, %v1488_v19 }
 0x117   :  { %v1511_v30 = vpop.xlane.xlu1 %443  ;;  %v415_v39 = vmul.f32 %v1107_v33, %v1490_v20  ;;  %v1109_v41 = vpop.eup %1108  ;;  %v377_v48 = vsel %vm376_vm15, %v1486_v17, %v375_v36  ;;  %vm392_vm15 = vcmp.eq.f32.partialorder %v1504_v25, 0.0 }
 0x118   :  { %778 = vadd.xlane.f32.xlu0 %v777_v7  ;;  %1118 = vrsqrt.f32 %v1511_v30  ;;  %v410_v51 = vsel %vm409_vm1, %v1488_v19, %v408_v38  ;;  %v455_v54 = vmul.f32 %v1109_v41, %v1502_v24  ;;  %vm463_vm1 = vcmp.eq.f32.partialorder %v1511_v30, inf }
 0x119   :  { %650 = vadd.xlane.f32.xlu1 %v649_v9  ;;  %1120 = vrsqrt.f32 %v1506_v26  ;;  %v417_v18 = vsel %vm416_vm2, %v1490_v20, %v415_v39  ;;  %vm465_vm2 = vcmp.eq.f32.partialorder %v1511_v30, 0.0  ;;  %v380_v44 = vsel %vm378_vm0, %v379_v42, %v377_v48 }
 0x11a   :  { %1122 = vrsqrt.f32 %v1516_v34  ;;  %v1111_v46 = vpop.eup %1110  ;;  %v457_v1 = vsel %vm456_vm13, %v1502_v24, %v455_v54  ;;  %v420_v2 = vsel %vm418_vm4, %v419_v49, %v417_v18  ;;  %v413_v62 = vsel %vm411_vm3, %v412_v45, %v410_v51 }
 0x11b   :  { %v1113_v50 = vpop.eup %1112  ;;  %v448_v56 = vmul.f32 %v1111_v46, %v1496_v23  ;;  %v466_v10 = vand.u32 2147483648, %v1511_v30  ;;  %vm430_vm0 = vcmp.eq.f32.partialorder %v1506_v26, inf  ;;  %vm432_vm4 = vcmp.eq.f32.partialorder %v1506_v26, 0.0 }
 0x11c   :  { %701 = vadd.xlane.f32.xlu0 %v700_v12  ;;  %v1115_v52 = vpop.eup %1114  ;;  %v382_v53 = vmul.f32 %v1113_v50, %v1492_v21  ;;  %v460_v13 = vsel %vm458_vm14, %v459_v59, %v457_v1  ;;  %v487_v16 = vmul.f32 %v413_v62, %v373_v8  ;;  %v433_v19 = vand.u32 2147483648, %v1506_v26 }
 0x11d   :  { %794 = vadd.xlane.f32.xlu1 %v793_v14  ;;  %v422_v63 = vmul.f32 %v1115_v52, %v1494_v22  ;;  %v450_v5 = vsel %vm449_vm11, %v1496_v23, %v448_v56  ;;  %v488_v14 = vmul.f32 %v420_v2, %v380_v44  ;;  %vm472_vm3 = vcmp.eq.f32.partialorder %v1516_v34, 0.0 }
 0x11e   :  { %v1117_v55 = vpop.eup %1116  ;;  %v384_v12 = vsel %vm383_vm5, %v1492_v21, %v382_v53  ;;  %v473_v23 = vand.u32 2147483648, %v1516_v34  ;;  %v520_v27 = vmul.f32 %v460_v13, %v380_v44  ;;  %v491_v39 = vmax.f32 %v487_v16, 1e-08 }
 0x11f   :  { %v389_v9 = vmul.f32 %v1117_v55, %v1504_v25  ;;  %v424_v28 = vsel %vm423_vm8, %v1494_v22, %v422_v63  ;;  %v492_v31 = vmax.f32 %v488_v14, 1e-08  ;;  %v387_v33 = vsel %vm385_vm9, %v386_v29, %v384_v12 }
 0x120   :  { %725 = vadd.xlane.f32.xlu0 %v724_v37  ;;  %v427_v35 = vsel %vm425_vm10, %v426_v0, %v424_v28  ;;  %v552_v41 = vmul.f32 %v460_v13, %v420_v2  ;;  %v524_v46 = vmax.f32 %v520_v27, 1e-08  ;;  %vm654_vm5 = vcmp.eq.s32.totalorder %v1468_v43, 1 }
 0x121   :  { %713 = vadd.xlane.f32.xlu1 %v712_v15  ;;  %v453_v15 = vsel %vm451_vm12, %v452_v57, %v450_v5  ;;  %v391_v20 = vsel %vm390_vm6, %v1504_v25, %v389_v9  ;;  %v489_v21 = vmul.f32 %v427_v35, %v387_v33  ;;  %1124 = vrcp.f32 %v492_v31 }
 0x122   :  { %v1119_v58 = vpop.eup %1118  ;;  %v519_v32 = vmul.f32 %v453_v15, %v373_v8  ;;  %v551_v38 = vmul.f32 %v453_v15, %v413_v62  ;;  %v394_v42 = vsel %vm392_vm15, %v393_v61, %v391_v20  ;;  %1126 = vrcp.f32 %v491_v39 }
 0x123   :  { %v1121_v60 = vpop.eup %1120  ;;  %v462_v7 = vmul.f32 %v1119_v58, %v1511_v30  ;;  %v556_v51 = vmax.f32 %v552_v41, 1e-08  ;;  %1128 = vrcp.f32 %v524_v46  ;;  %v493_v25 = vmax.f32 %v489_v21, 1e-08 }
 0x124   :  { %v1123_v4 = vpop.eup %1122  ;;  %v429_v11 = vmul.f32 %v1121_v60, %v1506_v26  ;;  %v523_v47 = vmax.f32 %v519_v32, 1e-08  ;;  %v555_v49 = vmax.f32 %v551_v38, 1e-08  ;;  %vm653_vm8 = vcmp.eq.s32.totalorder %v1468_v43, 0 }
 0x125   :  { %v469_v37 = vmul.f32 %v1123_v4, %v1516_v34  ;;  %v464_v17 = vsel %vm463_vm1, %v1511_v30, %v462_v7  ;;  %vm806_vm13 = vcmp.eq.s32.totalorder %v1468_v43, 2  ;;  %vm814_vm14 = vcmp.eq.s32.totalorder %v1468_v43, 3 }
 0x126   :  { %v431_v24 = vsel %vm430_vm0, %v1506_v26, %v429_v11  ;;  %v467_v40 = vsel %vm465_vm2, %v466_v10, %v464_v17  ;;  %1130 = vrcp.f32 %v523_v47  ;;  %vm816_vm6 = vcmp.eq.s32.totalorder %v1468_v43, 4 }
 0x127   :  { %v471_v36 = vsel %vm470_vm7, %v1516_v34, %v469_v37  ;;  %v434_v45 = vsel %vm432_vm4, %v433_v19, %v431_v24  ;;  %v521_v48 = vmul.f32 %v467_v40, %v387_v33  ;;  %v553_v52 = vmul.f32 %v467_v40, %v427_v35 }
 0x128   :  { %v474_v22 = vsel %vm472_vm3, %v473_v23, %v471_v36  ;;  %v490_v50 = vmul.f32 %v434_v45, %v394_v42  ;;  %1132 = vrcp.f32 %v555_v49  ;;  %vm818_vm15 = vcmp.eq.s32.totalorder %v1468_v43, 5 }
 0x129   :  { %v522_v29 = vmul.f32 %v474_v22, %v394_v42  ;;  %v525_v26 = vmax.f32 %v521_v48, 1e-08  ;;  %v554_v54 = vmul.f32 %v474_v22, %v434_v45  ;;  %1134 = vrcp.f32 %v556_v51 }
 0x12a   :  { %v494_v0 = vmax.f32 %v490_v50, 1e-08  ;;  %1136 = vrcp.f32 %v493_v25  ;;  %v557_v57 = vmax.f32 %v553_v52, 1e-08 }
 0x12b   :  { %v526_v56 = vmax.f32 %v522_v29, 1e-08  ;;  %1138 = vrcp.f32 %v525_v26  ;;  %v558_v58 = vmax.f32 %v554_v54, 1e-08  ;;  %v1125_v59 = vpop.eup %1124 }
 0x12c   :  { %1140 = vrcp.f32 %v494_v0  ;;  %v1127_v53 = vpop.eup %1126 }
 0x12d   :  { %1142 = vrcp.f32 %v526_v56  ;;  %v1129_v44 = vpop.eup %1128 }
 0x12e   :  { %1144 = vrcp.f32 %v557_v57 }
 0x12f   :  { %1146 = vrcp.f32 %v558_v58 }
 0x130   :  { %v1131_v2 = vpop.eup %1130 }
 0x132   :  { %v1133_v7 = vpop.eup %1132 }
 0x133   :  { %v1135_v9 = vpop.eup %1134 }
 0x134   :  { %v1137_v11 = vpop.eup %1136 }
 0x135   :  { %v1139_v13 = vpop.eup %1138 }
 0x136   :  { %v1141_v15 = vpop.eup %1140 }
 0x137   :  { %v1143_v27 = vpop.eup %1142 }
 0x138   :  { %v1145_v31 = vpop.eup %1144 }
 0x139   :  { %v1147_v38 = vpop.eup %1146 }
 0x18d   :  { %v482_v30 = vpop.xlane.xlu0 %481 }
 0x18e   :  { %v514_v18 = vpop.xlane.xlu1 %513  ;;  %v498_v61 = vmul.f32 %v1125_v59, %v482_v30 }
 0x18f   :  { %v530_v12 = vmul.f32 %v1129_v44, %v514_v18  ;;  %v1154_v18 = vmov 1966171168  }
 0x190   :  { %v504_v8 = vsub.f32 3.0, %v498_v61  ;;  %v659_v25 = vunpack.c.l.s4 %v1154_v18 }
 0x191   :  { %v512_v55 = vpop.xlane.xlu0 %511 }
 0x192   :  { %v546_v34 = vpop.xlane.xlu1 %545  ;;  %v528_v10 = vmul.f32 %v1131_v2, %v512_v55  ;;  %v536_v16 = vsub.f32 %v504_v8, %v530_v12  ;;  %v660_v54 = vunpack.c.0.s8 %v659_v25 }
 0x193   :  { %v562_v17 = vmul.f32 %v1135_v9, %v546_v34 }
 0x194   :  { %v663_v56 = vsub.s32 %v660_v54, %v1206_v3 }
 0x195   :  { %v544_v60 = vpop.xlane.xlu0 %543  ;;  %v568_v39 = vsub.f32 %v536_v16, %v562_v17 }
 0x196   :  { %v480_v63 = vpop.xlane.xlu1 %479  ;;  %v560_v20 = vmul.f32 %v1133_v7, %v544_v60 }
 0x197   :  { %v496_v1 = vmul.f32 %v1127_v53, %v480_v63  ;;  %v652_v63 = vld [vmem:[#allocation2] sm:$0x1] }
 0x199   :  { %v503_v4 = vsub.f32 3.0, %v496_v1  ;;  %v486_v5 = vpop.xlane.xlu0 %485 }
 0x19a   :  { %v484_v62 = vpop.xlane.xlu1 %483  ;;  %v502_v24 = vmul.f32 %v1141_v15, %v486_v5 }
 0x19b   :  { %v535_v14 = vsub.f32 %v503_v4, %v528_v10  ;;  %v500_v28 = vmul.f32 %v1137_v11, %v484_v62 }
 0x19c   :  { %v506_v41 = vsub.f32 3.0, %v502_v24 }
 0x19d   :  { %v518_v37 = vpop.xlane.xlu0 %517  ;;  %v567_v32 = vsub.f32 %v535_v14, %v560_v20  ;;  %v505_v33 = vsub.f32 3.0, %v500_v28 }
 0x19e   :  { %v516_v19 = vpop.xlane.xlu1 %515  ;;  %v534_v35 = vmul.f32 %v1143_v27, %v518_v37 }
 0x19f   :  { %v532_v23 = vmul.f32 %v1139_v13, %v516_v19  ;;  %v575_v47 = vadd.f32 %v568_v39, %v567_v32 }
 0x1a0   :  { %v538_v21 = vsub.f32 %v506_v41, %v534_v35 }
 0x1a1   :  { %v550_v36 = vpop.xlane.xlu0 %549  ;;  %v537_v42 = vsub.f32 %v505_v33, %v532_v23 }
 0x1a2   :  { %v548_v40 = vpop.xlane.xlu1 %547  ;;  %v566_v45 = vmul.f32 %v1147_v38, %v550_v36 }
 0x1a3   :  { %v564_v46 = vmul.f32 %v1145_v31, %v548_v40 }
 0x1a4   :  { %v570_v48 = vsub.f32 %v538_v21, %v566_v45 }
 0x1a5   :  { %v569_v22 = vsub.f32 %v537_v42, %v564_v46  ;;  %v779_v0 = vpop.xlane.xlu0 %778 }
 0x1a6   :  { %v651_v50 = vpop.xlane.xlu1 %650  ;;  %vm782_vm10 = vcmp.eq.f32.partialorder %v779_v0, inf  ;;  %v785_v10 = vand.u32 2147483648, %v779_v0  ;;  %vm784_vm12 = vcmp.eq.f32.partialorder %v779_v0, 0.0 }
 0x1a7   :  { %v576_v49 = vadd.f32 %v575_v47, %v569_v22  ;;  %v655_v57 = vsel %vm654_vm5, %v651_v50, 0.0 }
 0x1a9   :  { %v577_v30 = vadd.f32 %v576_v49, %v570_v48  ;;  %v702_v8 = vpop.xlane.xlu0 %701 }
 0x1aa   :  { %v795_v26 = vpop.xlane.xlu1 %794  ;;  %v703_v17 = vmul.f32 0.25, %v702_v8 }
 0x1ab   :  { %v578_v51 = vrot.slane %v577_v30, 4  ;;  %1148 = vrsqrt.f32 %v795_v26  ;;  %vm798_vm9 = vcmp.eq.f32.partialorder %v795_v26, inf  ;;  %v801_v62 = vand.u32 2147483648, %v795_v26 }
 0x1ac   :  { %1150 = vrsqrt.f32 %v779_v0  ;;  %vm800_vm11 = vcmp.eq.f32.partialorder %v795_v26, 0.0 }
 0x1ad   :  { %v579_v29 = vadd.f32 %v578_v51, %v577_v30  ;;  %v726_v28 = vpop.xlane.xlu0 %725 }
 0x1ae   :  { %v714_v13 = vpop.xlane.xlu1 %713  ;;  %v727_v20 = vmul.f32 0.25, %v726_v28 }
 0x1af   :  { %v580_v52 = vrot.slane %v579_v29, 2  ;;  %v715_v16 = vmul.f32 0.25, %v714_v13 }
 0x1b1   :  { %v581_v55 = vadd.f32 %v580_v52, %v579_v29 }
 0x1b3   :  { %v582_v34 = vrot.slane %v581_v55, 1 }
 0x1b5   :  { %v583_v58 = vadd.f32 %v582_v34, %v581_v55  ;;  %v1149_v53 = vpop.eup %1148 }
 0x1b6   :  { %v1151_v1 = vpop.eup %1150  ;;  %v797_v2 = vmul.f32 %v1149_v53, %v795_v26 }
 0x1b7   :  { %v656_v59 = vsel %vm653_vm8, %v583_v58, %v655_v57  ;;  %v781_v5 = vmul.f32 %v1151_v1, %v779_v0 }
 0x1b8   :  { %v664_v60 = vrot.slane %v656_v59, %v663_v56  ;;  %v799_v7 = vsel %vm798_vm9, %v795_v26, %v797_v2 }
 0x1b9   :  { %v783_v9 = vsel %vm782_vm10, %v779_v0, %v781_v5  ;;  %v802_v11 = vsel %vm800_vm11, %v801_v62, %v799_v7 }
 0x1ba   :  { %v665_v61 = vcombine.high %v664_v60, %v664_v60  ;;  %v786_v12 = vsel %vm784_vm12, %v785_v10, %v783_v9 }
 0x1bb   :  { %v803_v37 = vsub.f32 %v786_v12, %v802_v11 }
 0x1bc   :  { %v672_v44 = vrot.slane %v665_v61, %v663_v56 }
 0x1bd   :  { %v804_v24 = vadd.f32 5.0, %v803_v37 }
 0x1be   :  { %v674_v4 = vadd.f32 %v672_v44, %v652_v63 }
 0x1bf   :  { %v805_v32 = vmax.f32 %v804_v24, 0.0 }
 0x1c0   :  { %675 = vst [vmem:[#allocation2] sm:$0x1] %v674_v4 }
 0x1c7   :  { %v679_v14 = vld [vmem:[#allocation2] sm:$0x1] }
 0x1c8   :  { %v680_v15 = vmul.f32 0.03125, %v679_v14 }
 0x1ca   :  { %v811_v19 = vrot.slane %v680_v15, %v54_v6 }
 0x1cc   :  { %v813_v23 = vsel %vm806_vm13, %v703_v17, %v811_v19 }
 0x1cd   :  { %v815_v27 = vsel %vm814_vm14, %v715_v16, %v813_v23 }
 0x1ce   :  { %v817_v31 = vsel %vm816_vm6, %v727_v20, %v815_v27 }
 0x1cf   :  { %v820_v33 = vrot.slane %v817_v31, 3 }
 0x1d1   :  { %v822_v35 = vsel %vm818_vm15, %v805_v32, %v820_v33 }
 0x1d2   :  { %823 = vst [vmem:[%s1635_s7] sm:$0x1] %v822_v35 }

// kernel: disl_loss.2
= control target key start
LH: loop header
LB: loop body
LE: loop exit
PB: predicated region body
PF: predicated region fallthrough
CT: control target
= control target key end

     0   :  { %v1314_v5 = vmov 0.0   ;;  %vm111_vm0 = vcmask 261120   ;;  %vm652_vm5 = vcmask 1040384   ;;  %s1717_s2 = inlined_call_operand.vmem [shape: f32[32,128], index: 2, kind: input, shape index: {}]   ;;  %s1718_s1 = inlined_call_operand.vmem [shape: f32[32,128], index: 1, kind: input, shape index: {}]   ;;  %s1719_s0 = inlined_call_operand.vmem [shape: f32[32,128], index: 0, kind: input, shape index: {}]   ;;  %s1720_s3 = inlined_call_operand.vmem [shape: s32[2,128], index: 3, kind: output, shape index: {}]  }
   0x1   :  { %v59_v0 = vld [vmem:[%s1717_s2] sm:$0xff]  ;;  %v60_v2 = vld [vmem:[%s1717_s2 + $0x8] sm:$0xff]  ;;  %50 = vst [vmem:[#allocation4] sm:$0x1] %v1314_v5  ;;  %v53_v8 = vld [vmem:[%s1719_s0 + $0x10] sm:$0xff] }
   0x2   :  { %v55_v1 = vld [vmem:[%s1718_s1] sm:$0xff]  ;;  %353 = vxpose.xlu1.b32.start [1/4] (short) %v59_v0, 128  ;;  %v56_v3 = vld [vmem:[%s1718_s1 + $0x8] sm:$0xff]  ;;  %v54_v9 = vld [vmem:[%s1719_s0 + $0x18] sm:$0xff]  ;;  %v613_v13 = vmul.f32 %v53_v8, %v53_v8 }
   0x3   :  { %79 = vxpose.xlu0.b32.start [1/4] (short) %v55_v1, 128  ;;  %v51_v4 = vld [vmem:[%s1719_s0] sm:$0xff]  ;;  %v52_v6 = vld [vmem:[%s1719_s0 + $0x8] sm:$0xff]  ;;  %v1295_v12 = vpack.c.bf16 %v54_v9, %v53_v8  ;;  %v61_v14 = vld [vmem:[%s1717_s2 + $0x10] sm:$0xff]  ;;  %v614_v17 = vmul.f32 %v54_v9, %v54_v9 }
   0x4   :  { %v611_v7 = vmul.f32 %v51_v4, %v51_v4  ;;  %v1291_v10 = vpack.c.bf16 %v52_v6, %v51_v4  ;;  %v612_v11 = vmul.f32 %v52_v6, %v52_v6  ;;  %v57_v15 = vld [vmem:[%s1718_s1 + $0x10] sm:$0xff]  ;;  %v62_v19 = vld [vmem:[%s1717_s2 + $0x18] sm:$0xff]  ;;  %v640_v6 = vlaneseq }
   0x5   :  { %v58_v20 = vld [vmem:[%s1718_s1 + $0x18] sm:$0xff] }
   0x6   :  { %354 = vxpose.xlu1.b32.cont [2/4] (short) %v60_v2, 128  ;;  %1292 = vmatprep.subr.bf16.mxu0 %v1291_v10  ;;  %v615_v16 = vadd.f32 %v612_v11, %v611_v7  ;;  %v1405_v11 = vand.u32 127, %v640_v6 }
   0x7   :  { %80 = vxpose.xlu0.b32.cont [2/4] (short) %v56_v3, 128  ;;  %1300 = vmatprep.subr.bf16.mxu1 %v1291_v10 }
   0x8   :  { %1294 = vmatpush3.bf16.msra.mxu0 %v1291_v10  ;;  %1302 = vmatpush3.bf16.msra.mxu1 %v1291_v10  ;;  %v616_v18 = vadd.f32 %v615_v16, %v613_v13  ;;  %v610_v27 = vld [vmem:[#allocation4] sm:$0x1]  ;;  %vm643_vm3 = vcmp.ge.s32.totalorder %v1405_v11, 32 }
   0x9   :  { %1296 = vmatprep.subr.bf16.mxu0 %v1295_v12  ;;  %1304 = vmatprep.subr.bf16.mxu1 %v1295_v12 }
   0xa   :  { %355 = vxpose.xlu1.b32.cont [3/4] (short) %v61_v14, 128  ;;  %v617_v21 = vadd.f32 %v616_v18, %v614_v17 }
   0xb   :  { %81 = vxpose.xlu0.b32.cont [3/4] (short) %v57_v15, 128 }
   0xc   :  { %1298 = vmatpush3.bf16.msra.mxu0 %v1295_v12  ;;  %1306 = vmatpush3.bf16.msra.mxu1 %v1295_v12  ;;  %v618_v22 = vrot.slane %v617_v21, 4  ;;  %v1409_v12 = vsel %vm643_vm3, 1.0, %v1314_v5  ;;  %v1419_v5 = vcvt.s32.f32 %v1405_v11 }
   0xd   :  { %vm649_vm4 = vcmp.gt.f32.partialorder %v1409_v12, 0.5 }
   0xe   :  { %356 = vxpose.xlu1.b32.end [4/4] (short) %v62_v19, 128  ;;  %v619_v23 = vadd.f32 %v618_v22, %v617_v21 }
   0xf   :  { %82 = vxpose.xlu0.b32.end [4/4] (short) %v58_v20, 128 }
  0x10   :  { %v620_v24 = vrot.slane %v619_v23, 2 }
  0x12   :  { %v621_v25 = vadd.f32 %v620_v24, %v619_v23 }
  0x14   :  { %v622_v26 = vrot.slane %v621_v25, 1 }
  0x16   :  { %v623_v28 = vadd.f32 %v622_v26, %v621_v25 }
  0x18   :  { %v624_v29 = vadd.f32 %v623_v28, %v610_v27 }
  0x1a   :  { %625 = vst [vmem:[#allocation4] sm:$0x1] %v624_v29 }
  0x21   :  { %v629_v62 = vld [vmem:[#allocation4] sm:$0x1] }
  0x22   :  { %1310 = vrsqrt.f32 %v629_v62  ;;  %vm632_vm1 = vcmp.eq.f32.partialorder %v629_v62, inf  ;;  %v635_v1 = vand.u32 2147483648, %v629_v62  ;;  %vm634_vm2 = vcmp.eq.f32.partialorder %v629_v62, 0.0 }
  0x2c   :  { %v1311_v63 = vpop.eup %1310 }
  0x2d   :  { %v631_v0 = vmul.f32 %v1311_v63, %v629_v62 }
  0x2f   :  { %v633_v2 = vsel %vm632_vm1, %v629_v62, %v631_v0 }
  0x30   :  { %v636_v3 = vsel %vm634_vm2, %v635_v1, %v633_v2 }
  0x31   :  { %v637_v4 = vmax.f32 %v636_v3, 1e-12 }
  0x33   :  { %1312 = vrcp.f32 %v637_v4 }
  0x3d   :  { %v1411_v13 = vpop.eup %1312 }
  0x82   :  { %v369_v30 = vpop.trf.xlu1 }
  0x83   :  { %v95_v31 = vpop.trf.xlu0  ;;  %1267 = vmatprep.mubr.msk.f32.mxu1 %vm111_vm0, %v369_v30 }
  0x84   :  { %1235 = vmatprep.mubr.msk.f32.mxu0 %vm111_vm0, %v95_v31 }
  0x86   :  { %v370_v32 = vpop.trf.xlu1 }
  0x87   :  { %v96_v33 = vpop.trf.xlu0  ;;  %1268 = vmatmul.mubr.msk.f32.vlgmr.msra.gmra.mrb[0].mxu1 %vm111_vm0, %v370_v32 }
  0x88   :  { %1236 = vmatmul.mubr.msk.f32.vlgmr.msra.gmra.mrb[0].mxu0 %vm111_vm0, %v96_v33 }
  0x8a   :  { %v371_v35 = vpop.trf.xlu1 }
  0x8b   :  { %v97_v34 = vpop.trf.xlu0  ;;  %1270 = vmatprep.mubr.msk.f32.mxu1 %vm111_vm0, %v371_v35 }
  0x8c   :  { %1238 = vmatprep.mubr.msk.f32.mxu0 %vm111_vm0, %v97_v34 }
  0x8e   :  { %v372_v37 = vpop.trf.xlu1 }
  0x8f   :  { %v98_v36 = vpop.trf.xlu0  ;;  %1271 = vmatmul.mubr.msk.f32.gmra.mrb[2].mxu1 %vm111_vm0, %v372_v37 }
  0x90   :  { %1239 = vmatmul.mubr.msk.f32.gmra.mrb[2].mxu0 %vm111_vm0, %v98_v36 }
  0x92   :  { %v373_v39 = vpop.trf.xlu1 }
  0x93   :  { %v99_v38 = vpop.trf.xlu0  ;;  %1273 = vmatprep.mubr.msk.f32.mxu1 %vm111_vm0, %v373_v39 }
  0x94   :  { %1241 = vmatprep.mubr.msk.f32.mxu0 %vm111_vm0, %v99_v38 }
  0x96   :  { %v374_v41 = vpop.trf.xlu1 }
  0x97   :  { %v100_v40 = vpop.trf.xlu0  ;;  %1274 = vmatmul.mubr.msk.f32.gmra.mrb[4].mxu1 %vm111_vm0, %v374_v41 }
  0x98   :  { %1242 = vmatmul.mubr.msk.f32.gmra.mrb[4].mxu0 %vm111_vm0, %v100_v40 }
  0x9a   :  { %v375_v43 = vpop.trf.xlu1 }
  0x9b   :  { %v101_v42 = vpop.trf.xlu0  ;;  %1276 = vmatprep.mubr.msk.f32.mxu1 %vm111_vm0, %v375_v43 }
  0x9c   :  { %1244 = vmatprep.mubr.msk.f32.mxu0 %vm111_vm0, %v101_v42 }
  0x9e   :  { %v376_v45 = vpop.trf.xlu1 }
  0x9f   :  { %v102_v44 = vpop.trf.xlu0  ;;  %1277 = vmatmul.mubr.msk.f32.gmra.mrb[6].mxu1 %vm111_vm0, %v376_v45 }
  0xa0   :  { %1245 = vmatmul.mubr.msk.f32.gmra.mrb[6].mxu0 %vm111_vm0, %v102_v44 }
  0xa2   :  { %v377_v47 = vpop.trf.xlu1 }
  0xa3   :  { %v103_v46 = vpop.trf.xlu0  ;;  %1279 = vmatprep.mubr.msk.f32.mxu1 %vm111_vm0, %v377_v47 }
  0xa4   :  { %1247 = vmatprep.mubr.msk.f32.mxu0 %vm111_vm0, %v103_v46 }
  0xa6   :  { %v378_v49 = vpop.trf.xlu1 }
  0xa7   :  { %v104_v48 = vpop.trf.xlu0  ;;  %1280 = vmatmul.mubr.msk.f32.gmra.mrb[8].mxu1 %vm111_vm0, %v378_v49 }
  0xa8   :  { %1248 = vmatmul.mubr.msk.f32.gmra.mrb[8].mxu0 %vm111_vm0, %v104_v48 }
  0xaa   :  { %v379_v51 = vpop.trf.xlu1 }
  0xab   :  { %v105_v50 = vpop.trf.xlu0  ;;  %1282 = vmatprep.mubr.msk.f32.mxu1 %vm111_vm0, %v379_v51 }
  0xac   :  { %1250 = vmatprep.mubr.msk.f32.mxu0 %vm111_vm0, %v105_v50 }
  0xae   :  { %v380_v53 = vpop.trf.xlu1 }
  0xaf   :  { %v106_v52 = vpop.trf.xlu0  ;;  %1283 = vmatmul.mubr.msk.f32.gmra.mrb[10].mxu1 %vm111_vm0, %v380_v53 }
  0xb0   :  { %1251 = vmatmul.mubr.msk.f32.gmra.mrb[10].mxu0 %vm111_vm0, %v106_v52 }
  0xb2   :  { %v381_v55 = vpop.trf.xlu1 }
  0xb3   :  { %v107_v54 = vpop.trf.xlu0  ;;  %1285 = vmatprep.mubr.msk.f32.mxu1 %vm111_vm0, %v381_v55 }
  0xb4   :  { %1253 = vmatprep.mubr.msk.f32.mxu0 %vm111_vm0, %v107_v54 }
  0xb6   :  { %v382_v57 = vpop.trf.xlu1 }
  0xb7   :  { %v108_v56 = vpop.trf.xlu0  ;;  %1286 = vmatmul.mubr.msk.f32.gmra.mrb[12].mxu1 %vm111_vm0, %v382_v57 }
  0xb8   :  { %1254 = vmatmul.mubr.msk.f32.gmra.mrb[12].mxu0 %vm111_vm0, %v108_v56 }
  0xba   :  { %v383_v59 = vpop.trf.xlu1 }
  0xbb   :  { %v109_v58 = vpop.trf.xlu0  ;;  %1288 = vmatprep.mubr.msk.f32.mxu1 %vm111_vm0, %v383_v59 }
  0xbc   :  { %1256 = vmatprep.mubr.msk.f32.mxu0 %vm111_vm0, %v109_v58 }
  0xbe   :  { %v384_v61 = vpop.trf.xlu1 }
  0xbf   :  { %v110_v60 = vpop.trf.xlu0  ;;  %1289 = vmatmul.mubr.msk.f32.gmra.mrb[14].mxu1 %vm111_vm0, %v384_v61 }
  0xc0   :  { %1257 = vmatmul.mubr.msk.f32.gmra.mrb[14].mxu0 %vm111_vm0, %v110_v60 }
 0x15a   :  { %v1269_v8 = vpop.f32.mrb[0].mxu1 }
 0x15b   :  { %v1237_v7 = vpop.f32.mrb[0].mxu0  ;;  %v499_v10 = vpop.f32.mrb[1].mxu1  ;;  %595 = vst [vmem:[#allocation3 + $0x8] sm:$0xff] %v1269_v8 }
 0x15c   :  { %v226_v9 = vpop.f32.mrb[1].mxu0  ;;  %322 = vst [vmem:[#allocation2 + $0x8] sm:$0xff] %v1237_v7  ;;  %594 = vst [vmem:[#allocation3] sm:$0xff] %v499_v10 }
 0x15d   :  { %321 = vst [vmem:[#allocation2] sm:$0xff] %v226_v9 }
 0x162   :  { %v1272_v29 = vpop.f32.mrb[2].mxu1 }
 0x163   :  { %v647_v14 = vld [vmem:[#allocation3] sm:$0x1]  ;;  %v1240_v28 = vpop.f32.mrb[2].mxu0  ;;  %v509_v31 = vpop.f32.mrb[3].mxu1  ;;  %v678_v60 = vld [vmem:[#allocation3 + $0x1] sm:$0x1] }
 0x164   :  { %v645_v15 = vld [vmem:[#allocation2] sm:$0x1]  ;;  %v648_v16 = vmul.f32 %v1411_v13, %v647_v14  ;;  %v236_v30 = vpop.f32.mrb[3].mxu0  ;;  %v676_v56 = vld [vmem:[#allocation2 + $0x1] sm:$0x1]  ;;  %v679_v1 = vmul.f32 %v1411_v13, %v678_v60 }
 0x165   :  { %v646_v17 = vmul.f32 %v1411_v13, %v645_v15  ;;  %v677_v59 = vmul.f32 %v1411_v13, %v676_v56  ;;  %v707_v14 = vld [vmem:[#allocation2 + $0x2] sm:$0x1] }
 0x166   :  { %v651_v18 = vsel %vm649_vm4, -inf, %v648_v16 }
 0x167   :  { %v650_v19 = vsel %vm649_vm4, -inf, %v646_v17  ;;  %v656_v20 = vsel %vm652_vm5, %v651_v18, -inf  ;;  %v708_v17 = vmul.f32 %v1411_v13, %v707_v14  ;;  %v802_v14 = vld [vmem:[#allocation3 + $0x5] sm:$0x1] }
 0x168   :  { %v653_v21 = vsel %vm652_vm5, %v650_v19, -inf  ;;  %657 = vmax.xlane.f32.xlu1 %v656_v20 }
 0x169   :  { %654 = vmax.xlane.f32.xlu0 %v653_v21 }
 0x16a   :  { %v1275_v33 = vpop.f32.mrb[4].mxu1 }
 0x16b   :  { %v1243_v32 = vpop.f32.mrb[4].mxu0  ;;  %v519_v35 = vpop.f32.mrb[5].mxu1 }
 0x16c   :  { %v246_v34 = vpop.f32.mrb[5].mxu0  ;;  %v738_v32 = vld [vmem:[#allocation2 + $0x3] sm:$0x1] }
 0x16d   :  { %v739_v35 = vmul.f32 %v1411_v13, %v738_v32 }
 0x172   :  { %v1278_v37 = vpop.f32.mrb[6].mxu1 }
 0x173   :  { %v1246_v36 = vpop.f32.mrb[6].mxu0  ;;  %v529_v39 = vpop.f32.mrb[7].mxu1 }
 0x174   :  { %v256_v38 = vpop.f32.mrb[7].mxu0  ;;  %v740_v36 = vld [vmem:[#allocation3 + $0x3] sm:$0x1] }
 0x17a   :  { %v1281_v41 = vpop.f32.mrb[8].mxu1 }
 0x17b   :  { %v1249_v40 = vpop.f32.mrb[8].mxu0  ;;  %v539_v43 = vpop.f32.mrb[9].mxu1  ;;  %v741_v41 = vmul.f32 %v1411_v13, %v740_v36 }
 0x17c   :  { %v266_v42 = vpop.f32.mrb[9].mxu0 }
 0x182   :  { %v1284_v45 = vpop.f32.mrb[10].mxu1 }
 0x183   :  { %v1252_v44 = vpop.f32.mrb[10].mxu0  ;;  %v549_v47 = vpop.f32.mrb[11].mxu1 }
 0x184   :  { %v276_v46 = vpop.f32.mrb[11].mxu0 }
 0x18a   :  { %v1287_v49 = vpop.f32.mrb[12].mxu1 }
 0x18b   :  { %v1255_v48 = vpop.f32.mrb[12].mxu0  ;;  %v559_v51 = vpop.f32.mrb[13].mxu1 }
 0x18c   :  { %v286_v50 = vpop.f32.mrb[13].mxu0 }
 0x18d   :  { %v769_v50 = vld [vmem:[#allocation2 + $0x4] sm:$0x1] }
 0x192   :  { %v1290_v53 = vpop.f32.mrb[14].mxu1 }
 0x193   :  { %v1258_v52 = vpop.f32.mrb[14].mxu0  ;;  %v569_v55 = vpop.f32.mrb[15].mxu1  ;;  %v770_v53 = vmul.f32 %v1411_v13, %v769_v50  ;;  %v862_v50 = vld [vmem:[#allocation2 + $0x7] sm:$0x1] }
 0x194   :  { %v296_v54 = vpop.f32.mrb[15].mxu0 }
 0x195   :  { %v771_v54 = vld [vmem:[#allocation3 + $0x4] sm:$0x1] }
 0x196   :  { %v772_v60 = vmul.f32 %v1411_v13, %v771_v54  ;;  %v863_v54 = vmul.f32 %v1411_v13, %v862_v50 }
 0x1f5   :  { %v658_v22 = vpop.xlane.xlu1 %657 }
 0x1f6   :  { %v655_v23 = vpop.xlane.xlu0 %654  ;;  %vm664_vm6 = vcmp.ge.f32.partialorder %v651_v18, %v658_v22  ;;  %v709_v18 = vld [vmem:[#allocation3 + $0x2] sm:$0x1] }
 0x1f7   :  { %vm659_vm7 = vcmp.ge.f32.partialorder %v650_v19, %v655_v23  ;;  %v665_v26 = vsel %vm664_vm6, %v1419_v5, 128.0  ;;  %v710_v23 = vmul.f32 %v1411_v13, %v709_v18 }
 0x1f8   :  { %v660_v24 = vsel %vm659_vm7, %v1419_v5, 128.0  ;;  %v666_v27 = vsel %vm652_vm5, %v665_v26, inf }
 0x1f9   :  { %v661_v25 = vsel %vm652_vm5, %v660_v24, inf }
 0x1fa   :  { %662 = vmin.xlane.f32.xlu1 %v661_v25 }
 0x1fe   :  { %667 = vmin.xlane.f32.xlu1 %v666_v27 }
 0x287   :  { %v1425_v57 = vpop.xlane.xlu1 %662 }
 0x288   :  { %vm669_vm8 = vcmp.eq.f32.partialorder %v1419_v5, %v1425_v57 }
 0x289   :  { %v670_v58 = vsel %vm669_vm8, 1.0, %v1409_v12 }
 0x28a   :  { %vm680_vm9 = vcmp.gt.f32.partialorder %v670_v58, 0.5 }
 0x28b   :  { %v1431_v61 = vpop.xlane.xlu1 %667  ;;  %v681_v62 = vsel %vm680_vm9, -inf, %v677_v59 }
 0x28c   :  { %vm671_vm10 = vcmp.eq.f32.partialorder %v1419_v5, %v1431_v61  ;;  %v684_v63 = vsel %vm652_vm5, %v681_v62, -inf }
 0x28d   :  { %v672_v0 = vsel %vm671_vm10, 1.0, %v1409_v12  ;;  %685 = vmax.xlane.f32.xlu0 %v684_v63 }
 0x28e   :  { %vm682_vm11 = vcmp.gt.f32.partialorder %v672_v0, 0.5 }
 0x28f   :  { %v683_v2 = vsel %vm682_vm11, -inf, %v679_v1 }
 0x290   :  { %v687_v3 = vsel %vm652_vm5, %v683_v2, -inf }
 0x291   :  { %688 = vmax.xlane.f32.xlu1 %v687_v3 }
 0x31a   :  { %v686_v4 = vpop.xlane.xlu0 %685 }
 0x31b   :  { %vm690_vm12 = vcmp.ge.f32.partialorder %v681_v62, %v686_v4 }
 0x31c   :  { %v691_v7 = vsel %vm690_vm12, %v1419_v5, 128.0 }
 0x31d   :  { %v692_v8 = vsel %vm652_vm5, %v691_v7, inf }
 0x31e   :  { %693 = vmin.xlane.f32.xlu0 %v692_v8  ;;  %v689_v9 = vpop.xlane.xlu1 %688  ;;  %v800_v8 = vld [vmem:[#allocation2 + $0x5] sm:$0x1] }
 0x31f   :  { %vm695_vm13 = vcmp.ge.f32.partialorder %v683_v2, %v689_v9 }
 0x320   :  { %v696_v10 = vsel %vm695_vm13, %v1419_v5, 128.0 }
 0x321   :  { %v697_v12 = vsel %vm652_vm5, %v696_v10, inf }
 0x322   :  { %698 = vmin.xlane.f32.xlu1 %v697_v12  ;;  %v801_v12 = vmul.f32 %v1411_v13, %v800_v8 }
 0x3ab   :  { %v1443_v15 = vpop.xlane.xlu0 %693 }
 0x3ac   :  { %vm700_vm14 = vcmp.eq.f32.partialorder %v1419_v5, %v1443_v15 }
 0x3ad   :  { %v701_v16 = vsel %vm700_vm14, 1.0, %v670_v58 }
 0x3ae   :  { %vm711_vm15 = vcmp.gt.f32.partialorder %v701_v16, 0.5 }
 0x3af   :  { %v1448_v19 = vpop.xlane.xlu1 %698  ;;  %v712_v20 = vsel %vm711_vm15, -inf, %v708_v17 }
 0x3b0   :  { %vm702_vm0 = vcmp.eq.f32.partialorder %v1419_v5, %v1448_v19  ;;  %v715_v21 = vsel %vm652_vm5, %v712_v20, -inf }
 0x3b1   :  { %v703_v22 = vsel %vm702_vm0, 1.0, %v672_v0  ;;  %716 = vmax.xlane.f32.xlu0 %v715_v21  ;;  %v803_v21 = vmul.f32 %v1411_v13, %v802_v14 }
 0x3b2   :  { %vm713_vm1 = vcmp.gt.f32.partialorder %v703_v22, 0.5 }
 0x3b3   :  { %v714_v24 = vsel %vm713_vm1, -inf, %v710_v23 }
 0x3b4   :  { %v718_v25 = vsel %vm652_vm5, %v714_v24, -inf }
 0x3b5   :  { %719 = vmax.xlane.f32.xlu1 %v718_v25 }
 0x43e   :  { %v717_v26 = vpop.xlane.xlu0 %716 }
 0x43f   :  { %vm721_vm2 = vcmp.ge.f32.partialorder %v712_v20, %v717_v26 }
 0x440   :  { %v722_v27 = vsel %vm721_vm2, %v1419_v5, 128.0 }
 0x441   :  { %v723_v28 = vsel %vm652_vm5, %v722_v27, inf }
 0x442   :  { %724 = vmin.xlane.f32.xlu0 %v723_v28  ;;  %v720_v29 = vpop.xlane.xlu1 %719 }
 0x443   :  { %vm726_vm3 = vcmp.ge.f32.partialorder %v714_v24, %v720_v29 }
 0x444   :  { %v727_v30 = vsel %vm726_vm3, %v1419_v5, 128.0 }
 0x445   :  { %v728_v31 = vsel %vm652_vm5, %v727_v30, inf  ;;  %v831_v30 = vld [vmem:[#allocation2 + $0x6] sm:$0x1] }
 0x446   :  { %729 = vmin.xlane.f32.xlu1 %v728_v31 }
 0x4cf   :  { %v1459_v33 = vpop.xlane.xlu0 %724 }
 0x4d0   :  { %vm731_vm4 = vcmp.eq.f32.partialorder %v1419_v5, %v1459_v33 }
 0x4d1   :  { %v732_v34 = vsel %vm731_vm4, 1.0, %v701_v16 }
 0x4d2   :  { %vm742_vm6 = vcmp.gt.f32.partialorder %v732_v34, 0.5 }
 0x4d3   :  { %v1464_v37 = vpop.xlane.xlu1 %729  ;;  %v743_v38 = vsel %vm742_vm6, -inf, %v739_v35  ;;  %v833_v35 = vld [vmem:[#allocation3 + $0x6] sm:$0x1] }
 0x4d4   :  { %vm733_vm7 = vcmp.eq.f32.partialorder %v1419_v5, %v1464_v37  ;;  %v746_v39 = vsel %vm652_vm5, %v743_v38, -inf }
 0x4d5   :  { %v734_v40 = vsel %vm733_vm7, 1.0, %v703_v22  ;;  %747 = vmax.xlane.f32.xlu0 %v746_v39 }
 0x4d6   :  { %vm744_vm8 = vcmp.gt.f32.partialorder %v734_v40, 0.5 }
 0x4d7   :  { %v745_v42 = vsel %vm744_vm8, -inf, %v741_v41  ;;  %v834_v41 = vmul.f32 %v1411_v13, %v833_v35 }
 0x4d8   :  { %v749_v43 = vsel %vm652_vm5, %v745_v42, -inf }
 0x4d9   :  { %750 = vmax.xlane.f32.xlu1 %v749_v43 }
 0x562   :  { %v748_v44 = vpop.xlane.xlu0 %747 }
 0x563   :  { %vm752_vm9 = vcmp.ge.f32.partialorder %v743_v38, %v748_v44 }
 0x564   :  { %v753_v45 = vsel %vm752_vm9, %v1419_v5, 128.0 }
 0x565   :  { %v754_v46 = vsel %vm652_vm5, %v753_v45, inf }
 0x566   :  { %755 = vmin.xlane.f32.xlu0 %v754_v46  ;;  %v751_v47 = vpop.xlane.xlu1 %750 }
 0x567   :  { %vm757_vm10 = vcmp.ge.f32.partialorder %v745_v42, %v751_v47 }
 0x568   :  { %v758_v48 = vsel %vm757_vm10, %v1419_v5, 128.0 }
 0x569   :  { %v759_v49 = vsel %vm652_vm5, %v758_v48, inf }
 0x56a   :  { %760 = vmin.xlane.f32.xlu1 %v759_v49 }
 0x5f3   :  { %v1475_v51 = vpop.xlane.xlu0 %755 }
 0x5f4   :  { %vm762_vm11 = vcmp.eq.f32.partialorder %v1419_v5, %v1475_v51 }
 0x5f5   :  { %v763_v52 = vsel %vm762_vm11, 1.0, %v732_v34  ;;  %v832_v34 = vmul.f32 %v1411_v13, %v831_v30 }
 0x5f6   :  { %vm773_vm12 = vcmp.gt.f32.partialorder %v763_v52, 0.5 }
 0x5f7   :  { %v1480_v55 = vpop.xlane.xlu1 %760  ;;  %v774_v56 = vsel %vm773_vm12, -inf, %v770_v53 }
 0x5f8   :  { %vm764_vm13 = vcmp.eq.f32.partialorder %v1419_v5, %v1480_v55  ;;  %v777_v58 = vsel %vm652_vm5, %v774_v56, -inf }
 0x5f9   :  { %v765_v59 = vsel %vm764_vm13, 1.0, %v734_v40  ;;  %778 = vmax.xlane.f32.xlu0 %v777_v58 }
 0x5fa   :  { %vm775_vm14 = vcmp.gt.f32.partialorder %v765_v59, 0.5 }
 0x5fb   :  { %v776_v62 = vsel %vm775_vm14, -inf, %v772_v60 }
 0x5fc   :  { %v780_v63 = vsel %vm652_vm5, %v776_v62, -inf }
 0x5fd   :  { %781 = vmax.xlane.f32.xlu1 %v780_v63 }
 0x686   :  { %v779_v0 = vpop.xlane.xlu0 %778 }
 0x687   :  { %vm783_vm15 = vcmp.ge.f32.partialorder %v774_v56, %v779_v0  ;;  %v864_v56 = vld [vmem:[#allocation3 + $0x7] sm:$0x1] }
 0x688   :  { %v784_v1 = vsel %vm783_vm15, %v1419_v5, 128.0  ;;  %v865_v63 = vmul.f32 %v1411_v13, %v864_v56 }
 0x689   :  { %v785_v2 = vsel %vm652_vm5, %v784_v1, inf }
 0x68a   :  { %786 = vmin.xlane.f32.xlu0 %v785_v2  ;;  %v782_v3 = vpop.xlane.xlu1 %781 }
 0x68b   :  { %vm788_vm0 = vcmp.ge.f32.partialorder %v776_v62, %v782_v3 }
 0x68c   :  { %v789_v4 = vsel %vm788_vm0, %v1419_v5, 128.0 }
 0x68d   :  { %v790_v7 = vsel %vm652_vm5, %v789_v4, inf }
 0x68e   :  { %791 = vmin.xlane.f32.xlu1 %v790_v7 }
 0x717   :  { %v1491_v9 = vpop.xlane.xlu0 %786 }
 0x718   :  { %vm793_vm1 = vcmp.eq.f32.partialorder %v1419_v5, %v1491_v9 }
 0x719   :  { %v794_v10 = vsel %vm793_vm1, 1.0, %v763_v52 }
 0x71a   :  { %vm804_vm2 = vcmp.gt.f32.partialorder %v794_v10, 0.5 }
 0x71b   :  { %v1496_v16 = vpop.xlane.xlu1 %791  ;;  %v805_v17 = vsel %vm804_vm2, -inf, %v801_v12  ;;  %v893_v12 = vld [vmem:[#allocation2 + $0x8] sm:$0x1] }
 0x71c   :  { %vm795_vm3 = vcmp.eq.f32.partialorder %v1419_v5, %v1496_v16  ;;  %v808_v18 = vsel %vm652_vm5, %v805_v17, -inf }
 0x71d   :  { %v796_v20 = vsel %vm795_vm3, 1.0, %v765_v59  ;;  %809 = vmax.xlane.f32.xlu0 %v808_v18  ;;  %v894_v18 = vmul.f32 %v1411_v13, %v893_v12 }
 0x71e   :  { %vm806_vm4 = vcmp.gt.f32.partialorder %v796_v20, 0.5 }
 0x71f   :  { %v807_v22 = vsel %vm806_vm4, -inf, %v803_v21 }
 0x720   :  { %v811_v23 = vsel %vm652_vm5, %v807_v22, -inf }
 0x721   :  { %812 = vmax.xlane.f32.xlu1 %v811_v23 }
 0x7aa   :  { %v810_v24 = vpop.xlane.xlu0 %809 }
 0x7ab   :  { %vm814_vm6 = vcmp.ge.f32.partialorder %v805_v17, %v810_v24 }
 0x7ac   :  { %v815_v25 = vsel %vm814_vm6, %v1419_v5, 128.0 }
 0x7ad   :  { %v816_v26 = vsel %vm652_vm5, %v815_v25, inf }
 0x7ae   :  { %817 = vmin.xlane.f32.xlu0 %v816_v26  ;;  %v813_v27 = vpop.xlane.xlu1 %812 }
 0x7af   :  { %vm819_vm7 = vcmp.ge.f32.partialorder %v807_v22, %v813_v27 }
 0x7b0   :  { %v820_v28 = vsel %vm819_vm7, %v1419_v5, 128.0 }
 0x7b1   :  { %v821_v29 = vsel %vm652_vm5, %v820_v28, inf }
 0x7b2   :  { %822 = vmin.xlane.f32.xlu1 %v821_v29 }
 0x83b   :  { %v1507_v31 = vpop.xlane.xlu0 %817 }
 0x83c   :  { %vm824_vm8 = vcmp.eq.f32.partialorder %v1419_v5, %v1507_v31 }
 0x83d   :  { %v825_v32 = vsel %vm824_vm8, 1.0, %v794_v10 }
 0x83e   :  { %vm835_vm9 = vcmp.gt.f32.partialorder %v825_v32, 0.5 }
 0x83f   :  { %v1512_v36 = vpop.xlane.xlu1 %822  ;;  %v836_v38 = vsel %vm835_vm9, -inf, %v832_v34 }
 0x840   :  { %vm826_vm10 = vcmp.eq.f32.partialorder %v1419_v5, %v1512_v36  ;;  %v839_v39 = vsel %vm652_vm5, %v836_v38, -inf }
 0x841   :  { %v827_v40 = vsel %vm826_vm10, 1.0, %v796_v20  ;;  %840 = vmax.xlane.f32.xlu0 %v839_v39  ;;  %v895_v20 = vld [vmem:[#allocation3 + $0x8] sm:$0x1] }
 0x842   :  { %vm837_vm11 = vcmp.gt.f32.partialorder %v827_v40, 0.5  ;;  %v896_v25 = vmul.f32 %v1411_v13, %v895_v20 }
 0x843   :  { %v838_v42 = vsel %vm837_vm11, -inf, %v834_v41 }
 0x844   :  { %v842_v43 = vsel %vm652_vm5, %v838_v42, -inf }
 0x845   :  { %843 = vmax.xlane.f32.xlu1 %v842_v43 }
 0x8ce   :  { %v841_v44 = vpop.xlane.xlu0 %840 }
 0x8cf   :  { %vm845_vm12 = vcmp.ge.f32.partialorder %v836_v38, %v841_v44  ;;  %v924_v38 = vld [vmem:[#allocation2 + $0x9] sm:$0x1] }
 0x8d0   :  { %v846_v45 = vsel %vm845_vm12, %v1419_v5, 128.0  ;;  %v925_v41 = vmul.f32 %v1411_v13, %v924_v38 }
 0x8d1   :  { %v847_v46 = vsel %vm652_vm5, %v846_v45, inf }
 0x8d2   :  { %848 = vmin.xlane.f32.xlu0 %v847_v46  ;;  %v844_v47 = vpop.xlane.xlu1 %843 }
 0x8d3   :  { %vm850_vm13 = vcmp.ge.f32.partialorder %v838_v42, %v844_v47  ;;  %v926_v42 = vld [vmem:[#allocation3 + $0x9] sm:$0x1] }
 0x8d4   :  { %v851_v48 = vsel %vm850_vm13, %v1419_v5, 128.0  ;;  %v927_v47 = vmul.f32 %v1411_v13, %v926_v42 }
 0x8d5   :  { %v852_v49 = vsel %vm652_vm5, %v851_v48, inf }
 0x8d6   :  { %853 = vmin.xlane.f32.xlu1 %v852_v49 }
 0x95f   :  { %v1523_v52 = vpop.xlane.xlu0 %848 }
 0x960   :  { %vm855_vm14 = vcmp.eq.f32.partialorder %v1419_v5, %v1523_v52 }
 0x961   :  { %v856_v53 = vsel %vm855_vm14, 1.0, %v825_v32 }
 0x962   :  { %vm866_vm15 = vcmp.gt.f32.partialorder %v856_v53, 0.5 }
 0x963   :  { %v1528_v58 = vpop.xlane.xlu1 %853  ;;  %v867_v59 = vsel %vm866_vm15, -inf, %v863_v54 }
 0x964   :  { %vm857_vm0 = vcmp.eq.f32.partialorder %v1419_v5, %v1528_v58  ;;  %v870_v60 = vsel %vm652_vm5, %v867_v59, -inf }
 0x965   :  { %v858_v62 = vsel %vm857_vm0, 1.0, %v827_v40  ;;  %871 = vmax.xlane.f32.xlu0 %v870_v60 }
 0x966   :  { %vm868_vm1 = vcmp.gt.f32.partialorder %v858_v62, 0.5 }
 0x967   :  { %v869_v0 = vsel %vm868_vm1, -inf, %v865_v63 }
 0x968   :  { %v873_v1 = vsel %vm652_vm5, %v869_v0, -inf }
 0x969   :  { %874 = vmax.xlane.f32.xlu1 %v873_v1 }
 0x9f2   :  { %v872_v2 = vpop.xlane.xlu0 %871 }
 0x9f3   :  { %vm876_vm2 = vcmp.ge.f32.partialorder %v867_v59, %v872_v2  ;;  %v957_v2 = vld [vmem:[#allocation3 + $0xa] sm:$0x1] }
 0x9f4   :  { %v877_v3 = vsel %vm876_vm2, %v1419_v5, 128.0 }
 0x9f5   :  { %v878_v4 = vsel %vm652_vm5, %v877_v3, inf }
 0x9f6   :  { %879 = vmin.xlane.f32.xlu0 %v878_v4  ;;  %v875_v7 = vpop.xlane.xlu1 %874 }
 0x9f7   :  { %vm881_vm3 = vcmp.ge.f32.partialorder %v869_v0, %v875_v7 }
 0x9f8   :  { %v882_v8 = vsel %vm881_vm3, %v1419_v5, 128.0 }
 0x9f9   :  { %v883_v10 = vsel %vm652_vm5, %v882_v8, inf }
 0x9fa   :  { %884 = vmin.xlane.f32.xlu1 %v883_v10  ;;  %v958_v10 = vmul.f32 %v1411_v13, %v957_v2 }
 0xa83   :  { %v1539_v14 = vpop.xlane.xlu0 %879 }
 0xa84   :  { %vm886_vm4 = vcmp.eq.f32.partialorder %v1419_v5, %v1539_v14 }
 0xa85   :  { %v887_v17 = vsel %vm886_vm4, 1.0, %v856_v53 }
 0xa86   :  { %vm897_vm6 = vcmp.gt.f32.partialorder %v887_v17, 0.5 }
 0xa87   :  { %v1544_v21 = vpop.xlane.xlu1 %884  ;;  %v898_v22 = vsel %vm897_vm6, -inf, %v894_v18 }
 0xa88   :  { %vm888_vm7 = vcmp.eq.f32.partialorder %v1419_v5, %v1544_v21  ;;  %v901_v23 = vsel %vm652_vm5, %v898_v22, -inf }
 0xa89   :  { %v889_v24 = vsel %vm888_vm7, 1.0, %v858_v62  ;;  %902 = vmax.xlane.f32.xlu0 %v901_v23  ;;  %v955_v62 = vld [vmem:[#allocation2 + $0xa] sm:$0x1] }
 0xa8a   :  { %vm899_vm8 = vcmp.gt.f32.partialorder %v889_v24, 0.5  ;;  %v956_v1 = vmul.f32 %v1411_v13, %v955_v62 }
 0xa8b   :  { %v900_v26 = vsel %vm899_vm8, -inf, %v896_v25 }
 0xa8c   :  { %v904_v27 = vsel %vm652_vm5, %v900_v26, -inf }
 0xa8d   :  { %905 = vmax.xlane.f32.xlu1 %v904_v27 }
 0xb16   :  { %v903_v28 = vpop.xlane.xlu0 %902 }
 0xb17   :  { %vm907_vm9 = vcmp.ge.f32.partialorder %v898_v22, %v903_v28 }
 0xb18   :  { %v908_v29 = vsel %vm907_vm9, %v1419_v5, 128.0 }
 0xb19   :  { %v909_v30 = vsel %vm652_vm5, %v908_v29, inf }
 0xb1a   :  { %910 = vmin.xlane.f32.xlu0 %v909_v30  ;;  %v906_v32 = vpop.xlane.xlu1 %905  ;;  %v988_v30 = vld [vmem:[#allocation3 + $0xb] sm:$0x1] }
 0xb1b   :  { %vm912_vm10 = vcmp.ge.f32.partialorder %v900_v26, %v906_v32  ;;  %v986_v26 = vld [vmem:[#allocation2 + $0xb] sm:$0x1] }
 0xb1c   :  { %v913_v34 = vsel %vm912_vm10, %v1419_v5, 128.0  ;;  %v987_v29 = vmul.f32 %v1411_v13, %v986_v26  ;;  %v1050_v26 = vld [vmem:[#allocation3 + $0xd] sm:$0x1] }
 0xb1d   :  { %v914_v35 = vsel %vm652_vm5, %v913_v34, inf }
 0xb1e   :  { %915 = vmin.xlane.f32.xlu1 %v914_v35 }
 0xba7   :  { %v1555_v39 = vpop.xlane.xlu0 %910 }
 0xba8   :  { %vm917_vm11 = vcmp.eq.f32.partialorder %v1419_v5, %v1555_v39 }
 0xba9   :  { %v918_v40 = vsel %vm917_vm11, 1.0, %v887_v17 }
 0xbaa   :  { %vm928_vm12 = vcmp.gt.f32.partialorder %v918_v40, 0.5 }
 0xbab   :  { %v1560_v43 = vpop.xlane.xlu1 %915  ;;  %v929_v44 = vsel %vm928_vm12, -inf, %v925_v41 }
 0xbac   :  { %vm919_vm13 = vcmp.eq.f32.partialorder %v1419_v5, %v1560_v43  ;;  %v932_v45 = vsel %vm652_vm5, %v929_v44, -inf }
 0xbad   :  { %v920_v46 = vsel %vm919_vm13, 1.0, %v889_v24  ;;  %933 = vmax.xlane.f32.xlu0 %v932_v45 }
 0xbae   :  { %vm930_vm14 = vcmp.gt.f32.partialorder %v920_v46, 0.5 }
 0xbaf   :  { %v931_v48 = vsel %vm930_vm14, -inf, %v927_v47 }
 0xbb0   :  { %v935_v49 = vsel %vm652_vm5, %v931_v48, -inf }
 0xbb1   :  { %936 = vmax.xlane.f32.xlu1 %v935_v49 }
 0xc3a   :  { %v934_v50 = vpop.xlane.xlu0 %933 }
 0xc3b   :  { %vm938_vm15 = vcmp.ge.f32.partialorder %v929_v44, %v934_v50  ;;  %v1017_v50 = vld [vmem:[#allocation2 + $0xc] sm:$0x1] }
 0xc3c   :  { %v939_v53 = vsel %vm938_vm15, %v1419_v5, 128.0 }
 0xc3d   :  { %v940_v54 = vsel %vm652_vm5, %v939_v53, inf }
 0xc3e   :  { %941 = vmin.xlane.f32.xlu0 %v940_v54  ;;  %v937_v56 = vpop.xlane.xlu1 %936 }
 0xc3f   :  { %vm943_vm0 = vcmp.ge.f32.partialorder %v931_v48, %v937_v56  ;;  %v1018_v56 = vmul.f32 %v1411_v13, %v1017_v50 }
 0xc40   :  { %v944_v59 = vsel %vm943_vm0, %v1419_v5, 128.0 }
 0xc41   :  { %v945_v60 = vsel %vm652_vm5, %v944_v59, inf  ;;  %v1019_v59 = vld [vmem:[#allocation3 + $0xc] sm:$0x1] }
 0xc42   :  { %946 = vmin.xlane.f32.xlu1 %v945_v60  ;;  %v1020_v2 = vmul.f32 %v1411_v13, %v1019_v59 }
 0xccb   :  { %v1571_v63 = vpop.xlane.xlu0 %941 }
 0xccc   :  { %vm948_vm1 = vcmp.eq.f32.partialorder %v1419_v5, %v1571_v63 }
 0xccd   :  { %v949_v0 = vsel %vm948_vm1, 1.0, %v918_v40  ;;  %v989_v40 = vmul.f32 %v1411_v13, %v988_v30 }
 0xcce   :  { %vm959_vm2 = vcmp.gt.f32.partialorder %v949_v0, 0.5 }
 0xccf   :  { %v1576_v3 = vpop.xlane.xlu1 %946  ;;  %v960_v4 = vsel %vm959_vm2, -inf, %v956_v1 }
 0xcd0   :  { %vm950_vm3 = vcmp.eq.f32.partialorder %v1419_v5, %v1576_v3  ;;  %v963_v7 = vsel %vm652_vm5, %v960_v4, -inf }
 0xcd1   :  { %v951_v8 = vsel %vm950_vm3, 1.0, %v920_v46  ;;  %964 = vmax.xlane.f32.xlu0 %v963_v7 }
 0xcd2   :  { %vm961_vm4 = vcmp.gt.f32.partialorder %v951_v8, 0.5 }
 0xcd3   :  { %v962_v12 = vsel %vm961_vm4, -inf, %v958_v10 }
 0xcd4   :  { %v966_v17 = vsel %vm652_vm5, %v962_v12, -inf }
 0xcd5   :  { %967 = vmax.xlane.f32.xlu1 %v966_v17 }
 0xd5e   :  { %v965_v18 = vpop.xlane.xlu0 %964 }
 0xd5f   :  { %vm969_vm6 = vcmp.ge.f32.partialorder %v960_v4, %v965_v18 }
 0xd60   :  { %v970_v20 = vsel %vm969_vm6, %v1419_v5, 128.0 }
 0xd61   :  { %v971_v22 = vsel %vm652_vm5, %v970_v20, inf }
 0xd62   :  { %972 = vmin.xlane.f32.xlu0 %v971_v22  ;;  %v968_v23 = vpop.xlane.xlu1 %967  ;;  %v1048_v22 = vld [vmem:[#allocation2 + $0xd] sm:$0x1] }
 0xd63   :  { %vm974_vm7 = vcmp.ge.f32.partialorder %v962_v12, %v968_v23 }
 0xd64   :  { %v975_v24 = vsel %vm974_vm7, %v1419_v5, 128.0 }
 0xd65   :  { %v976_v25 = vsel %vm652_vm5, %v975_v24, inf }
 0xd66   :  { %977 = vmin.xlane.f32.xlu1 %v976_v25  ;;  %v1049_v25 = vmul.f32 %v1411_v13, %v1048_v22  ;;  %v1110_v22 = vld [vmem:[#allocation2 + $0xf] sm:$0x1] }
 0xdef   :  { %v1587_v27 = vpop.xlane.xlu0 %972 }
 0xdf0   :  { %vm979_vm8 = vcmp.eq.f32.partialorder %v1419_v5, %v1587_v27 }
 0xdf1   :  { %v980_v28 = vsel %vm979_vm8, 1.0, %v949_v0 }
 0xdf2   :  { %vm990_vm9 = vcmp.gt.f32.partialorder %v980_v28, 0.5 }
 0xdf3   :  { %v1592_v32 = vpop.xlane.xlu1 %977  ;;  %v991_v34 = vsel %vm990_vm9, -inf, %v987_v29 }
 0xdf4   :  { %vm981_vm10 = vcmp.eq.f32.partialorder %v1419_v5, %v1592_v32  ;;  %v994_v35 = vsel %vm652_vm5, %v991_v34, -inf }
 0xdf5   :  { %v982_v38 = vsel %vm981_vm10, 1.0, %v951_v8  ;;  %995 = vmax.xlane.f32.xlu0 %v994_v35  ;;  %v1051_v35 = vmul.f32 %v1411_v13, %v1050_v26  ;;  %v1111_v26 = vmul.f32 %v1411_v13, %v1110_v22 }
 0xdf6   :  { %vm992_vm11 = vcmp.gt.f32.partialorder %v982_v38, 0.5 }
 0xdf7   :  { %v993_v41 = vsel %vm992_vm11, -inf, %v989_v40 }
 0xdf8   :  { %v997_v42 = vsel %vm652_vm5, %v993_v41, -inf }
 0xdf9   :  { %998 = vmax.xlane.f32.xlu1 %v997_v42 }
 0xe82   :  { %v996_v44 = vpop.xlane.xlu0 %995 }
 0xe83   :  { %vm1000_vm12 = vcmp.ge.f32.partialorder %v991_v34, %v996_v44 }
 0xe84   :  { %v1001_v45 = vsel %vm1000_vm12, %v1419_v5, 128.0 }
 0xe85   :  { %v1002_v46 = vsel %vm652_vm5, %v1001_v45, inf }
 0xe86   :  { %1003 = vmin.xlane.f32.xlu0 %v1002_v46  ;;  %v999_v47 = vpop.xlane.xlu1 %998 }
 0xe87   :  { %vm1005_vm13 = vcmp.ge.f32.partialorder %v993_v41, %v999_v47 }
 0xe88   :  { %v1006_v48 = vsel %vm1005_vm13, %v1419_v5, 128.0 }
 0xe89   :  { %v1007_v49 = vsel %vm652_vm5, %v1006_v48, inf  ;;  %v1079_v48 = vld [vmem:[#allocation2 + $0xe] sm:$0x1] }
 0xe8a   :  { %1008 = vmin.xlane.f32.xlu1 %v1007_v49 }
 0xf13   :  { %v1603_v53 = vpop.xlane.xlu0 %1003 }
 0xf14   :  { %vm1010_vm14 = vcmp.eq.f32.partialorder %v1419_v5, %v1603_v53 }
 0xf15   :  { %v1011_v54 = vsel %vm1010_vm14, 1.0, %v980_v28 }
 0xf16   :  { %vm1021_vm15 = vcmp.gt.f32.partialorder %v1011_v54, 0.5 }
 0xf17   :  { %v1608_v60 = vpop.xlane.xlu1 %1008  ;;  %v1022_v62 = vsel %vm1021_vm15, -inf, %v1018_v56  ;;  %v1081_v56 = vld [vmem:[#allocation3 + $0xe] sm:$0x1] }
 0xf18   :  { %vm1012_vm0 = vcmp.eq.f32.partialorder %v1419_v5, %v1608_v60  ;;  %v1025_v0 = vsel %vm652_vm5, %v1022_v62, -inf }
 0xf19   :  { %v1013_v1 = vsel %vm1012_vm0, 1.0, %v982_v38  ;;  %1026 = vmax.xlane.f32.xlu0 %v1025_v0 }
 0xf1a   :  { %vm1023_vm1 = vcmp.gt.f32.partialorder %v1013_v1, 0.5 }
 0xf1b   :  { %v1024_v4 = vsel %vm1023_vm1, -inf, %v1020_v2  ;;  %v1082_v2 = vmul.f32 %v1411_v13, %v1081_v56 }
 0xf1c   :  { %v1028_v7 = vsel %vm652_vm5, %v1024_v4, -inf }
 0xf1d   :  { %1029 = vmax.xlane.f32.xlu1 %v1028_v7 }
 0xfa6   :  { %v1027_v8 = vpop.xlane.xlu0 %1026 }
 0xfa7   :  { %vm1031_vm2 = vcmp.ge.f32.partialorder %v1022_v62, %v1027_v8 }
 0xfa8   :  { %v1032_v10 = vsel %vm1031_vm2, %v1419_v5, 128.0 }
 0xfa9   :  { %v1033_v12 = vsel %vm652_vm5, %v1032_v10, inf }
 0xfaa   :  { %1034 = vmin.xlane.f32.xlu0 %v1033_v12  ;;  %v1030_v17 = vpop.xlane.xlu1 %1029 }
 0xfab   :  { %vm1036_vm3 = vcmp.ge.f32.partialorder %v1024_v4, %v1030_v17 }
 0xfac   :  { %v1037_v18 = vsel %vm1036_vm3, %v1419_v5, 128.0 }
 0xfad   :  { %v1038_v20 = vsel %vm652_vm5, %v1037_v18, inf }
 0xfae   :  { %1039 = vmin.xlane.f32.xlu1 %v1038_v20 }
0x1037   :  { %v1619_v23 = vpop.xlane.xlu0 %1034 }
0x1038   :  { %vm1041_vm4 = vcmp.eq.f32.partialorder %v1419_v5, %v1619_v23 }
0x1039   :  { %v1042_v24 = vsel %vm1041_vm4, 1.0, %v1011_v54  ;;  %v1080_v54 = vmul.f32 %v1411_v13, %v1079_v48 }
0x103a   :  { %vm1052_vm6 = vcmp.gt.f32.partialorder %v1042_v24, 0.5 }
0x103b   :  { %v1624_v28 = vpop.xlane.xlu1 %1039  ;;  %v1053_v29 = vsel %vm1052_vm6, -inf, %v1049_v25 }
0x103c   :  { %vm1043_vm7 = vcmp.eq.f32.partialorder %v1419_v5, %v1624_v28  ;;  %v1056_v30 = vsel %vm652_vm5, %v1053_v29, -inf }
0x103d   :  { %v1044_v34 = vsel %vm1043_vm7, 1.0, %v1013_v1  ;;  %1057 = vmax.xlane.f32.xlu0 %v1056_v30 }
0x103e   :  { %vm1054_vm8 = vcmp.gt.f32.partialorder %v1044_v34, 0.5 }
0x103f   :  { %v1055_v38 = vsel %vm1054_vm8, -inf, %v1051_v35  ;;  %vm673_vm8 = vcmp.eq.s32.totalorder %v1405_v11, 0 }
0x1040   :  { %v1059_v40 = vsel %vm652_vm5, %v1055_v38, -inf  ;;  %v675_v56 = vsel %vm673_vm8, %v1431_v61, 0.0 }
0x1041   :  { %1060 = vmax.xlane.f32.xlu1 %v1059_v40 }
0x10ca   :  { %v1058_v41 = vpop.xlane.xlu0 %1057 }
0x10cb   :  { %vm1062_vm9 = vcmp.ge.f32.partialorder %v1053_v29, %v1058_v41  ;;  %v1112_v29 = vld [vmem:[#allocation3 + $0xf] sm:$0x1] }
0x10cc   :  { %v1063_v42 = vsel %vm1062_vm9, %v1419_v5, 128.0  ;;  %v1113_v40 = vmul.f32 %v1411_v13, %v1112_v29  ;;  %vm704_vm9 = vcmp.eq.s32.totalorder %v1405_v11, 1  ;;  %v674_v13 = vsel %vm673_vm8, %v1425_v57, 0.0 }
0x10cd   :  { %v1064_v44 = vsel %vm652_vm5, %v1063_v42, inf }
0x10ce   :  { %1065 = vmin.xlane.f32.xlu0 %v1064_v44  ;;  %v1061_v45 = vpop.xlane.xlu1 %1060 }
0x10cf   :  { %vm1067_vm10 = vcmp.ge.f32.partialorder %v1055_v38, %v1061_v45 }
0x10d0   :  { %v1068_v46 = vsel %vm1067_vm10, %v1419_v5, 128.0  ;;  %vm735_vm10 = vcmp.eq.s32.totalorder %v1405_v11, 2 }
0x10d1   :  { %v1069_v47 = vsel %vm652_vm5, %v1068_v46, inf }
0x10d2   :  { %1070 = vmin.xlane.f32.xlu1 %v1069_v47 }
0x115b   :  { %v1635_v49 = vpop.xlane.xlu0 %1065 }
0x115c   :  { %vm1072_vm11 = vcmp.eq.f32.partialorder %v1419_v5, %v1635_v49 }
0x115d   :  { %v1073_v50 = vsel %vm1072_vm11, 1.0, %v1042_v24  ;;  %vm766_vm11 = vcmp.eq.s32.totalorder %v1405_v11, 3 }
0x115e   :  { %vm1083_vm12 = vcmp.gt.f32.partialorder %v1073_v50, 0.5 }
0x115f   :  { %v1640_v59 = vpop.xlane.xlu1 %1070  ;;  %v1084_v62 = vsel %vm1083_vm12, -inf, %v1080_v54  ;;  %v705_v54 = vsel %vm704_vm9, %v1443_v15, %v674_v13  ;;  %vm797_vm12 = vcmp.eq.s32.totalorder %v1405_v11, 4 }
0x1160   :  { %vm1074_vm13 = vcmp.eq.f32.partialorder %v1419_v5, %v1640_v59  ;;  %v1087_v0 = vsel %vm652_vm5, %v1084_v62, -inf }
0x1161   :  { %v1075_v1 = vsel %vm1074_vm13, 1.0, %v1044_v34  ;;  %1088 = vmax.xlane.f32.xlu0 %v1087_v0  ;;  %vm859_vm13 = vcmp.eq.s32.totalorder %v1405_v11, 6 }
0x1162   :  { %vm1085_vm14 = vcmp.gt.f32.partialorder %v1075_v1, 0.5 }
0x1163   :  { %v1086_v4 = vsel %vm1085_vm14, -inf, %v1082_v2  ;;  %vm890_vm14 = vcmp.eq.s32.totalorder %v1405_v11, 7 }
0x1164   :  { %v1090_v7 = vsel %vm652_vm5, %v1086_v4, -inf }
0x1165   :  { %1091 = vmax.xlane.f32.xlu1 %v1090_v7 }
0x11ee   :  { %v1089_v8 = vpop.xlane.xlu0 %1088 }
0x11ef   :  { %vm1093_vm15 = vcmp.ge.f32.partialorder %v1084_v62, %v1089_v8  ;;  %v706_v62 = vsel %vm704_vm9, %v1448_v19, %v675_v56 }
0x11f0   :  { %v1094_v10 = vsel %vm1093_vm15, %v1419_v5, 128.0  ;;  %v737_v57 = vsel %vm735_vm10, %v1464_v37, %v706_v62  ;;  %vm921_vm15 = vcmp.eq.s32.totalorder %v1405_v11, 8 }
0x11f1   :  { %v1095_v12 = vsel %vm652_vm5, %v1094_v10, inf  ;;  %v768_v15 = vsel %vm766_vm11, %v1480_v55, %v737_v57 }
0x11f2   :  { %1096 = vmin.xlane.f32.xlu0 %v1095_v12  ;;  %v1092_v17 = vpop.xlane.xlu1 %1091 }
0x11f3   :  { %vm1098_vm0 = vcmp.ge.f32.partialorder %v1086_v4, %v1092_v17 }
0x11f4   :  { %v1099_v18 = vsel %vm1098_vm0, %v1419_v5, 128.0  ;;  %vm952_vm0 = vcmp.eq.s32.totalorder %v1405_v11, 9 }
0x11f5   :  { %v1100_v20 = vsel %vm652_vm5, %v1099_v18, inf }
0x11f6   :  { %1101 = vmin.xlane.f32.xlu1 %v1100_v20 }
0x127f   :  { %v1651_v24 = vpop.xlane.xlu0 %1096 }
0x1280   :  { %vm1103_vm1 = vcmp.eq.f32.partialorder %v1419_v5, %v1651_v24 }
0x1281   :  { %v1104_v25 = vsel %vm1103_vm1, 1.0, %v1073_v50  ;;  %vm983_vm1 = vcmp.eq.s32.totalorder %v1405_v11, 10 }
0x1282   :  { %vm1114_vm2 = vcmp.gt.f32.partialorder %v1104_v25, 0.5 }
0x1283   :  { %v1656_v30 = vpop.xlane.xlu1 %1101  ;;  %v1115_v34 = vsel %vm1114_vm2, -inf, %v1111_v26  ;;  %vm1014_vm2 = vcmp.eq.s32.totalorder %v1405_v11, 11 }
0x1284   :  { %vm1105_vm3 = vcmp.eq.f32.partialorder %v1419_v5, %v1656_v30  ;;  %v1118_v35 = vsel %vm652_vm5, %v1115_v34, -inf }
0x1285   :  { %1119 = vmax.xlane.f32.xlu0 %v1118_v35  ;;  %v1106_v38 = vsel %vm1105_vm3, 1.0, %v1075_v1  ;;  %vm1045_vm3 = vcmp.eq.s32.totalorder %v1405_v11, 12 }
0x1286   :  { %vm1116_vm4 = vcmp.gt.f32.partialorder %v1106_v38, 0.5 }
0x1287   :  { %v1117_v41 = vsel %vm1116_vm4, -inf, %v1113_v40  ;;  %vm1076_vm4 = vcmp.eq.s32.totalorder %v1405_v11, 13 }
0x1288   :  { %v1121_v42 = vsel %vm652_vm5, %v1117_v41, -inf }
0x1289   :  { %1122 = vmax.xlane.f32.xlu1 %v1121_v42 }
0x1312   :  { %v1120_v44 = vpop.xlane.xlu0 %1119 }
0x1313   :  { %vm1124_vm6 = vcmp.ge.f32.partialorder %v1115_v34, %v1120_v44 }
0x1314   :  { %v1125_v45 = vsel %vm1124_vm6, %v1419_v5, 128.0  ;;  %vm1107_vm6 = vcmp.eq.s32.totalorder %v1405_v11, 14 }
0x1315   :  { %v1126_v46 = vsel %vm652_vm5, %v1125_v45, inf }
0x1316   :  { %1127 = vmin.xlane.f32.xlu0 %v1126_v46  ;;  %v1123_v47 = vpop.xlane.xlu1 %1122 }
0x1317   :  { %vm1129_vm7 = vcmp.ge.f32.partialorder %v1117_v41, %v1123_v47 }
0x1318   :  { %v1130_v48 = vsel %vm1129_vm7, %v1419_v5, 128.0  ;;  %v736_v5 = vsel %vm735_vm10, %v1459_v33, %v705_v54  ;;  %v799_v33 = vsel %vm797_vm12, %v1496_v16, %v768_v15  ;;  %vm1134_vm7 = vcmp.eq.s32.totalorder %v1405_v11, 15 }
0x1319   :  { %v1131_v50 = vsel %vm652_vm5, %v1130_v48, inf  ;;  %vm828_vm5 = vcmp.eq.s32.totalorder %v1405_v11, 5  ;;  %v767_v0 = vsel %vm766_vm11, %v1475_v51, %v736_v5 }
0x131a   :  { %1132 = vmin.xlane.f32.xlu1 %v1131_v50  ;;  %v798_v1 = vsel %vm797_vm12, %v1491_v9, %v767_v0  ;;  %v830_v51 = vsel %vm828_vm5, %v1512_v36, %v799_v33 }
0x131b   :  { %v829_v61 = vsel %vm828_vm5, %v1507_v31, %v798_v1  ;;  %v861_v9 = vsel %vm859_vm13, %v1528_v58, %v830_v51 }
0x131c   :  { %v860_v19 = vsel %vm859_vm13, %v1523_v52, %v829_v61  ;;  %v892_v31 = vsel %vm890_vm14, %v1544_v21, %v861_v9 }
0x131d   :  { %v891_v37 = vsel %vm890_vm14, %v1539_v14, %v860_v19  ;;  %v923_v52 = vsel %vm921_vm15, %v1560_v43, %v892_v31  ;;  %v1138_v14 = vshrl.u32 %v640_v6, 7 }
0x131e   :  { %v922_v55 = vsel %vm921_vm15, %v1555_v39, %v891_v37  ;;  %v954_v58 = vsel %vm952_vm0, %v1576_v3, %v923_v52 }
0x131f   :  { %v953_v16 = vsel %vm952_vm0, %v1571_v63, %v922_v55  ;;  %v985_v21 = vsel %vm983_vm1, %v1592_v32, %v954_v58  ;;  %v1142_v3 = vsub.s32 0, %v1138_v14  ;;  %vm1139_vm8 = vcmp.eq.s32.totalorder %v1138_v14, 0 }
0x1320   :  { %v984_v36 = vsel %vm983_vm1, %v1587_v27, %v953_v16  ;;  %v1016_v43 = vsel %vm1014_vm2, %v1608_v60, %v985_v21 }
0x1321   :  { %v1015_v39 = vsel %vm1014_vm2, %v1603_v53, %v984_v36  ;;  %v1047_v4 = vsel %vm1045_vm3, %v1624_v28, %v1016_v43 }
0x1322   :  { %v1046_v63 = vsel %vm1045_vm3, %v1619_v23, %v1015_v39  ;;  %v1078_v53 = vsel %vm1076_vm4, %v1640_v59, %v1047_v4 }
0x1323   :  { %v1077_v27 = vsel %vm1076_vm4, %v1635_v49, %v1046_v63  ;;  %v1109_v8 = vsel %vm1107_vm6, %v1656_v30, %v1078_v53 }
0x1324   :  { %v1108_v6 = vsel %vm1107_vm6, %v1651_v24, %v1077_v27 }
0x13a3   :  { %v1128_v2 = vpop.xlane.xlu0 %1127 }
0x13a4   :  { %v1135_v7 = vsel %vm1134_vm7, %v1128_v2, %v1108_v6 }
0x13a5   :  { %v1143_v10 = vrot.slane %v1135_v7, %v1142_v3 }
0x13a7   :  { %v1133_v32 = vpop.xlane.xlu1 %1132 }
0x13a8   :  { %v1136_v23 = vsel %vm1134_vm7, %v1133_v32, %v1109_v8 }
0x13a9   :  { %v1147_v11 = vrot.slane %v1136_v23, %v1142_v3 }
0x13ab   :  { %v1148_v12 = vsel %vm1139_vm8, %v1143_v10, %v1147_v11 }
0x13ac   :  { %v1307_v17 = vtrunc.f32 %v1148_v12 }
0x13ae   :  { %v1308_v60 = vcvt.f32.s32 %v1307_v17 }
0x13b0   :  { %1150 = vst [vmem:[%s1720_s3] sm:$0x3] %v1308_v60 }

</bundles_post_ra>
